<compile_context>
chip_gen: v6e
topology: v6e:2x2x1
jax: 0.10.0
libtpu: 0.0.40
codegen_flags: <defaults>
</compile_context>

<pallas_src>
import functools

import jax
import jax.numpy as jnp
from jax.experimental import pallas as pl
from jax.experimental.pallas import tpu as pltpu


# ---------------------------------------------------------------------------
# small helpers
# ---------------------------------------------------------------------------
def _round_up(v, m):
    return ((v + m - 1) // m) * m


def _pick_gate_block(gates, max_block):
    """Largest multiple-of-128 divisor of `gates` that is <= max_block."""
    if gates <= max_block:
        return gates
    start = max_block - (max_block % 128)
    for cand in range(start, 127, -128):
        if gates % cand == 0:
            return cand
    return gates  # fall back to the full extent (always legal)


def _vmem_limit_bytes(needed):
    """Clamp a computed VMEM need to [32 MiB, physical - 4 MiB headroom]."""
    phys = 64 * 1024 * 1024
    try:
        phys = int(pltpu.get_tpu_info().vmem_capacity_bytes)
    except Exception:
        pass
    lo = 32 * 1024 * 1024
    hi = max(phys - 4 * 1024 * 1024, lo)
    return int(min(max(int(needed * 1.25), lo), hi))


# ---------------------------------------------------------------------------
# Kernel 1: batch-parallel input projection
#   gi = x @ W_ih_cat + (b_ih + [b_hr, b_hz, 0])      (emitted in compute dtype)
# ---------------------------------------------------------------------------
def _input_proj_kernel(x_ref, w_ref, b_ref, gi_ref):
    gi_ref[...] = (
        jnp.dot(x_ref[...], w_ref[...], preferred_element_type=jnp.float32)
        + b_ref[...]
    ).astype(gi_ref.dtype)


def _input_projection(x2d, w_cat, b_row, *, out_dtype,
                      row_block=512, gate_block_max=3072):
    rows, feat = x2d.shape
    gates = w_cat.shape[1]

    # Row tiling: multiple of 16 (covers bf16 sublane packing), pad the tail
    # instead of falling back to a whole-array block.
    row_block = min(row_block, _round_up(rows, 16))
    rows_p = _round_up(rows, row_block)
    if rows_p != rows:
        x2d = jnp.pad(x2d, ((0, rows_p - rows), (0, 0)))

    # Gate tiling keeps the weight tile well under the scoped VMEM budget at
    # production size (2048 x 3072 bf16 = 12 MiB).
    gate_block = _pick_gate_block(gates, gate_block_max)

    in_b = jnp.dtype(x2d.dtype).itemsize
    w_b = jnp.dtype(w_cat.dtype).itemsize
    o_b = jnp.dtype(out_dtype).itemsize
    need = (2 * (row_block * feat * in_b
                 + feat * gate_block * w_b
                 + row_block * gate_block * o_b)
            + 2 * gate_block * 4
            + (1 << 20))

    gi = pl.pallas_call(
        _input_proj_kernel,
        out_shape=jax.ShapeDtypeStruct((rows_p, gates), out_dtype),
        grid=(rows_p // row_block, gates // gate_block),
        in_specs=[
            pl.BlockSpec((row_block, feat), lambda r, g: (r, 0)),
            pl.BlockSpec((feat, gate_block), lambda r, g: (0, g)),
            pl.BlockSpec((1, gate_block), lambda r, g: (0, g)),
        ],
        out_specs=pl.BlockSpec((row_block, gate_block), lambda r, g: (r, g)),
        compiler_params=pltpu.CompilerParams(
            dimension_semantics=("parallel", "parallel"),
            vmem_limit_bytes=_vmem_limit_bytes(need)),
    )(x2d, w_cat, b_row)
    return gi[:rows] if rows_p != rows else gi


# ---------------------------------------------------------------------------
# Kernel 2: serial GRU recurrence (+ residual), batch-parallel / time-serial
# ---------------------------------------------------------------------------
def _gru_scan_kernel(gi_ref, x_ref, bhn_ref, wh_ref, y_ref, h_scr,
                     *, use_residual):
    """Processes one (N_BLK, T_BLK) block of the sequence.

    gi_ref : (N_BLK, T_BLK, 3H) compute dtype, precomputed input projections
             with b_ih + b_hr/b_hz already folded in.
    x_ref  : (N_BLK, T_BLK, F)  compute dtype, raw input (residual add).
    bhn_ref: (1, H) f32, hidden bias of the n-gate (must stay per-step).
    wh_ref : (H, 3H) fused hidden->hidden weight; constant block index, so the
             pipeliner fetches it once per core and never re-copies it.
    y_ref  : (N_BLK, T_BLK, H) f32 output block.
    h_scr  : (N_BLK, H) f32 hidden-state carry across time blocks.
    """
    # New batch block -> reset the hidden state (fresh sequence).
    @pl.when(pl.program_id(1) == 0)
    def _reset():
        h_scr[...] = jnp.zeros_like(h_scr)

    t_blk = gi_ref.shape[1]
    hidden = h_scr.shape[1]
    bhn = bhn_ref[...]                      # (1, H) f32
    wh = wh_ref[...]                        # (H, 3H) compute dtype
    h = h_scr[...]                          # (N_BLK, H) f32

    # Fully unrolled time loop (t_blk is a compile-time constant).
    for t in range(t_blk):
        gi_t = gi_ref[:, t, :].astype(jnp.float32)      # (N_BLK, 3H)
        # Single fused hidden-gate matmul; f32 accumulation on the MXU.
        gh = jnp.dot(h.astype(wh.dtype), wh,
                     preferred_element_type=jnp.float32)
        # Gate elementwise math in f32 (v5e has no bf16 VPU/EUP path).
        r = jax.nn.sigmoid(gi_t[:, :hidden] + gh[:, :hidden])
        z = jax.nn.sigmoid(gi_t[:, hidden:2 * hidden]
                           + gh[:, hidden:2 * hidden])
        n = jnp.tanh(gi_t[:, 2 * hidden:] + r * (gh[:, 2 * hidden:] + bhn))
        h = n + z * (h - n)                 # == (1-z)*n + z*h
        if use_residual:
            out = h + x_ref[:, t, :].astype(jnp.float32)
        else:
            out = h
        y_ref[:, t, :] = out.astype(y_ref.dtype)

    h_scr[...] = h


# ---------------------------------------------------------------------------
# Parameter preparation (ONCE, outside the jitted forward)
# ---------------------------------------------------------------------------
def prepare_params(torch_params, *, compute_dtype=jnp.bfloat16):
    """PyTorch nn.GRU layout -> kernel layout (gate order r, z, n).

    weight_ih_l0 (3H, F), weight_hh_l0 (3H, H), bias_ih_l0 (3H,),
    bias_hh_l0 (3H,).  Returns contraction-major, gate-concatenated weights
    (optionally bf16) plus f32 bias rows with b_ih + b_hr/b_hz folded together.
    """
    w_ih = jnp.asarray(torch_params["w_ih"], jnp.float32)   # (3H, F)
    w_hh = jnp.asarray(torch_params["w_hh"], jnp.float32)   # (3H, H)
    b_ih = jnp.asarray(torch_params["b_ih"], jnp.float32)   # (3H,)
    b_hh = jnp.asarray(torch_params["b_hh"], jnp.float32)   # (3H,)
    hidden = w_hh.shape[1]
    # Fold b_ih and the r/z parts of b_hh into the parallel projection; only
    # b_hn must remain on the serial path (it is multiplied by the r gate).
    b_gi = b_ih + jnp.concatenate(
        [b_hh[:2 * hidden], jnp.zeros((hidden,), jnp.float32)])
    return {
        "w_ih_cat": jnp.asarray(w_ih.T, compute_dtype),      # (F, 3H)
        "w_hh_cat": jnp.asarray(w_hh.T, compute_dtype),      # (H, 3H)
        "b_gi_row": b_gi.reshape(1, 3 * hidden),              # (1, 3H) f32
        "b_hn_row": b_hh[2 * hidden:].reshape(1, hidden),      # (1, H)  f32
    }


# ---------------------------------------------------------------------------
# Forward pass (TemporalEncoder.forward, default config)
# ---------------------------------------------------------------------------
def temporal_encoder_forward(x, prepared, *, use_residual=True,
                             t_block=16, n_block=None,
                             row_block=512, gate_block_max=3072):
    """x: (N, T, F) batch-major (PyTorch layout). Returns (N, T, H) f32."""
    N, T, F = x.shape
    w_ih_cat = prepared["w_ih_cat"]          # (F, 3H)
    w_hh_cat = prepared["w_hh_cat"]          # (H, 3H)
    b_gi_row = prepared["b_gi_row"]          # (1, 3H) f32
    b_hn_row = prepared["b_hn_row"]          # (1, H)  f32
    gates = w_hh_cat.shape[1]
    hidden = gates // 3
    residual = use_residual and (hidden == F)

    compute_dtype = w_hh_cat.dtype
    cbytes = jnp.dtype(compute_dtype).itemsize
    # Trailing (t_block, channels) block dims: sublane granularity is 8 for
    # f32, 16 for packed bf16.
    sub = 16 if cbytes == 2 else 8

    if n_block is None:
        n_block = min(N, 256)                # fill MXU M rows, batch permitting
    assert N % n_block == 0, "batch must be divisible by n_block"
    assert T % t_block == 0, "sequence length must be divisible by t_block"
    assert (t_block % sub == 0) or (t_block == T), \
        f"t_block must be a multiple of {sub} (or the full T)"

    # Keep activations in the compute dtype end-to-end (no f32 materialization
    # of x; at production the input is already bf16 and this cast is a no-op).
    x_c = x if x.dtype == compute_dtype else x.astype(compute_dtype)

    # --- (1) input projection: batch-parallel matmul, off the serial path.
    gi = _input_projection(x_c.reshape(N * T, F), w_ih_cat, b_gi_row,
                           out_dtype=compute_dtype, row_block=row_block,
                           gate_block_max=gate_block_max)
    gi = gi.reshape(N, T, gates)

    # --- (2) serial recurrence: batch-parallel grid axis (megacore on v7x),
    #         T-blocked "arbitrary" time axis with a VMEM hidden-state carry.
    act_tiles = (n_block * t_block * (gates + F) * cbytes      # gi + x tiles
                 + n_block * t_block * hidden * 4)             # y tile (f32)
    need = (2 * act_tiles                                      # double buffer
            + 2 * hidden * gates * cbytes                      # W_hh alloc
            + n_block * hidden * 4                             # h carry
            + 8 * n_block * gates * 4                          # gate temps
            + (1 << 20))
    kernel = functools.partial(_gru_scan_kernel, use_residual=residual)
    y = pl.pallas_call(
        kernel,
        # y stays f32 here; emit compute_dtype instead if downstream allows.
        out_shape=jax.ShapeDtypeStruct((N, T, hidden), jnp.float32),
        grid=(N // n_block, T // t_block),
        in_specs=[
            pl.BlockSpec((n_block, t_block, gates), lambda b, t: (b, t, 0)),
            pl.BlockSpec((n_block, t_block, F), lambda b, t: (b, t, 0)),
            pl.BlockSpec((1, hidden), lambda b, t: (0, 0)),
            # Constant block index: fetched once per core by the pipeliner,
            # never re-copied across batch/time blocks, never a blocking wait.
            pl.BlockSpec((hidden, gates), lambda b, t: (0, 0)),
        ],
        out_specs=pl.BlockSpec((n_block, t_block, hidden),
                               lambda b, t: (b, t, 0)),
        scratch_shapes=[
            pltpu.VMEM((n_block, hidden), jnp.float32),   # hidden carry
        ],
        compiler_params=pltpu.CompilerParams(
            dimension_semantics=("parallel", "arbitrary"),
            vmem_limit_bytes=_vmem_limit_bytes(need)),
    )(gi, x_c, b_hn_row, w_hh_cat)
    return y


# ---------------------------------------------------------------------------
# Pure-JAX reference of the PyTorch module (for correctness check)
# ---------------------------------------------------------------------------
def _reference_forward(x, params, *, use_residual=True):
    N, T, F = x.shape
    H = params["w_hh"].shape[1]
    w_ih, w_hh = params["w_ih"], params["w_hh"]
    b_ih, b_hh = params["b_ih"], params["b_hh"]
    x_tm = jnp.transpose(x, (1, 0, 2))  # (T, N, F)

    def step(h, x_t):
        gi = x_t @ w_ih.T + b_ih
        gh = h @ w_hh.T + b_hh
        i_r, i_z, i_n = gi[:, :H], gi[:, H:2 * H], gi[:, 2 * H:]
        h_r, h_z, h_n = gh[:, :H], gh[:, H:2 * H], gh[:, 2 * H:]
        r = jax.nn.sigmoid(i_r + h_r)
        z = jax.nn.sigmoid(i_z + h_z)
        n = jnp.tanh(i_n + r * h_n)
        h_new = (1.0 - z) * n + z * h
        return h_new, h_new

    h0 = jnp.zeros((N, H), jnp.float32)
    _, y_tm = jax.lax.scan(step, h0, x_tm)
    if use_residual and H == F:
        y_tm = y_tm + x_tm
    return jnp.transpose(y_tm, (1, 0, 2))


if __name__ == "__main__":
    # Small synthetic shapes (real module: F = H = 2048, larger N/T).
    # N=8 / n_block=4 -> 2 batch blocks (exercises weight revisit);
    # T=32 / t_block=16 -> 2 time blocks (exercises the hidden-state carry).
    N, T, F = 8, 32, 32
    H = 32  # hidden == input feature size -> residual branch is active

    key = jax.random.PRNGKey(0)
    kx, k1, k2, k3, k4 = jax.random.split(key, 5)
    bound = 1.0 / float(jnp.sqrt(H))  # PyTorch nn.GRU default init range
    params = {
        "w_ih": jax.random.uniform(k1, (3 * H, F), jnp.float32, -bound, bound),
        "w_hh": jax.random.uniform(k2, (3 * H, H), jnp.float32, -bound, bound),
        "b_ih": jax.random.uniform(k3, (3 * H,), jnp.float32, -bound, bound),
        "b_hh": jax.random.uniform(k4, (3 * H,), jnp.float32, -bound, bound),
    }
    x = jax.random.normal(kx, (N, T, F), jnp.float32)

    y_ref = _reference_forward(x, params, use_residual=True)

    fwd = jax.jit(functools.partial(temporal_encoder_forward,
                                    use_residual=True, t_block=16, n_block=4))

    # f32-weight path: exact-semantics check.
    prep_f32 = prepare_params(params, compute_dtype=jnp.float32)
    y_f32 = jax.block_until_ready(fwd(x, prep_f32))
    assert y_f32.shape == (N, T, H)
    assert jnp.allclose(y_f32, y_ref, atol=2e-4, rtol=2e-4), "f32 mismatch"

    # bf16 activation/weight path (half the HBM traffic for gi/x and half the
    # weight bytes; f32 MXU accumulation + f32 gate math): loose tolerance.
    prep_bf16 = prepare_params(params, compute_dtype=jnp.bfloat16)
    y_bf16 = jax.block_until_ready(fwd(x, prep_bf16))
    assert y_bf16.shape == (N, T, H)
    assert jnp.allclose(y_bf16, y_ref, atol=1.5e-1, rtol=1.5e-1), "bf16 mismatch"

    print("KERNEL_OK")
</pallas_src>

<mosaic_0001>
module attributes {stable_mosaic.version = 11 : i64} {
  func.func @_input_proj_kernel(%arg0: i32, %arg1: i32, %arg2: memref<256x32xf32, #tpu.memory_space<vmem>>, %arg3: memref<32x96xf32, #tpu.memory_space<vmem>>, %arg4: memref<1x96xf32, #tpu.memory_space<vmem>>, %arg5: memref<256x96xf32, #tpu.memory_space<vmem>>) attributes {dimension_semantics = [#tpu.dimension_semantics<parallel>, #tpu.dimension_semantics<parallel>], iteration_bounds = array<i64: 1, 1>, scalar_prefetch = 0 : i64, scratch_operands = 0 : i64, tpu.core_type = #tpu.core_type<tc>, window_params = [{transform_indices = @transform_0, window_bounds = array<i64: 256, 32>}, {transform_indices = @transform_1, window_bounds = array<i64: 32, 96>}, {transform_indices = @transform_2, window_bounds = array<i64: 1, 96>}, {transform_indices = @transform_3, window_bounds = array<i64: 256, 96>}]} {
    %c0 = arith.constant 0 : index
    %c0_0 = arith.constant 0 : index
    %0 = vector.load %arg2[%c0, %c0_0] : memref<256x32xf32, #tpu.memory_space<vmem>>, vector<256x32xf32>
    %c0_1 = arith.constant 0 : index
    %c0_2 = arith.constant 0 : index
    %1 = vector.load %arg3[%c0_1, %c0_2] : memref<32x96xf32, #tpu.memory_space<vmem>>, vector<32x96xf32>
    %cst = arith.constant dense<0.000000e+00> : vector<256x96xf32>
    %2 = tpu.matmul %0, %1, %cst {dimension_numbers = #tpu.dot_dimension_numbers<[1], [0], [0], [1], [0, 0, 1, 1], [], []>} : vector<256x32xf32>, vector<32x96xf32>, vector<256x96xf32> -> vector<256x96xf32>
    %c0_3 = arith.constant 0 : index
    %c0_4 = arith.constant 0 : index
    %3 = vector.load %arg4[%c0_3, %c0_4] : memref<1x96xf32, #tpu.memory_space<vmem>>, vector<1x96xf32>
    %4 = vector.broadcast %3 : vector<1x96xf32> to vector<256x96xf32>
    %5 = arith.addf %2, %4 : vector<256x96xf32>
    %c0_5 = arith.constant 0 : index
    %c0_6 = arith.constant 0 : index
    %6 = vector.load %arg5[%c0_5, %c0_6] : memref<256x96xf32, #tpu.memory_space<vmem>>, vector<256x96xf32>
    tpu.vector_store %arg5[%c0_5, %c0_6], %5 {strides = array<i32>} : memref<256x96xf32, #tpu.memory_space<vmem>>, vector<256x96xf32>,
    return
  }
  func.func @transform_0(%arg0: i32, %arg1: i32) -> (i32, i32) {
    %c0_i32 = arith.constant 0 : i32
    %c0_i32_0 = arith.constant 0 : i32
    return %arg0, %c0_i32 : i32, i32
  }
  func.func @transform_1(%arg0: i32, %arg1: i32) -> (i32, i32) {
    %c0_i32 = arith.constant 0 : i32
    %c0_i32_0 = arith.constant 0 : i32
    return %c0_i32, %arg1 : i32, i32
  }
  func.func @transform_2(%arg0: i32, %arg1: i32) -> (i32, i32) {
    %c0_i32 = arith.constant 0 : i32
    %c0_i32_0 = arith.constant 0 : i32
    return %c0_i32, %arg1 : i32, i32
  }
  func.func @transform_3(%arg0: i32, %arg1: i32) -> (i32, i32) {
    %c0_i32 = arith.constant 0 : i32
    return %arg0, %arg1 : i32, i32
  }
}

module attributes {stable_mosaic.version = 11 : i64} {
  func.func @_gru_scan_kernel(%arg0: i32, %arg1: i32, %arg2: memref<4x16x96xf32, #tpu.memory_space<vmem>>, %arg3: memref<4x16x32xf32, #tpu.memory_space<vmem>>, %arg4: memref<1x32xf32, #tpu.memory_space<vmem>>, %arg5: memref<32x96xf32, #tpu.memory_space<vmem>>, %arg6: memref<4x16x32xf32, #tpu.memory_space<vmem>>, %arg7: memref<4x32xf32, #tpu.memory_space<vmem>>) attributes {dimension_semantics = [#tpu.dimension_semantics<parallel>, #tpu.dimension_semantics<arbitrary>], iteration_bounds = array<i64: 2, 2>, scalar_prefetch = 0 : i64, scratch_operands = 1 : i64, tpu.core_type = #tpu.core_type<tc>, window_params = [{transform_indices = @transform_0, window_bounds = array<i64: 4, 16, 96>}, {transform_indices = @transform_1, window_bounds = array<i64: 4, 16, 32>}, {pipeline_mode = #tpu.pipeline_mode<synchronous>, transform_indices = @transform_2, window_bounds = array<i64: 1, 32>}, {pipeline_mode = #tpu.pipeline_mode<synchronous>, transform_indices = @transform_3, window_bounds = array<i64: 32, 96>}, {transform_indices = @transform_4, window_bounds = array<i64: 4, 16, 32>}]} {
    %c0_i32 = arith.constant 0 : i32
    %0 = arith.cmpi eq, %arg1, %c0_i32 : i32
    %1 = arith.extui %0 : i1 to i32
    %c0_i32_0 = arith.constant 0 : i32
    %2 = arith.cmpi ne, %1, %c0_i32_0 : i32
    scf.if %2 {
      %cst_184 = arith.constant 0.000000e+00 : f32
      %567 = vector.broadcast %cst_184 : f32 to vector<4x32xf32>
      %c0_185 = arith.constant 0 : index
      %c0_186 = arith.constant 0 : index
      %568 = vector.load %arg7[%c0_185, %c0_186] : memref<4x32xf32, #tpu.memory_space<vmem>>, vector<4x32xf32>
      tpu.vector_store %arg7[%c0_185, %c0_186], %567 {strides = array<i32>} : memref<4x32xf32, #tpu.memory_space<vmem>>, vector<4x32xf32>,
    } else {
    }
    %c0 = arith.constant 0 : index
    %c0_1 = arith.constant 0 : index
    %3 = vector.load %arg4[%c0, %c0_1] : memref<1x32xf32, #tpu.memory_space<vmem>>, vector<1x32xf32>
    %c0_2 = arith.constant 0 : index
    %c0_3 = arith.constant 0 : index
    %4 = vector.load %arg5[%c0_2, %c0_3] : memref<32x96xf32, #tpu.memory_space<vmem>>, vector<32x96xf32>
    %c0_4 = arith.constant 0 : index
    %c0_5 = arith.constant 0 : index
    %5 = vector.load %arg7[%c0_4, %c0_5] : memref<4x32xf32, #tpu.memory_space<vmem>>, vector<4x32xf32>
    %c0_6 = arith.constant 0 : index
    %c0_7 = arith.constant 0 : index
    %c0_8 = arith.constant 0 : index
    %6 = vector.load %arg2[%c0_6, %c0_7, %c0_8] : memref<4x16x96xf32, #tpu.memory_space<vmem>>, vector<4x1x96xf32>
    %7 = vector.shape_cast %6 : vector<4x1x96xf32> to vector<4x96xf32>
    %cst = arith.constant dense<0.000000e+00> : vector<4x96xf32>
    %8 = tpu.matmul %5, %4, %cst {dimension_numbers = #tpu.dot_dimension_numbers<[1], [0], [0], [1], [0, 0, 1, 1], [], []>} : vector<4x32xf32>, vector<32x96xf32>, vector<4x96xf32> -> vector<4x96xf32>
    %9 = vector.extract_strided_slice %7 {offsets = [0, 0], sizes = [4, 32], strides = [1, 1]} : vector<4x96xf32> to vector<4x32xf32>
    %10 = vector.extract_strided_slice %8 {offsets = [0, 0], sizes = [4, 32], strides = [1, 1]} : vector<4x96xf32> to vector<4x32xf32>
    %11 = arith.addf %9, %10 : vector<4x32xf32>
    %12 = arith.negf %11 : vector<4x32xf32>
    %13 = math.exp %12 : vector<4x32xf32>
    %cst_9 = arith.constant 1.000000e+00 : f32
    %14 = vector.broadcast %cst_9 : f32 to vector<4x32xf32>
    %15 = arith.addf %14, %13 : vector<4x32xf32>
    %16 = arith.divf %14, %15 : vector<4x32xf32>
    %17 = vector.extract_strided_slice %7 {offsets = [0, 32], sizes = [4, 32], strides = [1, 1]} : vector<4x96xf32> to vector<4x32xf32>
    %18 = vector.extract_strided_slice %8 {offsets = [0, 32], sizes = [4, 32], strides = [1, 1]} : vector<4x96xf32> to vector<4x32xf32>
    %19 = arith.addf %17, %18 : vector<4x32xf32>
    %20 = arith.negf %19 : vector<4x32xf32>
    %21 = math.exp %20 : vector<4x32xf32>
    %cst_10 = arith.constant 1.000000e+00 : f32
    %22 = vector.broadcast %cst_10 : f32 to vector<4x32xf32>
    %23 = arith.addf %22, %21 : vector<4x32xf32>
    %24 = arith.divf %22, %23 : vector<4x32xf32>
    %25 = vector.extract_strided_slice %7 {offsets = [0, 64], sizes = [4, 32], strides = [1, 1]} : vector<4x96xf32> to vector<4x32xf32>
    %26 = vector.extract_strided_slice %8 {offsets = [0, 64], sizes = [4, 32], strides = [1, 1]} : vector<4x96xf32> to vector<4x32xf32>
    %27 = vector.broadcast %3 : vector<1x32xf32> to vector<4x32xf32>
    %28 = arith.addf %26, %27 : vector<4x32xf32>
    %29 = arith.mulf %16, %28 : vector<4x32xf32>
    %30 = arith.addf %25, %29 : vector<4x32xf32>
    %31 = math.tanh %30 : vector<4x32xf32>
    %32 = arith.subf %5, %31 : vector<4x32xf32>
    %33 = arith.mulf %24, %32 : vector<4x32xf32>
    %34 = arith.addf %31, %33 : vector<4x32xf32>
    %c0_11 = arith.constant 0 : index
    %c0_12 = arith.constant 0 : index
    %c0_13 = arith.constant 0 : index
    %35 = vector.load %arg3[%c0_11, %c0_12, %c0_13] : memref<4x16x32xf32, #tpu.memory_space<vmem>>, vector<4x1x32xf32>
    %36 = vector.shape_cast %35 : vector<4x1x32xf32> to vector<4x32xf32>
    %37 = arith.addf %34, %36 : vector<4x32xf32>
    %c0_14 = arith.constant 0 : index
    %c0_15 = arith.constant 0 : index
    %c0_16 = arith.constant 0 : index
    %38 = vector.load %arg6[%c0_14, %c0_15, %c0_16] : memref<4x16x32xf32, #tpu.memory_space<vmem>>, vector<4x1x32xf32>
    %39 = vector.shape_cast %38 : vector<4x1x32xf32> to vector<4x32xf32>
    %40 = vector.shape_cast %37 : vector<4x32xf32> to vector<4x1x32xf32>
    tpu.vector_store %arg6[%c0_14, %c0_15, %c0_16], %40 {strides = array<i32>} : memref<4x16x32xf32, #tpu.memory_space<vmem>>, vector<4x1x32xf32>,
    %c0_17 = arith.constant 0 : index
    %c1 = arith.constant 1 : index
    %c0_18 = arith.constant 0 : index
    %41 = vector.load %arg2[%c0_17, %c1, %c0_18] : memref<4x16x96xf32, #tpu.memory_space<vmem>>, vector<4x1x96xf32>
    %42 = vector.shape_cast %41 : vector<4x1x96xf32> to vector<4x96xf32>
    %cst_19 = arith.constant dense<0.000000e+00> : vector<4x96xf32>
    %43 = tpu.matmul %34, %4, %cst_19 {dimension_numbers = #tpu.dot_dimension_numbers<[1], [0], [0], [1], [0, 0, 1, 1], [], []>} : vector<4x32xf32>, vector<32x96xf32>, vector<4x96xf32> -> vector<4x96xf32>
    %44 = vector.extract_strided_slice %42 {offsets = [0, 0], sizes = [4, 32], strides = [1, 1]} : vector<4x96xf32> to vector<4x32xf32>
    %45 = vector.extract_strided_slice %43 {offsets = [0, 0], sizes = [4, 32], strides = [1, 1]} : vector<4x96xf32> to vector<4x32xf32>
    %46 = arith.addf %44, %45 : vector<4x32xf32>
    %47 = arith.negf %46 : vector<4x32xf32>
    %48 = math.exp %47 : vector<4x32xf32>
    %cst_20 = arith.constant 1.000000e+00 : f32
    %49 = vector.broadcast %cst_20 : f32 to vector<4x32xf32>
    %50 = arith.addf %49, %48 : vector<4x32xf32>
    %51 = arith.divf %49, %50 : vector<4x32xf32>
    %52 = vector.extract_strided_slice %42 {offsets = [0, 32], sizes = [4, 32], strides = [1, 1]} : vector<4x96xf32> to vector<4x32xf32>
    %53 = vector.extract_strided_slice %43 {offsets = [0, 32], sizes = [4, 32], strides = [1, 1]} : vector<4x96xf32> to vector<4x32xf32>
    %54 = arith.addf %52, %53 : vector<4x32xf32>
    %55 = arith.negf %54 : vector<4x32xf32>
    %56 = math.exp %55 : vector<4x32xf32>
    %cst_21 = arith.constant 1.000000e+00 : f32
    %57 = vector.broadcast %cst_21 : f32 to vector<4x32xf32>
    %58 = arith.addf %57, %56 : vector<4x32xf32>
    %59 = arith.divf %57, %58 : vector<4x32xf32>
    %60 = vector.extract_strided_slice %42 {offsets = [0, 64], sizes = [4, 32], strides = [1, 1]} : vector<4x96xf32> to vector<4x32xf32>
    %61 = vector.extract_strided_slice %43 {offsets = [0, 64], sizes = [4, 32], strides = [1, 1]} : vector<4x96xf32> to vector<4x32xf32>
    %62 = vector.broadcast %3 : vector<1x32xf32> to vector<4x32xf32>
    %63 = arith.addf %61, %62 : vector<4x32xf32>
    %64 = arith.mulf %51, %63 : vector<4x32xf32>
    %65 = arith.addf %60, %64 : vector<4x32xf32>
    %66 = math.tanh %65 : vector<4x32xf32>
    %67 = arith.subf %34, %66 : vector<4x32xf32>
    %68 = arith.mulf %59, %67 : vector<4x32xf32>
    %69 = arith.addf %66, %68 : vector<4x32xf32>
    %c0_22 = arith.constant 0 : index
    %c1_23 = arith.constant 1 : index
    %c0_24 = arith.constant 0 : index
    %70 = vector.load %arg3[%c0_22, %c1_23, %c0_24] : memref<4x16x32xf32, #tpu.memory_space<vmem>>, vector<4x1x32xf32>
    %71 = vector.shape_cast %70 : vector<4x1x32xf32> to vector<4x32xf32>
    %72 = arith.addf %69, %71 : vector<4x32xf32>
    %c0_25 = arith.constant 0 : index
    %c1_26 = arith.constant 1 : index
    %c0_27 = arith.constant 0 : index
    %73 = vector.load %arg6[%c0_25, %c1_26, %c0_27] : memref<4x16x32xf32, #tpu.memory_space<vmem>>, vector<4x1x32xf32>
    %74 = vector.shape_cast %73 : vector<4x1x32xf32> to vector<4x32xf32>
    %75 = vector.shape_cast %72 : vector<4x32xf32> to vector<4x1x32xf32>
    tpu.vector_store %arg6[%c0_25, %c1_26, %c0_27], %75 {strides = array<i32>} : memref<4x16x32xf32, #tpu.memory_space<vmem>>, vector<4x1x32xf32>,
    %c0_28 = arith.constant 0 : index
    %c2 = arith.constant 2 : index
    %c0_29 = arith.constant 0 : index
    %76 = vector.load %arg2[%c0_28, %c2, %c0_29] : memref<4x16x96xf32, #tpu.memory_space<vmem>>, vector<4x1x96xf32>
    %77 = vector.shape_cast %76 : vector<4x1x96xf32> to vector<4x96xf32>
    %cst_30 = arith.constant dense<0.000000e+00> : vector<4x96xf32>
    %78 = tpu.matmul %69, %4, %cst_30 {dimension_numbers = #tpu.dot_dimension_numbers<[1], [0], [0], [1], [0, 0, 1, 1], [], []>} : vector<4x32xf32>, vector<32x96xf32>, vector<4x96xf32> -> vector<4x96xf32>
    %79 = vector.extract_strided_slice %77 {offsets = [0, 0], sizes = [4, 32], strides = [1, 1]} : vector<4x96xf32> to vector<4x32xf32>
    %80 = vector.extract_strided_slice %78 {offsets = [0, 0], sizes = [4, 32], strides = [1, 1]} : vector<4x96xf32> to vector<4x32xf32>
    %81 = arith.addf %79, %80 : vector<4x32xf32>
    %82 = arith.negf %81 : vector<4x32xf32>
    %83 = math.exp %82 : vector<4x32xf32>
    %cst_31 = arith.constant 1.000000e+00 : f32
    %84 = vector.broadcast %cst_31 : f32 to vector<4x32xf32>
    %85 = arith.addf %84, %83 : vector<4x32xf32>
    %86 = arith.divf %84, %85 : vector<4x32xf32>
    %87 = vector.extract_strided_slice %77 {offsets = [0, 32], sizes = [4, 32], strides = [1, 1]} : vector<4x96xf32> to vector<4x32xf32>
    %88 = vector.extract_strided_slice %78 {offsets = [0, 32], sizes = [4, 32], strides = [1, 1]} : vector<4x96xf32> to vector<4x32xf32>
    %89 = arith.addf %87, %88 : vector<4x32xf32>
    %90 = arith.negf %89 : vector<4x32xf32>
    %91 = math.exp %90 : vector<4x32xf32>
    %cst_32 = arith.constant 1.000000e+00 : f32
    %92 = vector.broadcast %cst_32 : f32 to vector<4x32xf32>
    %93 = arith.addf %92, %91 : vector<4x32xf32>
    %94 = arith.divf %92, %93 : vector<4x32xf32>
    %95 = vector.extract_strided_slice %77 {offsets = [0, 64], sizes = [4, 32], strides = [1, 1]} : vector<4x96xf32> to vector<4x32xf32>
    %96 = vector.extract_strided_slice %78 {offsets = [0, 64], sizes = [4, 32], strides = [1, 1]} : vector<4x96xf32> to vector<4x32xf32>
    %97 = vector.broadcast %3 : vector<1x32xf32> to vector<4x32xf32>
    %98 = arith.addf %96, %97 : vector<4x32xf32>
    %99 = arith.mulf %86, %98 : vector<4x32xf32>
    %100 = arith.addf %95, %99 : vector<4x32xf32>
    %101 = math.tanh %100 : vector<4x32xf32>
    %102 = arith.subf %69, %101 : vector<4x32xf32>
    %103 = arith.mulf %94, %102 : vector<4x32xf32>
    %104 = arith.addf %101, %103 : vector<4x32xf32>
    %c0_33 = arith.constant 0 : index
    %c2_34 = arith.constant 2 : index
    %c0_35 = arith.constant 0 : index
    %105 = vector.load %arg3[%c0_33, %c2_34, %c0_35] : memref<4x16x32xf32, #tpu.memory_space<vmem>>, vector<4x1x32xf32>
    %106 = vector.shape_cast %105 : vector<4x1x32xf32> to vector<4x32xf32>
    %107 = arith.addf %104, %106 : vector<4x32xf32>
    %c0_36 = arith.constant 0 : index
    %c2_37 = arith.constant 2 : index
    %c0_38 = arith.constant 0 : index
    %108 = vector.load %arg6[%c0_36, %c2_37, %c0_38] : memref<4x16x32xf32, #tpu.memory_space<vmem>>, vector<4x1x32xf32>
    %109 = vector.shape_cast %108 : vector<4x1x32xf32> to vector<4x32xf32>
    %110 = vector.shape_cast %107 : vector<4x32xf32> to vector<4x1x32xf32>
    tpu.vector_store %arg6[%c0_36, %c2_37, %c0_38], %110 {strides = array<i32>} : memref<4x16x32xf32, #tpu.memory_space<vmem>>, vector<4x1x32xf32>,
    %c0_39 = arith.constant 0 : index
    %c3 = arith.constant 3 : index
    %c0_40 = arith.constant 0 : index
    %111 = vector.load %arg2[%c0_39, %c3, %c0_40] : memref<4x16x96xf32, #tpu.memory_space<vmem>>, vector<4x1x96xf32>
    %112 = vector.shape_cast %111 : vector<4x1x96xf32> to vector<4x96xf32>
    %cst_41 = arith.constant dense<0.000000e+00> : vector<4x96xf32>
    %113 = tpu.matmul %104, %4, %cst_41 {dimension_numbers = #tpu.dot_dimension_numbers<[1], [0], [0], [1], [0, 0, 1, 1], [], []>} : vector<4x32xf32>, vector<32x96xf32>, vector<4x96xf32> -> vector<4x96xf32>
    %114 = vector.extract_strided_slice %112 {offsets = [0, 0], sizes = [4, 32], strides = [1, 1]} : vector<4x96xf32> to vector<4x32xf32>
    %115 = vector.extract_strided_slice %113 {offsets = [0, 0], sizes = [4, 32], strides = [1, 1]} : vector<4x96xf32> to vector<4x32xf32>
    %116 = arith.addf %114, %115 : vector<4x32xf32>
    %117 = arith.negf %116 : vector<4x32xf32>
    %118 = math.exp %117 : vector<4x32xf32>
    %cst_42 = arith.constant 1.000000e+00 : f32
    %119 = vector.broadcast %cst_42 : f32 to vector<4x32xf32>
    %120 = arith.addf %119, %118 : vector<4x32xf32>
    %121 = arith.divf %119, %120 : vector<4x32xf32>
    %122 = vector.extract_strided_slice %112 {offsets = [0, 32], sizes = [4, 32], strides = [1, 1]} : vector<4x96xf32> to vector<4x32xf32>
    %123 = vector.extract_strided_slice %113 {offsets = [0, 32], sizes = [4, 32], strides = [1, 1]} : vector<4x96xf32> to vector<4x32xf32>
    %124 = arith.addf %122, %123 : vector<4x32xf32>
    %125 = arith.negf %124 : vector<4x32xf32>
    %126 = math.exp %125 : vector<4x32xf32>
    %cst_43 = arith.constant 1.000000e+00 : f32
    %127 = vector.broadcast %cst_43 : f32 to vector<4x32xf32>
    %128 = arith.addf %127, %126 : vector<4x32xf32>
    %129 = arith.divf %127, %128 : vector<4x32xf32>
    %130 = vector.extract_strided_slice %112 {offsets = [0, 64], sizes = [4, 32], strides = [1, 1]} : vector<4x96xf32> to vector<4x32xf32>
    %131 = vector.extract_strided_slice %113 {offsets = [0, 64], sizes = [4, 32], strides = [1, 1]} : vector<4x96xf32> to vector<4x32xf32>
    %132 = vector.broadcast %3 : vector<1x32xf32> to vector<4x32xf32>
    %133 = arith.addf %131, %132 : vector<4x32xf32>
    %134 = arith.mulf %121, %133 : vector<4x32xf32>
    %135 = arith.addf %130, %134 : vector<4x32xf32>
    %136 = math.tanh %135 : vector<4x32xf32>
    %137 = arith.subf %104, %136 : vector<4x32xf32>
    %138 = arith.mulf %129, %137 : vector<4x32xf32>
    %139 = arith.addf %136, %138 : vector<4x32xf32>
    %c0_44 = arith.constant 0 : index
    %c3_45 = arith.constant 3 : index
    %c0_46 = arith.constant 0 : index
    %140 = vector.load %arg3[%c0_44, %c3_45, %c0_46] : memref<4x16x32xf32, #tpu.memory_space<vmem>>, vector<4x1x32xf32>
    %141 = vector.shape_cast %140 : vector<4x1x32xf32> to vector<4x32xf32>
    %142 = arith.addf %139, %141 : vector<4x32xf32>
    %c0_47 = arith.constant 0 : index
    %c3_48 = arith.constant 3 : index
    %c0_49 = arith.constant 0 : index
    %143 = vector.load %arg6[%c0_47, %c3_48, %c0_49] : memref<4x16x32xf32, #tpu.memory_space<vmem>>, vector<4x1x32xf32>
    %144 = vector.shape_cast %143 : vector<4x1x32xf32> to vector<4x32xf32>
    %145 = vector.shape_cast %142 : vector<4x32xf32> to vector<4x1x32xf32>
    tpu.vector_store %arg6[%c0_47, %c3_48, %c0_49], %145 {strides = array<i32>} : memref<4x16x32xf32, #tpu.memory_space<vmem>>, vector<4x1x32xf32>,
    %c0_50 = arith.constant 0 : index
    %c4 = arith.constant 4 : index
    %c0_51 = arith.constant 0 : index
    %146 = vector.load %arg2[%c0_50, %c4, %c0_51] : memref<4x16x96xf32, #tpu.memory_space<vmem>>, vector<4x1x96xf32>
    %147 = vector.shape_cast %146 : vector<4x1x96xf32> to vector<4x96xf32>
    %cst_52 = arith.constant dense<0.000000e+00> : vector<4x96xf32>
    %148 = tpu.matmul %139, %4, %cst_52 {dimension_numbers = #tpu.dot_dimension_numbers<[1], [0], [0], [1], [0, 0, 1, 1], [], []>} : vector<4x32xf32>, vector<32x96xf32>, vector<4x96xf32> -> vector<4x96xf32>
    %149 = vector.extract_strided_slice %147 {offsets = [0, 0], sizes = [4, 32], strides = [1, 1]} : vector<4x96xf32> to vector<4x32xf32>
    %150 = vector.extract_strided_slice %148 {offsets = [0, 0], sizes = [4, 32], strides = [1, 1]} : vector<4x96xf32> to vector<4x32xf32>
    %151 = arith.addf %149, %150 : vector<4x32xf32>
    %152 = arith.negf %151 : vector<4x32xf32>
    %153 = math.exp %152 : vector<4x32xf32>
    %cst_53 = arith.constant 1.000000e+00 : f32
    %154 = vector.broadcast %cst_53 : f32 to vector<4x32xf32>
    %155 = arith.addf %154, %153 : vector<4x32xf32>
    %156 = arith.divf %154, %155 : vector<4x32xf32>
    %157 = vector.extract_strided_slice %147 {offsets = [0, 32], sizes = [4, 32], strides = [1, 1]} : vector<4x96xf32> to vector<4x32xf32>
    %158 = vector.extract_strided_slice %148 {offsets = [0, 32], sizes = [4, 32], strides = [1, 1]} : vector<4x96xf32> to vector<4x32xf32>
    %159 = arith.addf %157, %158 : vector<4x32xf32>
    %160 = arith.negf %159 : vector<4x32xf32>
    %161 = math.exp %160 : vector<4x32xf32>
    %cst_54 = arith.constant 1.000000e+00 : f32
    %162 = vector.broadcast %cst_54 : f32 to vector<4x32xf32>
    %163 = arith.addf %162, %161 : vector<4x32xf32>
    %164 = arith.divf %162, %163 : vector<4x32xf32>
    %165 = vector.extract_strided_slice %147 {offsets = [0, 64], sizes = [4, 32], strides = [1, 1]} : vector<4x96xf32> to vector<4x32xf32>
    %166 = vector.extract_strided_slice %148 {offsets = [0, 64], sizes = [4, 32], strides = [1, 1]} : vector<4x96xf32> to vector<4x32xf32>
    %167 = vector.broadcast %3 : vector<1x32xf32> to vector<4x32xf32>
    %168 = arith.addf %166, %167 : vector<4x32xf32>
    %169 = arith.mulf %156, %168 : vector<4x32xf32>
    %170 = arith.addf %165, %169 : vector<4x32xf32>
    %171 = math.tanh %170 : vector<4x32xf32>
    %172 = arith.subf %139, %171 : vector<4x32xf32>
    %173 = arith.mulf %164, %172 : vector<4x32xf32>
    %174 = arith.addf %171, %173 : vector<4x32xf32>
    %c0_55 = arith.constant 0 : index
    %c4_56 = arith.constant 4 : index
    %c0_57 = arith.constant 0 : index
    %175 = vector.load %arg3[%c0_55, %c4_56, %c0_57] : memref<4x16x32xf32, #tpu.memory_space<vmem>>, vector<4x1x32xf32>
    %176 = vector.shape_cast %175 : vector<4x1x32xf32> to vector<4x32xf32>
    %177 = arith.addf %174, %176 : vector<4x32xf32>
    %c0_58 = arith.constant 0 : index
    %c4_59 = arith.constant 4 : index
    %c0_60 = arith.constant 0 : index
    %178 = vector.load %arg6[%c0_58, %c4_59, %c0_60] : memref<4x16x32xf32, #tpu.memory_space<vmem>>, vector<4x1x32xf32>
    %179 = vector.shape_cast %178 : vector<4x1x32xf32> to vector<4x32xf32>
    %180 = vector.shape_cast %177 : vector<4x32xf32> to vector<4x1x32xf32>
    tpu.vector_store %arg6[%c0_58, %c4_59, %c0_60], %180 {strides = array<i32>} : memref<4x16x32xf32, #tpu.memory_space<vmem>>, vector<4x1x32xf32>,
    %c0_61 = arith.constant 0 : index
    %c5 = arith.constant 5 : index
    %c0_62 = arith.constant 0 : index
    %181 = vector.load %arg2[%c0_61, %c5, %c0_62] : memref<4x16x96xf32, #tpu.memory_space<vmem>>, vector<4x1x96xf32>
    %182 = vector.shape_cast %181 : vector<4x1x96xf32> to vector<4x96xf32>
    %cst_63 = arith.constant dense<0.000000e+00> : vector<4x96xf32>
    %183 = tpu.matmul %174, %4, %cst_63 {dimension_numbers = #tpu.dot_dimension_numbers<[1], [0], [0], [1], [0, 0, 1, 1], [], []>} : vector<4x32xf32>, vector<32x96xf32>, vector<4x96xf32> -> vector<4x96xf32>
    %184 = vector.extract_strided_slice %182 {offsets = [0, 0], sizes = [4, 32], strides = [1, 1]} : vector<4x96xf32> to vector<4x32xf32>
    %185 = vector.extract_strided_slice %183 {offsets = [0, 0], sizes = [4, 32], strides = [1, 1]} : vector<4x96xf32> to vector<4x32xf32>
    %186 = arith.addf %184, %185 : vector<4x32xf32>
    %187 = arith.negf %186 : vector<4x32xf32>
    %188 = math.exp %187 : vector<4x32xf32>
    %cst_64 = arith.constant 1.000000e+00 : f32
    %189 = vector.broadcast %cst_64 : f32 to vector<4x32xf32>
    %190 = arith.addf %189, %188 : vector<4x32xf32>
    %191 = arith.divf %189, %190 : vector<4x32xf32>
    %192 = vector.extract_strided_slice %182 {offsets = [0, 32], sizes = [4, 32], strides = [1, 1]} : vector<4x96xf32> to vector<4x32xf32>
    %193 = vector.extract_strided_slice %183 {offsets = [0, 32], sizes = [4, 32], strides = [1, 1]} : vector<4x96xf32> to vector<4x32xf32>
    %194 = arith.addf %192, %193 : vector<4x32xf32>
    %195 = arith.negf %194 : vector<4x32xf32>
    %196 = math.exp %195 : vector<4x32xf32>
    %cst_65 = arith.constant 1.000000e+00 : f32
    %197 = vector.broadcast %cst_65 : f32 to vector<4x32xf32>
    %198 = arith.addf %197, %196 : vector<4x32xf32>
    %199 = arith.divf %197, %198 : vector<4x32xf32>
    %200 = vector.extract_strided_slice %182 {offsets = [0, 64], sizes = [4, 32], strides = [1, 1]} : vector<4x96xf32> to vector<4x32xf32>
    %201 = vector.extract_strided_slice %183 {offsets = [0, 64], sizes = [4, 32], strides = [1, 1]} : vector<4x96xf32> to vector<4x32xf32>
    %202 = vector.broadcast %3 : vector<1x32xf32> to vector<4x32xf32>
    %203 = arith.addf %201, %202 : vector<4x32xf32>
    %204 = arith.mulf %191, %203 : vector<4x32xf32>
    %205 = arith.addf %200, %204 : vector<4x32xf32>
    %206 = math.tanh %205 : vector<4x32xf32>
    %207 = arith.subf %174, %206 : vector<4x32xf32>
    %208 = arith.mulf %199, %207 : vector<4x32xf32>
    %209 = arith.addf %206, %208 : vector<4x32xf32>
    %c0_66 = arith.constant 0 : index
    %c5_67 = arith.constant 5 : index
    %c0_68 = arith.constant 0 : index
    %210 = vector.load %arg3[%c0_66, %c5_67, %c0_68] : memref<4x16x32xf32, #tpu.memory_space<vmem>>, vector<4x1x32xf32>
    %211 = vector.shape_cast %210 : vector<4x1x32xf32> to vector<4x32xf32>
    %212 = arith.addf %209, %211 : vector<4x32xf32>
    %c0_69 = arith.constant 0 : index
    %c5_70 = arith.constant 5 : index
    %c0_71 = arith.constant 0 : index
    %213 = vector.load %arg6[%c0_69, %c5_70, %c0_71] : memref<4x16x32xf32, #tpu.memory_space<vmem>>, vector<4x1x32xf32>
    %214 = vector.shape_cast %213 : vector<4x1x32xf32> to vector<4x32xf32>
    %215 = vector.shape_cast %212 : vector<4x32xf32> to vector<4x1x32xf32>
    tpu.vector_store %arg6[%c0_69, %c5_70, %c0_71], %215 {strides = array<i32>} : memref<4x16x32xf32, #tpu.memory_space<vmem>>, vector<4x1x32xf32>,
    %c0_72 = arith.constant 0 : index
    %c6 = arith.constant 6 : index
    %c0_73 = arith.constant 0 : index
    %216 = vector.load %arg2[%c0_72, %c6, %c0_73] : memref<4x16x96xf32, #tpu.memory_space<vmem>>, vector<4x1x96xf32>
    %217 = vector.shape_cast %216 : vector<4x1x96xf32> to vector<4x96xf32>
    %cst_74 = arith.constant dense<0.000000e+00> : vector<4x96xf32>
    %218 = tpu.matmul %209, %4, %cst_74 {dimension_numbers = #tpu.dot_dimension_numbers<[1], [0], [0], [1], [0, 0, 1, 1], [], []>} : vector<4x32xf32>, vector<32x96xf32>, vector<4x96xf32> -> vector<4x96xf32>
    %219 = vector.extract_strided_slice %217 {offsets = [0, 0], sizes = [4, 32], strides = [1, 1]} : vector<4x96xf32> to vector<4x32xf32>
    %220 = vector.extract_strided_slice %218 {offsets = [0, 0], sizes = [4, 32], strides = [1, 1]} : vector<4x96xf32> to vector<4x32xf32>
    %221 = arith.addf %219, %220 : vector<4x32xf32>
    %222 = arith.negf %221 : vector<4x32xf32>
    %223 = math.exp %222 : vector<4x32xf32>
    %cst_75 = arith.constant 1.000000e+00 : f32
    %224 = vector.broadcast %cst_75 : f32 to vector<4x32xf32>
    %225 = arith.addf %224, %223 : vector<4x32xf32>
    %226 = arith.divf %224, %225 : vector<4x32xf32>
    %227 = vector.extract_strided_slice %217 {offsets = [0, 32], sizes = [4, 32], strides = [1, 1]} : vector<4x96xf32> to vector<4x32xf32>
    %228 = vector.extract_strided_slice %218 {offsets = [0, 32], sizes = [4, 32], strides = [1, 1]} : vector<4x96xf32> to vector<4x32xf32>
    %229 = arith.addf %227, %228 : vector<4x32xf32>
    %230 = arith.negf %229 : vector<4x32xf32>
    %231 = math.exp %230 : vector<4x32xf32>
    %cst_76 = arith.constant 1.000000e+00 : f32
    %232 = vector.broadcast %cst_76 : f32 to vector<4x32xf32>
    %233 = arith.addf %232, %231 : vector<4x32xf32>
    %234 = arith.divf %232, %233 : vector<4x32xf32>
    %235 = vector.extract_strided_slice %217 {offsets = [0, 64], sizes = [4, 32], strides = [1, 1]} : vector<4x96xf32> to vector<4x32xf32>
    %236 = vector.extract_strided_slice %218 {offsets = [0, 64], sizes = [4, 32], strides = [1, 1]} : vector<4x96xf32> to vector<4x32xf32>
    %237 = vector.broadcast %3 : vector<1x32xf32> to vector<4x32xf32>
    %238 = arith.addf %236, %237 : vector<4x32xf32>
    %239 = arith.mulf %226, %238 : vector<4x32xf32>
    %240 = arith.addf %235, %239 : vector<4x32xf32>
    %241 = math.tanh %240 : vector<4x32xf32>
    %242 = arith.subf %209, %241 : vector<4x32xf32>
    %243 = arith.mulf %234, %242 : vector<4x32xf32>
    %244 = arith.addf %241, %243 : vector<4x32xf32>
    %c0_77 = arith.constant 0 : index
    %c6_78 = arith.constant 6 : index
    %c0_79 = arith.constant 0 : index
    %245 = vector.load %arg3[%c0_77, %c6_78, %c0_79] : memref<4x16x32xf32, #tpu.memory_space<vmem>>, vector<4x1x32xf32>
    %246 = vector.shape_cast %245 : vector<4x1x32xf32> to vector<4x32xf32>
    %247 = arith.addf %244, %246 : vector<4x32xf32>
    %c0_80 = arith.constant 0 : index
    %c6_81 = arith.constant 6 : index
    %c0_82 = arith.constant 0 : index
    %248 = vector.load %arg6[%c0_80, %c6_81, %c0_82] : memref<4x16x32xf32, #tpu.memory_space<vmem>>, vector<4x1x32xf32>
    %249 = vector.shape_cast %248 : vector<4x1x32xf32> to vector<4x32xf32>
    %250 = vector.shape_cast %247 : vector<4x32xf32> to vector<4x1x32xf32>
    tpu.vector_store %arg6[%c0_80, %c6_81, %c0_82], %250 {strides = array<i32>} : memref<4x16x32xf32, #tpu.memory_space<vmem>>, vector<4x1x32xf32>,
    %c0_83 = arith.constant 0 : index
    %c7 = arith.constant 7 : index
    %c0_84 = arith.constant 0 : index
    %251 = vector.load %arg2[%c0_83, %c7, %c0_84] : memref<4x16x96xf32, #tpu.memory_space<vmem>>, vector<4x1x96xf32>
    %252 = vector.shape_cast %251 : vector<4x1x96xf32> to vector<4x96xf32>
    %cst_85 = arith.constant dense<0.000000e+00> : vector<4x96xf32>
    %253 = tpu.matmul %244, %4, %cst_85 {dimension_numbers = #tpu.dot_dimension_numbers<[1], [0], [0], [1], [0, 0, 1, 1], [], []>} : vector<4x32xf32>, vector<32x96xf32>, vector<4x96xf32> -> vector<4x96xf32>
    %254 = vector.extract_strided_slice %252 {offsets = [0, 0], sizes = [4, 32], strides = [1, 1]} : vector<4x96xf32> to vector<4x32xf32>
    %255 = vector.extract_strided_slice %253 {offsets = [0, 0], sizes = [4, 32], strides = [1, 1]} : vector<4x96xf32> to vector<4x32xf32>
    %256 = arith.addf %254, %255 : vector<4x32xf32>
    %257 = arith.negf %256 : vector<4x32xf32>
    %258 = math.exp %257 : vector<4x32xf32>
    %cst_86 = arith.constant 1.000000e+00 : f32
    %259 = vector.broadcast %cst_86 : f32 to vector<4x32xf32>
    %260 = arith.addf %259, %258 : vector<4x32xf32>
    %261 = arith.divf %259, %260 : vector<4x32xf32>
    %262 = vector.extract_strided_slice %252 {offsets = [0, 32], sizes = [4, 32], strides = [1, 1]} : vector<4x96xf32> to vector<4x32xf32>
    %263 = vector.extract_strided_slice %253 {offsets = [0, 32], sizes = [4, 32], strides = [1, 1]} : vector<4x96xf32> to vector<4x32xf32>
    %264 = arith.addf %262, %263 : vector<4x32xf32>
    %265 = arith.negf %264 : vector<4x32xf32>
    %266 = math.exp %265 : vector<4x32xf32>
    %cst_87 = arith.constant 1.000000e+00 : f32
    %267 = vector.broadcast %cst_87 : f32 to vector<4x32xf32>
    %268 = arith.addf %267, %266 : vector<4x32xf32>
    %269 = arith.divf %267, %268 : vector<4x32xf32>
    %270 = vector.extract_strided_slice %252 {offsets = [0, 64], sizes = [4, 32], strides = [1, 1]} : vector<4x96xf32> to vector<4x32xf32>
    %271 = vector.extract_strided_slice %253 {offsets = [0, 64], sizes = [4, 32], strides = [1, 1]} : vector<4x96xf32> to vector<4x32xf32>
    %272 = vector.broadcast %3 : vector<1x32xf32> to vector<4x32xf32>
    %273 = arith.addf %271, %272 : vector<4x32xf32>
    %274 = arith.mulf %261, %273 : vector<4x32xf32>
    %275 = arith.addf %270, %274 : vector<4x32xf32>
    %276 = math.tanh %275 : vector<4x32xf32>
    %277 = arith.subf %244, %276 : vector<4x32xf32>
    %278 = arith.mulf %269, %277 : vector<4x32xf32>
    %279 = arith.addf %276, %278 : vector<4x32xf32>
    %c0_88 = arith.constant 0 : index
    %c7_89 = arith.constant 7 : index
    %c0_90 = arith.constant 0 : index
    %280 = vector.load %arg3[%c0_88, %c7_89, %c0_90] : memref<4x16x32xf32, #tpu.memory_space<vmem>>, vector<4x1x32xf32>
    %281 = vector.shape_cast %280 : vector<4x1x32xf32> to vector<4x32xf32>
    %282 = arith.addf %279, %281 : vector<4x32xf32>
    %c0_91 = arith.constant 0 : index
    %c7_92 = arith.constant 7 : index
    %c0_93 = arith.constant 0 : index
    %283 = vector.load %arg6[%c0_91, %c7_92, %c0_93] : memref<4x16x32xf32, #tpu.memory_space<vmem>>, vector<4x1x32xf32>
    %284 = vector.shape_cast %283 : vector<4x1x32xf32> to vector<4x32xf32>
    %285 = vector.shape_cast %282 : vector<4x32xf32> to vector<4x1x32xf32>
    tpu.vector_store %arg6[%c0_91, %c7_92, %c0_93], %285 {strides = array<i32>} : memref<4x16x32xf32, #tpu.memory_space<vmem>>, vector<4x1x32xf32>,
    %c0_94 = arith.constant 0 : index
    %c8 = arith.constant 8 : index
    %c0_95 = arith.constant 0 : index
    %286 = vector.load %arg2[%c0_94, %c8, %c0_95] : memref<4x16x96xf32, #tpu.memory_space<vmem>>, vector<4x1x96xf32>
    %287 = vector.shape_cast %286 : vector<4x1x96xf32> to vector<4x96xf32>
    %cst_96 = arith.constant dense<0.000000e+00> : vector<4x96xf32>
    %288 = tpu.matmul %279, %4, %cst_96 {dimension_numbers = #tpu.dot_dimension_numbers<[1], [0], [0], [1], [0, 0, 1, 1], [], []>} : vector<4x32xf32>, vector<32x96xf32>, vector<4x96xf32> -> vector<4x96xf32>
    %289 = vector.extract_strided_slice %287 {offsets = [0, 0], sizes = [4, 32], strides = [1, 1]} : vector<4x96xf32> to vector<4x32xf32>
    %290 = vector.extract_strided_slice %288 {offsets = [0, 0], sizes = [4, 32], strides = [1, 1]} : vector<4x96xf32> to vector<4x32xf32>
    %291 = arith.addf %289, %290 : vector<4x32xf32>
    %292 = arith.negf %291 : vector<4x32xf32>
    %293 = math.exp %292 : vector<4x32xf32>
    %cst_97 = arith.constant 1.000000e+00 : f32
    %294 = vector.broadcast %cst_97 : f32 to vector<4x32xf32>
    %295 = arith.addf %294, %293 : vector<4x32xf32>
    %296 = arith.divf %294, %295 : vector<4x32xf32>
    %297 = vector.extract_strided_slice %287 {offsets = [0, 32], sizes = [4, 32], strides = [1, 1]} : vector<4x96xf32> to vector<4x32xf32>
    %298 = vector.extract_strided_slice %288 {offsets = [0, 32], sizes = [4, 32], strides = [1, 1]} : vector<4x96xf32> to vector<4x32xf32>
    %299 = arith.addf %297, %298 : vector<4x32xf32>
    %300 = arith.negf %299 : vector<4x32xf32>
    %301 = math.exp %300 : vector<4x32xf32>
    %cst_98 = arith.constant 1.000000e+00 : f32
    %302 = vector.broadcast %cst_98 : f32 to vector<4x32xf32>
    %303 = arith.addf %302, %301 : vector<4x32xf32>
    %304 = arith.divf %302, %303 : vector<4x32xf32>
    %305 = vector.extract_strided_slice %287 {offsets = [0, 64], sizes = [4, 32], strides = [1, 1]} : vector<4x96xf32> to vector<4x32xf32>
    %306 = vector.extract_strided_slice %288 {offsets = [0, 64], sizes = [4, 32], strides = [1, 1]} : vector<4x96xf32> to vector<4x32xf32>
    %307 = vector.broadcast %3 : vector<1x32xf32> to vector<4x32xf32>
    %308 = arith.addf %306, %307 : vector<4x32xf32>
    %309 = arith.mulf %296, %308 : vector<4x32xf32>
    %310 = arith.addf %305, %309 : vector<4x32xf32>
    %311 = math.tanh %310 : vector<4x32xf32>
    %312 = arith.subf %279, %311 : vector<4x32xf32>
    %313 = arith.mulf %304, %312 : vector<4x32xf32>
    %314 = arith.addf %311, %313 : vector<4x32xf32>
    %c0_99 = arith.constant 0 : index
    %c8_100 = arith.constant 8 : index
    %c0_101 = arith.constant 0 : index
    %315 = vector.load %arg3[%c0_99, %c8_100, %c0_101] : memref<4x16x32xf32, #tpu.memory_space<vmem>>, vector<4x1x32xf32>
    %316 = vector.shape_cast %315 : vector<4x1x32xf32> to vector<4x32xf32>
    %317 = arith.addf %314, %316 : vector<4x32xf32>
    %c0_102 = arith.constant 0 : index
    %c8_103 = arith.constant 8 : index
    %c0_104 = arith.constant 0 : index
    %318 = vector.load %arg6[%c0_102, %c8_103, %c0_104] : memref<4x16x32xf32, #tpu.memory_space<vmem>>, vector<4x1x32xf32>
    %319 = vector.shape_cast %318 : vector<4x1x32xf32> to vector<4x32xf32>
    %320 = vector.shape_cast %317 : vector<4x32xf32> to vector<4x1x32xf32>
    tpu.vector_store %arg6[%c0_102, %c8_103, %c0_104], %320 {strides = array<i32>} : memref<4x16x32xf32, #tpu.memory_space<vmem>>, vector<4x1x32xf32>,
    %c0_105 = arith.constant 0 : index
    %c9 = arith.constant 9 : index
    %c0_106 = arith.constant 0 : index
    %321 = vector.load %arg2[%c0_105, %c9, %c0_106] : memref<4x16x96xf32, #tpu.memory_space<vmem>>, vector<4x1x96xf32>
    %322 = vector.shape_cast %321 : vector<4x1x96xf32> to vector<4x96xf32>
    %cst_107 = arith.constant dense<0.000000e+00> : vector<4x96xf32>
    %323 = tpu.matmul %314, %4, %cst_107 {dimension_numbers = #tpu.dot_dimension_numbers<[1], [0], [0], [1], [0, 0, 1, 1], [], []>} : vector<4x32xf32>, vector<32x96xf32>, vector<4x96xf32> -> vector<4x96xf32>
    %324 = vector.extract_strided_slice %322 {offsets = [0, 0], sizes = [4, 32], strides = [1, 1]} : vector<4x96xf32> to vector<4x32xf32>
    %325 = vector.extract_strided_slice %323 {offsets = [0, 0], sizes = [4, 32], strides = [1, 1]} : vector<4x96xf32> to vector<4x32xf32>
    %326 = arith.addf %324, %325 : vector<4x32xf32>
    %327 = arith.negf %326 : vector<4x32xf32>
    %328 = math.exp %327 : vector<4x32xf32>
    %cst_108 = arith.constant 1.000000e+00 : f32
    %329 = vector.broadcast %cst_108 : f32 to vector<4x32xf32>
    %330 = arith.addf %329, %328 : vector<4x32xf32>
    %331 = arith.divf %329, %330 : vector<4x32xf32>
    %332 = vector.extract_strided_slice %322 {offsets = [0, 32], sizes = [4, 32], strides = [1, 1]} : vector<4x96xf32> to vector<4x32xf32>
    %333 = vector.extract_strided_slice %323 {offsets = [0, 32], sizes = [4, 32], strides = [1, 1]} : vector<4x96xf32> to vector<4x32xf32>
    %334 = arith.addf %332, %333 : vector<4x32xf32>
    %335 = arith.negf %334 : vector<4x32xf32>
    %336 = math.exp %335 : vector<4x32xf32>
    %cst_109 = arith.constant 1.000000e+00 : f32
    %337 = vector.broadcast %cst_109 : f32 to vector<4x32xf32>
    %338 = arith.addf %337, %336 : vector<4x32xf32>
    %339 = arith.divf %337, %338 : vector<4x32xf32>
    %340 = vector.extract_strided_slice %322 {offsets = [0, 64], sizes = [4, 32], strides = [1, 1]} : vector<4x96xf32> to vector<4x32xf32>
    %341 = vector.extract_strided_slice %323 {offsets = [0, 64], sizes = [4, 32], strides = [1, 1]} : vector<4x96xf32> to vector<4x32xf32>
    %342 = vector.broadcast %3 : vector<1x32xf32> to vector<4x32xf32>
    %343 = arith.addf %341, %342 : vector<4x32xf32>
    %344 = arith.mulf %331, %343 : vector<4x32xf32>
    %345 = arith.addf %340, %344 : vector<4x32xf32>
    %346 = math.tanh %345 : vector<4x32xf32>
    %347 = arith.subf %314, %346 : vector<4x32xf32>
    %348 = arith.mulf %339, %347 : vector<4x32xf32>
    %349 = arith.addf %346, %348 : vector<4x32xf32>
    %c0_110 = arith.constant 0 : index
    %c9_111 = arith.constant 9 : index
    %c0_112 = arith.constant 0 : index
    %350 = vector.load %arg3[%c0_110, %c9_111, %c0_112] : memref<4x16x32xf32, #tpu.memory_space<vmem>>, vector<4x1x32xf32>
    %351 = vector.shape_cast %350 : vector<4x1x32xf32> to vector<4x32xf32>
    %352 = arith.addf %349, %351 : vector<4x32xf32>
    %c0_113 = arith.constant 0 : index
    %c9_114 = arith.constant 9 : index
    %c0_115 = arith.constant 0 : index
    %353 = vector.load %arg6[%c0_113, %c9_114, %c0_115] : memref<4x16x32xf32, #tpu.memory_space<vmem>>, vector<4x1x32xf32>
    %354 = vector.shape_cast %353 : vector<4x1x32xf32> to vector<4x32xf32>
    %355 = vector.shape_cast %352 : vector<4x32xf32> to vector<4x1x32xf32>
    tpu.vector_store %arg6[%c0_113, %c9_114, %c0_115], %355 {strides = array<i32>} : memref<4x16x32xf32, #tpu.memory_space<vmem>>, vector<4x1x32xf32>,
    %c0_116 = arith.constant 0 : index
    %c10 = arith.constant 10 : index
    %c0_117 = arith.constant 0 : index
    %356 = vector.load %arg2[%c0_116, %c10, %c0_117] : memref<4x16x96xf32, #tpu.memory_space<vmem>>, vector<4x1x96xf32>
    %357 = vector.shape_cast %356 : vector<4x1x96xf32> to vector<4x96xf32>
    %cst_118 = arith.constant dense<0.000000e+00> : vector<4x96xf32>
    %358 = tpu.matmul %349, %4, %cst_118 {dimension_numbers = #tpu.dot_dimension_numbers<[1], [0], [0], [1], [0, 0, 1, 1], [], []>} : vector<4x32xf32>, vector<32x96xf32>, vector<4x96xf32> -> vector<4x96xf32>
    %359 = vector.extract_strided_slice %357 {offsets = [0, 0], sizes = [4, 32], strides = [1, 1]} : vector<4x96xf32> to vector<4x32xf32>
    %360 = vector.extract_strided_slice %358 {offsets = [0, 0], sizes = [4, 32], strides = [1, 1]} : vector<4x96xf32> to vector<4x32xf32>
    %361 = arith.addf %359, %360 : vector<4x32xf32>
    %362 = arith.negf %361 : vector<4x32xf32>
    %363 = math.exp %362 : vector<4x32xf32>
    %cst_119 = arith.constant 1.000000e+00 : f32
    %364 = vector.broadcast %cst_119 : f32 to vector<4x32xf32>
    %365 = arith.addf %364, %363 : vector<4x32xf32>
    %366 = arith.divf %364, %365 : vector<4x32xf32>
    %367 = vector.extract_strided_slice %357 {offsets = [0, 32], sizes = [4, 32], strides = [1, 1]} : vector<4x96xf32> to vector<4x32xf32>
    %368 = vector.extract_strided_slice %358 {offsets = [0, 32], sizes = [4, 32], strides = [1, 1]} : vector<4x96xf32> to vector<4x32xf32>
    %369 = arith.addf %367, %368 : vector<4x32xf32>
    %370 = arith.negf %369 : vector<4x32xf32>
    %371 = math.exp %370 : vector<4x32xf32>
    %cst_120 = arith.constant 1.000000e+00 : f32
    %372 = vector.broadcast %cst_120 : f32 to vector<4x32xf32>
    %373 = arith.addf %372, %371 : vector<4x32xf32>
    %374 = arith.divf %372, %373 : vector<4x32xf32>
    %375 = vector.extract_strided_slice %357 {offsets = [0, 64], sizes = [4, 32], strides = [1, 1]} : vector<4x96xf32> to vector<4x32xf32>
    %376 = vector.extract_strided_slice %358 {offsets = [0, 64], sizes = [4, 32], strides = [1, 1]} : vector<4x96xf32> to vector<4x32xf32>
    %377 = vector.broadcast %3 : vector<1x32xf32> to vector<4x32xf32>
    %378 = arith.addf %376, %377 : vector<4x32xf32>
    %379 = arith.mulf %366, %378 : vector<4x32xf32>
    %380 = arith.addf %375, %379 : vector<4x32xf32>
    %381 = math.tanh %380 : vector<4x32xf32>
    %382 = arith.subf %349, %381 : vector<4x32xf32>
    %383 = arith.mulf %374, %382 : vector<4x32xf32>
    %384 = arith.addf %381, %383 : vector<4x32xf32>
    %c0_121 = arith.constant 0 : index
    %c10_122 = arith.constant 10 : index
    %c0_123 = arith.constant 0 : index
    %385 = vector.load %arg3[%c0_121, %c10_122, %c0_123] : memref<4x16x32xf32, #tpu.memory_space<vmem>>, vector<4x1x32xf32>
    %386 = vector.shape_cast %385 : vector<4x1x32xf32> to vector<4x32xf32>
    %387 = arith.addf %384, %386 : vector<4x32xf32>
    %c0_124 = arith.constant 0 : index
    %c10_125 = arith.constant 10 : index
    %c0_126 = arith.constant 0 : index
    %388 = vector.load %arg6[%c0_124, %c10_125, %c0_126] : memref<4x16x32xf32, #tpu.memory_space<vmem>>, vector<4x1x32xf32>
    %389 = vector.shape_cast %388 : vector<4x1x32xf32> to vector<4x32xf32>
    %390 = vector.shape_cast %387 : vector<4x32xf32> to vector<4x1x32xf32>
    tpu.vector_store %arg6[%c0_124, %c10_125, %c0_126], %390 {strides = array<i32>} : memref<4x16x32xf32, #tpu.memory_space<vmem>>, vector<4x1x32xf32>,
    %c0_127 = arith.constant 0 : index
    %c11 = arith.constant 11 : index
    %c0_128 = arith.constant 0 : index
    %391 = vector.load %arg2[%c0_127, %c11, %c0_128] : memref<4x16x96xf32, #tpu.memory_space<vmem>>, vector<4x1x96xf32>
    %392 = vector.shape_cast %391 : vector<4x1x96xf32> to vector<4x96xf32>
    %cst_129 = arith.constant dense<0.000000e+00> : vector<4x96xf32>
    %393 = tpu.matmul %384, %4, %cst_129 {dimension_numbers = #tpu.dot_dimension_numbers<[1], [0], [0], [1], [0, 0, 1, 1], [], []>} : vector<4x32xf32>, vector<32x96xf32>, vector<4x96xf32> -> vector<4x96xf32>
    %394 = vector.extract_strided_slice %392 {offsets = [0, 0], sizes = [4, 32], strides = [1, 1]} : vector<4x96xf32> to vector<4x32xf32>
    %395 = vector.extract_strided_slice %393 {offsets = [0, 0], sizes = [4, 32], strides = [1, 1]} : vector<4x96xf32> to vector<4x32xf32>
    %396 = arith.addf %394, %395 : vector<4x32xf32>
    %397 = arith.negf %396 : vector<4x32xf32>
    %398 = math.exp %397 : vector<4x32xf32>
    %cst_130 = arith.constant 1.000000e+00 : f32
    %399 = vector.broadcast %cst_130 : f32 to vector<4x32xf32>
    %400 = arith.addf %399, %398 : vector<4x32xf32>
    %401 = arith.divf %399, %400 : vector<4x32xf32>
    %402 = vector.extract_strided_slice %392 {offsets = [0, 32], sizes = [4, 32], strides = [1, 1]} : vector<4x96xf32> to vector<4x32xf32>
    %403 = vector.extract_strided_slice %393 {offsets = [0, 32], sizes = [4, 32], strides = [1, 1]} : vector<4x96xf32> to vector<4x32xf32>
    %404 = arith.addf %402, %403 : vector<4x32xf32>
    %405 = arith.negf %404 : vector<4x32xf32>
    %406 = math.exp %405 : vector<4x32xf32>
    %cst_131 = arith.constant 1.000000e+00 : f32
    %407 = vector.broadcast %cst_131 : f32 to vector<4x32xf32>
    %408 = arith.addf %407, %406 : vector<4x32xf32>
    %409 = arith.divf %407, %408 : vector<4x32xf32>
    %410 = vector.extract_strided_slice %392 {offsets = [0, 64], sizes = [4, 32], strides = [1, 1]} : vector<4x96xf32> to vector<4x32xf32>
    %411 = vector.extract_strided_slice %393 {offsets = [0, 64], sizes = [4, 32], strides = [1, 1]} : vector<4x96xf32> to vector<4x32xf32>
    %412 = vector.broadcast %3 : vector<1x32xf32> to vector<4x32xf32>
    %413 = arith.addf %411, %412 : vector<4x32xf32>
    %414 = arith.mulf %401, %413 : vector<4x32xf32>
    %415 = arith.addf %410, %414 : vector<4x32xf32>
    %416 = math.tanh %415 : vector<4x32xf32>
    %417 = arith.subf %384, %416 : vector<4x32xf32>
    %418 = arith.mulf %409, %417 : vector<4x32xf32>
    %419 = arith.addf %416, %418 : vector<4x32xf32>
    %c0_132 = arith.constant 0 : index
    %c11_133 = arith.constant 11 : index
    %c0_134 = arith.constant 0 : index
    %420 = vector.load %arg3[%c0_132, %c11_133, %c0_134] : memref<4x16x32xf32, #tpu.memory_space<vmem>>, vector<4x1x32xf32>
    %421 = vector.shape_cast %420 : vector<4x1x32xf32> to vector<4x32xf32>
    %422 = arith.addf %419, %421 : vector<4x32xf32>
    %c0_135 = arith.constant 0 : index
    %c11_136 = arith.constant 11 : index
    %c0_137 = arith.constant 0 : index
    %423 = vector.load %arg6[%c0_135, %c11_136, %c0_137] : memref<4x16x32xf32, #tpu.memory_space<vmem>>, vector<4x1x32xf32>
    %424 = vector.shape_cast %423 : vector<4x1x32xf32> to vector<4x32xf32>
    %425 = vector.shape_cast %422 : vector<4x32xf32> to vector<4x1x32xf32>
    tpu.vector_store %arg6[%c0_135, %c11_136, %c0_137], %425 {strides = array<i32>} : memref<4x16x32xf32, #tpu.memory_space<vmem>>, vector<4x1x32xf32>,
    %c0_138 = arith.constant 0 : index
    %c12 = arith.constant 12 : index
    %c0_139 = arith.constant 0 : index
    %426 = vector.load %arg2[%c0_138, %c12, %c0_139] : memref<4x16x96xf32, #tpu.memory_space<vmem>>, vector<4x1x96xf32>
    %427 = vector.shape_cast %426 : vector<4x1x96xf32> to vector<4x96xf32>
    %cst_140 = arith.constant dense<0.000000e+00> : vector<4x96xf32>
    %428 = tpu.matmul %419, %4, %cst_140 {dimension_numbers = #tpu.dot_dimension_numbers<[1], [0], [0], [1], [0, 0, 1, 1], [], []>} : vector<4x32xf32>, vector<32x96xf32>, vector<4x96xf32> -> vector<4x96xf32>
    %429 = vector.extract_strided_slice %427 {offsets = [0, 0], sizes = [4, 32], strides = [1, 1]} : vector<4x96xf32> to vector<4x32xf32>
    %430 = vector.extract_strided_slice %428 {offsets = [0, 0], sizes = [4, 32], strides = [1, 1]} : vector<4x96xf32> to vector<4x32xf32>
    %431 = arith.addf %429, %430 : vector<4x32xf32>
    %432 = arith.negf %431 : vector<4x32xf32>
    %433 = math.exp %432 : vector<4x32xf32>
    %cst_141 = arith.constant 1.000000e+00 : f32
    %434 = vector.broadcast %cst_141 : f32 to vector<4x32xf32>
    %435 = arith.addf %434, %433 : vector<4x32xf32>
    %436 = arith.divf %434, %435 : vector<4x32xf32>
    %437 = vector.extract_strided_slice %427 {offsets = [0, 32], sizes = [4, 32], strides = [1, 1]} : vector<4x96xf32> to vector<4x32xf32>
    %438 = vector.extract_strided_slice %428 {offsets = [0, 32], sizes = [4, 32], strides = [1, 1]} : vector<4x96xf32> to vector<4x32xf32>
    %439 = arith.addf %437, %438 : vector<4x32xf32>
    %440 = arith.negf %439 : vector<4x32xf32>
    %441 = math.exp %440 : vector<4x32xf32>
    %cst_142 = arith.constant 1.000000e+00 : f32
    %442 = vector.broadcast %cst_142 : f32 to vector<4x32xf32>
    %443 = arith.addf %442, %441 : vector<4x32xf32>
    %444 = arith.divf %442, %443 : vector<4x32xf32>
    %445 = vector.extract_strided_slice %427 {offsets = [0, 64], sizes = [4, 32], strides = [1, 1]} : vector<4x96xf32> to vector<4x32xf32>
    %446 = vector.extract_strided_slice %428 {offsets = [0, 64], sizes = [4, 32], strides = [1, 1]} : vector<4x96xf32> to vector<4x32xf32>
    %447 = vector.broadcast %3 : vector<1x32xf32> to vector<4x32xf32>
    %448 = arith.addf %446, %447 : vector<4x32xf32>
    %449 = arith.mulf %436, %448 : vector<4x32xf32>
    %450 = arith.addf %445, %449 : vector<4x32xf32>
    %451 = math.tanh %450 : vector<4x32xf32>
    %452 = arith.subf %419, %451 : vector<4x32xf32>
    %453 = arith.mulf %444, %452 : vector<4x32xf32>
    %454 = arith.addf %451, %453 : vector<4x32xf32>
    %c0_143 = arith.constant 0 : index
    %c12_144 = arith.constant 12 : index
    %c0_145 = arith.constant 0 : index
    %455 = vector.load %arg3[%c0_143, %c12_144, %c0_145] : memref<4x16x32xf32, #tpu.memory_space<vmem>>, vector<4x1x32xf32>
    %456 = vector.shape_cast %455 : vector<4x1x32xf32> to vector<4x32xf32>
    %457 = arith.addf %454, %456 : vector<4x32xf32>
    %c0_146 = arith.constant 0 : index
    %c12_147 = arith.constant 12 : index
    %c0_148 = arith.constant 0 : index
    %458 = vector.load %arg6[%c0_146, %c12_147, %c0_148] : memref<4x16x32xf32, #tpu.memory_space<vmem>>, vector<4x1x32xf32>
    %459 = vector.shape_cast %458 : vector<4x1x32xf32> to vector<4x32xf32>
    %460 = vector.shape_cast %457 : vector<4x32xf32> to vector<4x1x32xf32>
    tpu.vector_store %arg6[%c0_146, %c12_147, %c0_148], %460 {strides = array<i32>} : memref<4x16x32xf32, #tpu.memory_space<vmem>>, vector<4x1x32xf32>,
    %c0_149 = arith.constant 0 : index
    %c13 = arith.constant 13 : index
    %c0_150 = arith.constant 0 : index
    %461 = vector.load %arg2[%c0_149, %c13, %c0_150] : memref<4x16x96xf32, #tpu.memory_space<vmem>>, vector<4x1x96xf32>
    %462 = vector.shape_cast %461 : vector<4x1x96xf32> to vector<4x96xf32>
    %cst_151 = arith.constant dense<0.000000e+00> : vector<4x96xf32>
    %463 = tpu.matmul %454, %4, %cst_151 {dimension_numbers = #tpu.dot_dimension_numbers<[1], [0], [0], [1], [0, 0, 1, 1], [], []>} : vector<4x32xf32>, vector<32x96xf32>, vector<4x96xf32> -> vector<4x96xf32>
    %464 = vector.extract_strided_slice %462 {offsets = [0, 0], sizes = [4, 32], strides = [1, 1]} : vector<4x96xf32> to vector<4x32xf32>
    %465 = vector.extract_strided_slice %463 {offsets = [0, 0], sizes = [4, 32], strides = [1, 1]} : vector<4x96xf32> to vector<4x32xf32>
    %466 = arith.addf %464, %465 : vector<4x32xf32>
    %467 = arith.negf %466 : vector<4x32xf32>
    %468 = math.exp %467 : vector<4x32xf32>
    %cst_152 = arith.constant 1.000000e+00 : f32
    %469 = vector.broadcast %cst_152 : f32 to vector<4x32xf32>
    %470 = arith.addf %469, %468 : vector<4x32xf32>
    %471 = arith.divf %469, %470 : vector<4x32xf32>
    %472 = vector.extract_strided_slice %462 {offsets = [0, 32], sizes = [4, 32], strides = [1, 1]} : vector<4x96xf32> to vector<4x32xf32>
    %473 = vector.extract_strided_slice %463 {offsets = [0, 32], sizes = [4, 32], strides = [1, 1]} : vector<4x96xf32> to vector<4x32xf32>
    %474 = arith.addf %472, %473 : vector<4x32xf32>
    %475 = arith.negf %474 : vector<4x32xf32>
    %476 = math.exp %475 : vector<4x32xf32>
    %cst_153 = arith.constant 1.000000e+00 : f32
    %477 = vector.broadcast %cst_153 : f32 to vector<4x32xf32>
    %478 = arith.addf %477, %476 : vector<4x32xf32>
    %479 = arith.divf %477, %478 : vector<4x32xf32>
    %480 = vector.extract_strided_slice %462 {offsets = [0, 64], sizes = [4, 32], strides = [1, 1]} : vector<4x96xf32> to vector<4x32xf32>
    %481 = vector.extract_strided_slice %463 {offsets = [0, 64], sizes = [4, 32], strides = [1, 1]} : vector<4x96xf32> to vector<4x32xf32>
    %482 = vector.broadcast %3 : vector<1x32xf32> to vector<4x32xf32>
    %483 = arith.addf %481, %482 : vector<4x32xf32>
    %484 = arith.mulf %471, %483 : vector<4x32xf32>
    %485 = arith.addf %480, %484 : vector<4x32xf32>
    %486 = math.tanh %485 : vector<4x32xf32>
    %487 = arith.subf %454, %486 : vector<4x32xf32>
    %488 = arith.mulf %479, %487 : vector<4x32xf32>
    %489 = arith.addf %486, %488 : vector<4x32xf32>
    %c0_154 = arith.constant 0 : index
    %c13_155 = arith.constant 13 : index
    %c0_156 = arith.constant 0 : index
    %490 = vector.load %arg3[%c0_154, %c13_155, %c0_156] : memref<4x16x32xf32, #tpu.memory_space<vmem>>, vector<4x1x32xf32>
    %491 = vector.shape_cast %490 : vector<4x1x32xf32> to vector<4x32xf32>
    %492 = arith.addf %489, %491 : vector<4x32xf32>
    %c0_157 = arith.constant 0 : index
    %c13_158 = arith.constant 13 : index
    %c0_159 = arith.constant 0 : index
    %493 = vector.load %arg6[%c0_157, %c13_158, %c0_159] : memref<4x16x32xf32, #tpu.memory_space<vmem>>, vector<4x1x32xf32>
    %494 = vector.shape_cast %493 : vector<4x1x32xf32> to vector<4x32xf32>
    %495 = vector.shape_cast %492 : vector<4x32xf32> to vector<4x1x32xf32>
    tpu.vector_store %arg6[%c0_157, %c13_158, %c0_159], %495 {strides = array<i32>} : memref<4x16x32xf32, #tpu.memory_space<vmem>>, vector<4x1x32xf32>,
    %c0_160 = arith.constant 0 : index
    %c14 = arith.constant 14 : index
    %c0_161 = arith.constant 0 : index
    %496 = vector.load %arg2[%c0_160, %c14, %c0_161] : memref<4x16x96xf32, #tpu.memory_space<vmem>>, vector<4x1x96xf32>
    %497 = vector.shape_cast %496 : vector<4x1x96xf32> to vector<4x96xf32>
    %cst_162 = arith.constant dense<0.000000e+00> : vector<4x96xf32>
    %498 = tpu.matmul %489, %4, %cst_162 {dimension_numbers = #tpu.dot_dimension_numbers<[1], [0], [0], [1], [0, 0, 1, 1], [], []>} : vector<4x32xf32>, vector<32x96xf32>, vector<4x96xf32> -> vector<4x96xf32>
    %499 = vector.extract_strided_slice %497 {offsets = [0, 0], sizes = [4, 32], strides = [1, 1]} : vector<4x96xf32> to vector<4x32xf32>
    %500 = vector.extract_strided_slice %498 {offsets = [0, 0], sizes = [4, 32], strides = [1, 1]} : vector<4x96xf32> to vector<4x32xf32>
    %501 = arith.addf %499, %500 : vector<4x32xf32>
    %502 = arith.negf %501 : vector<4x32xf32>
    %503 = math.exp %502 : vector<4x32xf32>
    %cst_163 = arith.constant 1.000000e+00 : f32
    %504 = vector.broadcast %cst_163 : f32 to vector<4x32xf32>
    %505 = arith.addf %504, %503 : vector<4x32xf32>
    %506 = arith.divf %504, %505 : vector<4x32xf32>
    %507 = vector.extract_strided_slice %497 {offsets = [0, 32], sizes = [4, 32], strides = [1, 1]} : vector<4x96xf32> to vector<4x32xf32>
    %508 = vector.extract_strided_slice %498 {offsets = [0, 32], sizes = [4, 32], strides = [1, 1]} : vector<4x96xf32> to vector<4x32xf32>
    %509 = arith.addf %507, %508 : vector<4x32xf32>
    %510 = arith.negf %509 : vector<4x32xf32>
    %511 = math.exp %510 : vector<4x32xf32>
    %cst_164 = arith.constant 1.000000e+00 : f32
    %512 = vector.broadcast %cst_164 : f32 to vector<4x32xf32>
    %513 = arith.addf %512, %511 : vector<4x32xf32>
    %514 = arith.divf %512, %513 : vector<4x32xf32>
    %515 = vector.extract_strided_slice %497 {offsets = [0, 64], sizes = [4, 32], strides = [1, 1]} : vector<4x96xf32> to vector<4x32xf32>
    %516 = vector.extract_strided_slice %498 {offsets = [0, 64], sizes = [4, 32], strides = [1, 1]} : vector<4x96xf32> to vector<4x32xf32>
    %517 = vector.broadcast %3 : vector<1x32xf32> to vector<4x32xf32>
    %518 = arith.addf %516, %517 : vector<4x32xf32>
    %519 = arith.mulf %506, %518 : vector<4x32xf32>
    %520 = arith.addf %515, %519 : vector<4x32xf32>
    %521 = math.tanh %520 : vector<4x32xf32>
    %522 = arith.subf %489, %521 : vector<4x32xf32>
    %523 = arith.mulf %514, %522 : vector<4x32xf32>
    %524 = arith.addf %521, %523 : vector<4x32xf32>
    %c0_165 = arith.constant 0 : index
    %c14_166 = arith.constant 14 : index
    %c0_167 = arith.constant 0 : index
    %525 = vector.load %arg3[%c0_165, %c14_166, %c0_167] : memref<4x16x32xf32, #tpu.memory_space<vmem>>, vector<4x1x32xf32>
    %526 = vector.shape_cast %525 : vector<4x1x32xf32> to vector<4x32xf32>
    %527 = arith.addf %524, %526 : vector<4x32xf32>
    %c0_168 = arith.constant 0 : index
    %c14_169 = arith.constant 14 : index
    %c0_170 = arith.constant 0 : index
    %528 = vector.load %arg6[%c0_168, %c14_169, %c0_170] : memref<4x16x32xf32, #tpu.memory_space<vmem>>, vector<4x1x32xf32>
    %529 = vector.shape_cast %528 : vector<4x1x32xf32> to vector<4x32xf32>
    %530 = vector.shape_cast %527 : vector<4x32xf32> to vector<4x1x32xf32>
    tpu.vector_store %arg6[%c0_168, %c14_169, %c0_170], %530 {strides = array<i32>} : memref<4x16x32xf32, #tpu.memory_space<vmem>>, vector<4x1x32xf32>,
    %c0_171 = arith.constant 0 : index
    %c15 = arith.constant 15 : index
    %c0_172 = arith.constant 0 : index
    %531 = vector.load %arg2[%c0_171, %c15, %c0_172] : memref<4x16x96xf32, #tpu.memory_space<vmem>>, vector<4x1x96xf32>
    %532 = vector.shape_cast %531 : vector<4x1x96xf32> to vector<4x96xf32>
    %cst_173 = arith.constant dense<0.000000e+00> : vector<4x96xf32>
    %533 = tpu.matmul %524, %4, %cst_173 {dimension_numbers = #tpu.dot_dimension_numbers<[1], [0], [0], [1], [0, 0, 1, 1], [], []>} : vector<4x32xf32>, vector<32x96xf32>, vector<4x96xf32> -> vector<4x96xf32>
    %534 = vector.extract_strided_slice %532 {offsets = [0, 0], sizes = [4, 32], strides = [1, 1]} : vector<4x96xf32> to vector<4x32xf32>
    %535 = vector.extract_strided_slice %533 {offsets = [0, 0], sizes = [4, 32], strides = [1, 1]} : vector<4x96xf32> to vector<4x32xf32>
    %536 = arith.addf %534, %535 : vector<4x32xf32>
    %537 = arith.negf %536 : vector<4x32xf32>
    %538 = math.exp %537 : vector<4x32xf32>
    %cst_174 = arith.constant 1.000000e+00 : f32
    %539 = vector.broadcast %cst_174 : f32 to vector<4x32xf32>
    %540 = arith.addf %539, %538 : vector<4x32xf32>
    %541 = arith.divf %539, %540 : vector<4x32xf32>
    %542 = vector.extract_strided_slice %532 {offsets = [0, 32], sizes = [4, 32], strides = [1, 1]} : vector<4x96xf32> to vector<4x32xf32>
    %543 = vector.extract_strided_slice %533 {offsets = [0, 32], sizes = [4, 32], strides = [1, 1]} : vector<4x96xf32> to vector<4x32xf32>
    %544 = arith.addf %542, %543 : vector<4x32xf32>
    %545 = arith.negf %544 : vector<4x32xf32>
    %546 = math.exp %545 : vector<4x32xf32>
    %cst_175 = arith.constant 1.000000e+00 : f32
    %547 = vector.broadcast %cst_175 : f32 to vector<4x32xf32>
    %548 = arith.addf %547, %546 : vector<4x32xf32>
    %549 = arith.divf %547, %548 : vector<4x32xf32>
    %550 = vector.extract_strided_slice %532 {offsets = [0, 64], sizes = [4, 32], strides = [1, 1]} : vector<4x96xf32> to vector<4x32xf32>
    %551 = vector.extract_strided_slice %533 {offsets = [0, 64], sizes = [4, 32], strides = [1, 1]} : vector<4x96xf32> to vector<4x32xf32>
    %552 = vector.broadcast %3 : vector<1x32xf32> to vector<4x32xf32>
    %553 = arith.addf %551, %552 : vector<4x32xf32>
    %554 = arith.mulf %541, %553 : vector<4x32xf32>
    %555 = arith.addf %550, %554 : vector<4x32xf32>
    %556 = math.tanh %555 : vector<4x32xf32>
    %557 = arith.subf %524, %556 : vector<4x32xf32>
    %558 = arith.mulf %549, %557 : vector<4x32xf32>
    %559 = arith.addf %556, %558 : vector<4x32xf32>
    %c0_176 = arith.constant 0 : index
    %c15_177 = arith.constant 15 : index
    %c0_178 = arith.constant 0 : index
    %560 = vector.load %arg3[%c0_176, %c15_177, %c0_178] : memref<4x16x32xf32, #tpu.memory_space<vmem>>, vector<4x1x32xf32>
    %561 = vector.shape_cast %560 : vector<4x1x32xf32> to vector<4x32xf32>
    %562 = arith.addf %559, %561 : vector<4x32xf32>
    %c0_179 = arith.constant 0 : index
    %c15_180 = arith.constant 15 : index
    %c0_181 = arith.constant 0 : index
    %563 = vector.load %arg6[%c0_179, %c15_180, %c0_181] : memref<4x16x32xf32, #tpu.memory_space<vmem>>, vector<4x1x32xf32>
    %564 = vector.shape_cast %563 : vector<4x1x32xf32> to vector<4x32xf32>
    %565 = vector.shape_cast %562 : vector<4x32xf32> to vector<4x1x32xf32>
    tpu.vector_store %arg6[%c0_179, %c15_180, %c0_181], %565 {strides = array<i32>} : memref<4x16x32xf32, #tpu.memory_space<vmem>>, vector<4x1x32xf32>,
    %c0_182 = arith.constant 0 : index
    %c0_183 = arith.constant 0 : index
    %566 = vector.load %arg7[%c0_182, %c0_183] : memref<4x32xf32, #tpu.memory_space<vmem>>, vector<4x32xf32>
    tpu.vector_store %arg7[%c0_182, %c0_183], %559 {strides = array<i32>} : memref<4x32xf32, #tpu.memory_space<vmem>>, vector<4x32xf32>,
    return
  }
  func.func @transform_0(%arg0: i32, %arg1: i32) -> (i32, i32, i32) {
    %c0_i32 = arith.constant 0 : i32
    %c0_i32_0 = arith.constant 0 : i32
    return %arg0, %arg1, %c0_i32 : i32, i32, i32
  }
  func.func @transform_1(%arg0: i32, %arg1: i32) -> (i32, i32, i32) {
    %c0_i32 = arith.constant 0 : i32
    %c0_i32_0 = arith.constant 0 : i32
    return %arg0, %arg1, %c0_i32 : i32, i32, i32
  }
  func.func @transform_2(%arg0: i32, %arg1: i32) -> (i32, i32) {
    %c0_i32 = arith.constant 0 : i32
    %c0_i32_0 = arith.constant 0 : i32
    %c0_i32_1 = arith.constant 0 : i32
    return %c0_i32, %c0_i32_0 : i32, i32
  }
  func.func @transform_3(%arg0: i32, %arg1: i32) -> (i32, i32) {
    %c0_i32 = arith.constant 0 : i32
    %c0_i32_0 = arith.constant 0 : i32
    %c0_i32_1 = arith.constant 0 : i32
    return %c0_i32, %c0_i32_0 : i32, i32
  }
  func.func @transform_4(%arg0: i32, %arg1: i32) -> (i32, i32, i32) {
    %c0_i32 = arith.constant 0 : i32
    %c0_i32_0 = arith.constant 0 : i32
    return %arg0, %arg1, %c0_i32 : i32, i32, i32
  }
}

</mosaic_0001>

<bundles_post_ra>
// kernel: temporal_encoder_forward.2
= control target key start
LH: loop header
LB: loop body
LE: loop exit
PB: predicated region body
PF: predicated region fallthrough
CT: control target
= control target key end

     0   :  { %8 = vsyncpa [#allocation3], 0  ;;  %s854_s0 = inlined_call_operand.hbm [shape: f32[256,32], index: 0, kind: input, shape index: {}]   ;;  %s855_s1 = inlined_call_operand.hbm [shape: f32[32,96], index: 1, kind: input, shape index: {}]   ;;  %s856_s2 = inlined_call_operand.vmem [shape: f32[1,96], index: 2, kind: input, shape index: {}]   ;;  %s857_s3 = inlined_call_operand.vmem [shape: f32[256,96], index: 3, kind: output, shape index: {}]  }
   0x1   :  { %9 = vsyncpa [#allocation5], 0  ;;  %s627_s12 = smov [#allocation2]  }
   0x2   :  { %s15_s13 = sshll.u32 %s627_s12, 4  ;;  %s16_s13 = int_to_ptr.vmem [resolvable:$true] %s15_s13 }
   0x3   :  { %s591_s14 = scalar_lea.vmem %s16_s13, 4096  ;;  %p596_p1 = scmp.lt.s32.totalorder %s16_s13, %s16_s13 }
   0x4   :  { %p592_p0 = scmp.ne.s32.totalorder %s16_s13, %s591_s14  ;;  %p597_p2 = scmp.lt.s32.totalorder %s591_s14, %s591_s14 }
   0x6   :  { %p598_p3 = por %p597_p2, %p596_p1 }
   0x8   :  { %p599_p4 = pnand %p598_p3, %p592_p0 }
   0xa   :  { %602 = shalt.err (!%p599_p4)
}
   0xb   :  { %s628_s15 = smov 128   ;;  %s629_s16 = smov 8  }
   0xc   :  { %21 = dma.hbm_to_vmem [thread:$0]  %s854_s0, 4096, %s16_s13, [#allocation3], %s628_s15, %s628_s15, %s629_s16  }
   0xd   :  { %s630_s19 = smov [#allocation4]  }
   0xe   :  { %s27_s20 = sshll.u32 %s630_s19, 4  ;;  %s28_s20 = int_to_ptr.vmem [resolvable:$true] %s27_s20 }
   0xf   :  { %s611_s21 = scalar_lea.vmem %s28_s20, 512  ;;  %p616_p6 = scmp.lt.s32.totalorder %s28_s20, %s28_s20 }
  0x10   :  { %p612_p5 = scmp.ne.s32.totalorder %s28_s20, %s611_s21  ;;  %p617_p7 = scmp.lt.s32.totalorder %s611_s21, %s611_s21 }
  0x12   :  { %p618_p8 = por %p617_p7, %p616_p6 }
  0x14   :  { %p619_p9 = pnand %p618_p8, %p612_p5 }
  0x16   :  { %622 = shalt.err (!%p619_p9)
}
  0x17   :  { %33 = dma.hbm_to_vmem [thread:$0]  %s855_s1, 512, %s28_s20, [#allocation5], %s628_s15, %s628_s15, %s629_s16  }
  0x18   :  { %623 = dma.done.wait [#allocation3], 4096  }
  0x19   :  { %624 = vsyncadd [#allocation3], 4294963200 }
  0x1a   :  { %625 = dma.done.wait [#allocation5], 512  }
  0x1b   :  { %626 = vsyncadd [#allocation5], 4294966784  ;;  %v77_v0 = vld [vmem:[#allocation4 + $0x18] sm:$0xff]  ;;  %v76_v1 = vld [vmem:[#allocation4 + $0x10] sm:$0xff]  ;;  %vm85_vm0 = vcmask 261120   ;;  %vm407_vm1 = vcmask 785408  }
  0x1c   :  { %515 = vmatprep.subr.mxu0 %v77_v0  ;;  %571 = vmatprep.subr.mxu1 %v77_v0  ;;  %v75_v2 = vld [vmem:[#allocation4 + $0x8] sm:$0xff]  ;;  %v74_v3 = vld [vmem:[#allocation4] sm:$0xff]  ;;  %v44_v8 = vld [vmem:[#allocation2 + $0x10] sm:$0xff] }
  0x1d   :  { %516 = vmatpush3.msra.mxu0 %v77_v0  ;;  %575 = vmatpush3.msra.mxu1 %v77_v0  ;;  %v42_v4 = vld [vmem:[#allocation2] sm:$0xff]  ;;  %v43_v6 = vld [vmem:[#allocation2 + $0x8] sm:$0xff]  ;;  %v60_v9 = vld [vmem:[#allocation2 + $0x90] sm:$0xff] }
  0x1e   :  { %517 = vmatprep.subr.mxu0 %v76_v1  ;;  %572 = vmatprep.subr.mxu1 %v76_v1  ;;  %v58_v5 = vld [vmem:[#allocation2 + $0x80] sm:$0xff]  ;;  %v59_v7 = vld [vmem:[#allocation2 + $0x88] sm:$0xff]  ;;  %v45_v10 = vld [vmem:[#allocation2 + $0x18] sm:$0xff] }
  0x1f   :  { %518 = vmatpush3.msra.mxu0 %v76_v1  ;;  %576 = vmatpush3.msra.mxu1 %v76_v1  ;;  %v61_v11 = vld [vmem:[#allocation2 + $0x98] sm:$0xff]  ;;  %v46_v12 = vld [vmem:[#allocation2 + $0x20] sm:$0xff]  ;;  %v47_v14 = vld [vmem:[#allocation2 + $0x28] sm:$0xff] }
  0x20   :  { %519 = vmatprep.subr.mxu0 %v75_v2  ;;  %573 = vmatprep.subr.mxu1 %v75_v2  ;;  %v62_v13 = vld [vmem:[#allocation2 + $0xa0] sm:$0xff]  ;;  %v63_v15 = vld [vmem:[#allocation2 + $0xa8] sm:$0xff]  ;;  %v48_v16 = vld [vmem:[#allocation2 + $0x30] sm:$0xff] }
  0x21   :  { %520 = vmatpush3.msra.mxu0 %v75_v2  ;;  %577 = vmatpush3.msra.mxu1 %v75_v2  ;;  %v64_v17 = vld [vmem:[#allocation2 + $0xb0] sm:$0xff]  ;;  %v49_v18 = vld [vmem:[#allocation2 + $0x38] sm:$0xff]  ;;  %v50_v20 = vld [vmem:[#allocation2 + $0x40] sm:$0xff] }
  0x22   :  { %521 = vmatprep.subr.mxu0 %v74_v3  ;;  %574 = vmatprep.subr.mxu1 %v74_v3  ;;  %v65_v19 = vld [vmem:[#allocation2 + $0xb8] sm:$0xff]  ;;  %v66_v21 = vld [vmem:[#allocation2 + $0xc0] sm:$0xff]  ;;  %v51_v22 = vld [vmem:[#allocation2 + $0x48] sm:$0xff] }
  0x23   :  { %522 = vmatpush3.msra.mxu0 %v74_v3  ;;  %578 = vmatpush3.msra.mxu1 %v74_v3  ;;  %v67_v23 = vld [vmem:[#allocation2 + $0xc8] sm:$0xff]  ;;  %v52_v24 = vld [vmem:[#allocation2 + $0x50] sm:$0xff]  ;;  %v53_v26 = vld [vmem:[#allocation2 + $0x58] sm:$0xff] }
  0x24   :  { %523 = vmatprep.mubr.msk.f32.mxu0 %vm85_vm0, %v42_v4  ;;  %547 = vmatprep.mubr.msk.f32.mxu1 %vm85_vm0, %v58_v5  ;;  %v68_v25 = vld [vmem:[#allocation2 + $0xd0] sm:$0xff]  ;;  %v69_v27 = vld [vmem:[#allocation2 + $0xd8] sm:$0xff]  ;;  %v54_v28 = vld [vmem:[#allocation2 + $0x60] sm:$0xff] }
  0x25   :  { %524 = vmatmul.mubr.msk.f32.vlgmr.msra.gmra.mxu0 %vm85_vm0, %v43_v6  ;;  %548 = vmatmul.mubr.msk.f32.vlgmr.msra.gmra.mxu1 %vm85_vm0, %v59_v7  ;;  %v70_v29 = vld [vmem:[#allocation2 + $0xe0] sm:$0xff]  ;;  %v55_v30 = vld [vmem:[#allocation2 + $0x68] sm:$0xff]  ;;  %v56_v32 = vld [vmem:[#allocation2 + $0x70] sm:$0xff] }
  0x26   :  { %526 = vmatprep.mubr.msk.f32.mxu0 %vm85_vm0, %v44_v8  ;;  %550 = vmatprep.mubr.msk.f32.mxu1 %vm85_vm0, %v60_v9  ;;  %v71_v31 = vld [vmem:[#allocation2 + $0xe8] sm:$0xff]  ;;  %v72_v33 = vld [vmem:[#allocation2 + $0xf0] sm:$0xff]  ;;  %v57_v34 = vld [vmem:[#allocation2 + $0x78] sm:$0xff] }
  0x27   :  { %v73_v35 = vld [vmem:[#allocation2 + $0xf8] sm:$0xff]  ;;  %v692_v36 = vld [vmem:[%s856_s2] ss:$0 sm:$0xff] }
  0x29   :  { %527 = vmatmul.mubr.msk.f32.gmra.mxu0 %vm85_vm0, %v45_v10  ;;  %551 = vmatmul.mubr.msk.f32.gmra.mxu1 %vm85_vm0, %v61_v11 }
  0x2a   :  { %529 = vmatprep.mubr.msk.f32.mxu0 %vm85_vm0, %v46_v12  ;;  %553 = vmatprep.mubr.msk.f32.mxu1 %vm85_vm0, %v62_v13 }
  0x2d   :  { %530 = vmatmul.mubr.msk.f32.gmra.mxu0 %vm85_vm0, %v47_v14  ;;  %554 = vmatmul.mubr.msk.f32.gmra.mxu1 %vm85_vm0, %v63_v15 }
  0x2e   :  { %532 = vmatprep.mubr.msk.f32.mxu0 %vm85_vm0, %v48_v16  ;;  %556 = vmatprep.mubr.msk.f32.mxu1 %vm85_vm0, %v64_v17 }
  0x31   :  { %533 = vmatmul.mubr.msk.f32.gmra.mxu0 %vm85_vm0, %v49_v18  ;;  %557 = vmatmul.mubr.msk.f32.gmra.mxu1 %vm85_vm0, %v65_v19 }
  0x32   :  { %535 = vmatprep.mubr.msk.f32.mxu0 %vm85_vm0, %v50_v20  ;;  %559 = vmatprep.mubr.msk.f32.mxu1 %vm85_vm0, %v66_v21 }
  0x35   :  { %536 = vmatmul.mubr.msk.f32.gmra.mxu0 %vm85_vm0, %v51_v22  ;;  %560 = vmatmul.mubr.msk.f32.gmra.mxu1 %vm85_vm0, %v67_v23 }
  0x36   :  { %538 = vmatprep.mubr.msk.f32.mxu0 %vm85_vm0, %v52_v24  ;;  %562 = vmatprep.mubr.msk.f32.mxu1 %vm85_vm0, %v68_v25 }
  0x39   :  { %539 = vmatmul.mubr.msk.f32.gmra.mxu0 %vm85_vm0, %v53_v26  ;;  %563 = vmatmul.mubr.msk.f32.gmra.mxu1 %vm85_vm0, %v69_v27 }
  0x3a   :  { %541 = vmatprep.mubr.msk.f32.mxu0 %vm85_vm0, %v54_v28  ;;  %565 = vmatprep.mubr.msk.f32.mxu1 %vm85_vm0, %v70_v29 }
  0x3d   :  { %542 = vmatmul.mubr.msk.f32.gmra.mxu0 %vm85_vm0, %v55_v30  ;;  %566 = vmatmul.mubr.msk.f32.gmra.mxu1 %vm85_vm0, %v71_v31 }
  0x3e   :  { %544 = vmatprep.mubr.msk.f32.mxu0 %vm85_vm0, %v56_v32  ;;  %568 = vmatprep.mubr.msk.f32.mxu1 %vm85_vm0, %v72_v33 }
  0x41   :  { %545 = vmatmul.mubr.msk.f32.gmra.mxu0 %vm85_vm0, %v57_v34  ;;  %569 = vmatmul.mubr.msk.f32.gmra.mxu1 %vm85_vm0, %v73_v35 }
  0xe5   :  { %v525_v37 = vpop.f32.mrf.mxu0  ;;  %v549_v38 = vpop.f32.mrf.mxu1 }
  0xe6   :  { %v254_v39 = vadd.f32 %v525_v37, %v692_v36  ;;  %v334_v40 = vadd.f32 %v549_v38, %v692_v36 }
  0xe7   :  { %v248_v41 = vpop.f32.mrf.mxu0  ;;  %v328_v42 = vpop.f32.mrf.mxu1 }
  0xe8   :  { %409 = vst.msk [vmem:[%s857_s3 + $0x8] sm:$0xff] %vm407_vm1, %v254_v39  ;;  %425 = vst.msk [vmem:[%s857_s3 + $0x88] sm:$0xff] %vm407_vm1, %v334_v40  ;;  %v249_v43 = vadd.f32 %v692_v36, %v248_v41  ;;  %v329_v44 = vadd.f32 %v692_v36, %v328_v42 }
  0xe9   :  { %v528_v45 = vpop.f32.mrf.mxu0  ;;  %v552_v46 = vpop.f32.mrf.mxu1 }
  0xea   :  { %408 = vst.msk [vmem:[%s857_s3] sm:$0xff] %vm407_vm1, %v249_v43  ;;  %424 = vst.msk [vmem:[%s857_s3 + $0x80] sm:$0xff] %vm407_vm1, %v329_v44  ;;  %v264_v47 = vadd.f32 %v528_v45, %v692_v36  ;;  %v344_v48 = vadd.f32 %v552_v46, %v692_v36 }
  0xeb   :  { %v258_v49 = vpop.f32.mrf.mxu0  ;;  %v338_v50 = vpop.f32.mrf.mxu1 }
  0xec   :  { %411 = vst.msk [vmem:[%s857_s3 + $0x18] sm:$0xff] %vm407_vm1, %v264_v47  ;;  %427 = vst.msk [vmem:[%s857_s3 + $0x98] sm:$0xff] %vm407_vm1, %v344_v48  ;;  %v259_v51 = vadd.f32 %v692_v36, %v258_v49  ;;  %v339_v52 = vadd.f32 %v692_v36, %v338_v50 }
  0xed   :  { %v531_v53 = vpop.f32.mrf.mxu0  ;;  %v555_v54 = vpop.f32.mrf.mxu1 }
  0xee   :  { %410 = vst.msk [vmem:[%s857_s3 + $0x10] sm:$0xff] %vm407_vm1, %v259_v51  ;;  %426 = vst.msk [vmem:[%s857_s3 + $0x90] sm:$0xff] %vm407_vm1, %v339_v52  ;;  %v274_v55 = vadd.f32 %v531_v53, %v692_v36  ;;  %v354_v56 = vadd.f32 %v555_v54, %v692_v36 }
  0xef   :  { %v268_v57 = vpop.f32.mrf.mxu0  ;;  %v348_v58 = vpop.f32.mrf.mxu1 }
  0xf0   :  { %413 = vst.msk [vmem:[%s857_s3 + $0x28] sm:$0xff] %vm407_vm1, %v274_v55  ;;  %429 = vst.msk [vmem:[%s857_s3 + $0xa8] sm:$0xff] %vm407_vm1, %v354_v56  ;;  %v269_v59 = vadd.f32 %v692_v36, %v268_v57  ;;  %v349_v60 = vadd.f32 %v692_v36, %v348_v58 }
  0xf1   :  { %v534_v61 = vpop.f32.mrf.mxu0  ;;  %v558_v62 = vpop.f32.mrf.mxu1 }
  0xf2   :  { %412 = vst.msk [vmem:[%s857_s3 + $0x20] sm:$0xff] %vm407_vm1, %v269_v59  ;;  %428 = vst.msk [vmem:[%s857_s3 + $0xa0] sm:$0xff] %vm407_vm1, %v349_v60  ;;  %v284_v63 = vadd.f32 %v534_v61, %v692_v36  ;;  %v364_v0 = vadd.f32 %v558_v62, %v692_v36 }
  0xf3   :  { %v278_v1 = vpop.f32.mrf.mxu0  ;;  %v358_v2 = vpop.f32.mrf.mxu1 }
  0xf4   :  { %415 = vst.msk [vmem:[%s857_s3 + $0x38] sm:$0xff] %vm407_vm1, %v284_v63  ;;  %431 = vst.msk [vmem:[%s857_s3 + $0xb8] sm:$0xff] %vm407_vm1, %v364_v0  ;;  %v279_v3 = vadd.f32 %v692_v36, %v278_v1  ;;  %v359_v4 = vadd.f32 %v692_v36, %v358_v2 }
  0xf5   :  { %v537_v5 = vpop.f32.mrf.mxu0  ;;  %v561_v6 = vpop.f32.mrf.mxu1 }
  0xf6   :  { %414 = vst.msk [vmem:[%s857_s3 + $0x30] sm:$0xff] %vm407_vm1, %v279_v3  ;;  %430 = vst.msk [vmem:[%s857_s3 + $0xb0] sm:$0xff] %vm407_vm1, %v359_v4  ;;  %v294_v7 = vadd.f32 %v537_v5, %v692_v36  ;;  %v374_v8 = vadd.f32 %v561_v6, %v692_v36 }
  0xf7   :  { %v288_v9 = vpop.f32.mrf.mxu0  ;;  %v368_v10 = vpop.f32.mrf.mxu1 }
  0xf8   :  { %417 = vst.msk [vmem:[%s857_s3 + $0x48] sm:$0xff] %vm407_vm1, %v294_v7  ;;  %433 = vst.msk [vmem:[%s857_s3 + $0xc8] sm:$0xff] %vm407_vm1, %v374_v8  ;;  %v289_v11 = vadd.f32 %v692_v36, %v288_v9  ;;  %v369_v12 = vadd.f32 %v692_v36, %v368_v10 }
  0xf9   :  { %v540_v13 = vpop.f32.mrf.mxu0  ;;  %v564_v14 = vpop.f32.mrf.mxu1 }
  0xfa   :  { %416 = vst.msk [vmem:[%s857_s3 + $0x40] sm:$0xff] %vm407_vm1, %v289_v11  ;;  %432 = vst.msk [vmem:[%s857_s3 + $0xc0] sm:$0xff] %vm407_vm1, %v369_v12  ;;  %v304_v15 = vadd.f32 %v540_v13, %v692_v36  ;;  %v384_v16 = vadd.f32 %v564_v14, %v692_v36 }
  0xfb   :  { %v298_v17 = vpop.f32.mrf.mxu0  ;;  %v378_v18 = vpop.f32.mrf.mxu1 }
  0xfc   :  { %419 = vst.msk [vmem:[%s857_s3 + $0x58] sm:$0xff] %vm407_vm1, %v304_v15  ;;  %435 = vst.msk [vmem:[%s857_s3 + $0xd8] sm:$0xff] %vm407_vm1, %v384_v16  ;;  %v299_v19 = vadd.f32 %v692_v36, %v298_v17  ;;  %v379_v20 = vadd.f32 %v692_v36, %v378_v18 }
  0xfd   :  { %v543_v21 = vpop.f32.mrf.mxu0  ;;  %v567_v22 = vpop.f32.mrf.mxu1 }
  0xfe   :  { %418 = vst.msk [vmem:[%s857_s3 + $0x50] sm:$0xff] %vm407_vm1, %v299_v19  ;;  %434 = vst.msk [vmem:[%s857_s3 + $0xd0] sm:$0xff] %vm407_vm1, %v379_v20  ;;  %v314_v23 = vadd.f32 %v543_v21, %v692_v36  ;;  %v394_v24 = vadd.f32 %v567_v22, %v692_v36 }
  0xff   :  { %v308_v25 = vpop.f32.mrf.mxu0  ;;  %v388_v26 = vpop.f32.mrf.mxu1 }
 0x100   :  { %421 = vst.msk [vmem:[%s857_s3 + $0x68] sm:$0xff] %vm407_vm1, %v314_v23  ;;  %437 = vst.msk [vmem:[%s857_s3 + $0xe8] sm:$0xff] %vm407_vm1, %v394_v24  ;;  %v309_v27 = vadd.f32 %v692_v36, %v308_v25  ;;  %v389_v28 = vadd.f32 %v692_v36, %v388_v26 }
 0x101   :  { %v546_v29 = vpop.f32.mrf.mxu0  ;;  %v570_v30 = vpop.f32.mrf.mxu1 }
 0x102   :  { %420 = vst.msk [vmem:[%s857_s3 + $0x60] sm:$0xff] %vm407_vm1, %v309_v27  ;;  %436 = vst.msk [vmem:[%s857_s3 + $0xe0] sm:$0xff] %vm407_vm1, %v389_v28  ;;  %v324_v31 = vadd.f32 %v546_v29, %v692_v36  ;;  %v404_v32 = vadd.f32 %v570_v30, %v692_v36 }
 0x103   :  { %v318_v33 = vpop.f32.mrf.mxu0  ;;  %v398_v34 = vpop.f32.mrf.mxu1 }
 0x104   :  { %423 = vst.msk [vmem:[%s857_s3 + $0x78] sm:$0xff] %vm407_vm1, %v324_v31  ;;  %439 = vst.msk [vmem:[%s857_s3 + $0xf8] sm:$0xff] %vm407_vm1, %v404_v32  ;;  %v319_v35 = vadd.f32 %v692_v36, %v318_v33  ;;  %v399_v37 = vadd.f32 %v692_v36, %v398_v34 }
 0x106   :  { %422 = vst.msk [vmem:[%s857_s3 + $0x70] sm:$0xff] %vm407_vm1, %v319_v35  ;;  %438 = vst.msk [vmem:[%s857_s3 + $0xf0] sm:$0xff] %vm407_vm1, %v399_v37 }
 0x107   :  { %444 = vsyncpa [#allocation3], 1 }
 0x108   :  { %445 = vsyncpa [#allocation5], 1 }

// kernel: temporal_encoder_forward.3
= control target key start
LH: loop header
LB: loop body
LE: loop exit
PB: predicated region body
PF: predicated region fallthrough
CT: control target
= control target key end

     0   :  { %9 = vsyncpa [#allocation6], 0  ;;  %s7140_s0 = inlined_call_operand.vmem [shape: f32[8,32,96], index: 0, kind: input, shape index: {}]   ;;  %s7141_s1 = inlined_call_operand.vmem [shape: f32[8,32,32], index: 1, kind: input, shape index: {}]   ;;  %s7142_s2 = inlined_call_operand.vmem [shape: f32[1,32], index: 2, kind: input, shape index: {}]   ;;  %s7143_s3 = inlined_call_operand.vmem [shape: f32[32,96], index: 3, kind: input, shape index: {}]   ;;  %s7144_s4 = inlined_call_operand.hbm [shape: f32[8,32,32], index: 4, kind: output, shape index: {}]  }
   0x1   :  { %11 = vsyncpa [#allocation6 + $0x1], 0  ;;  %s5625_s15 = smov 0   ;;  %s5627_s16 = smov 0  }
   0x2   :  { %s5629_s17 = smov 0   ;;  %s5631_s18 = smov 0  }
   0x3   :  { %s5633_s19 = smov 0   ;;  %s5635_s20 = smov 0  }
   0x4   :  { %s5637_s21 = smov 0   ;;  %s5639_s22 = smov 0  }
   0x5 LB: > { %s4671_s23 = sadd.s32 4294967295, %s5585_s22   ;;  %s4672_s24 = sadd.s32 4294967294, %s5585_s22   ;;  %s5585_s22 = sphi %s5639_s22, %s17_s22   ;;  %s5581_s21 = sphi %s5637_s21, %s7202_s21   ;;  %s5577_s20 = sphi %s5635_s20, %s7201_s20   ;;  %s5573_s19 = sphi %s5633_s19, %s7200_s19   ;;  %s5569_s18 = sphi %s5631_s18, %s7199_s18   ;;  %s5565_s17 = sphi %s5629_s17, %s7198_s17   ;;  %s5561_s16 = sphi %s5627_s16, %s7197_s16   ;;  %s5557_s15 = sphi %s5625_s15, %s7196_s15  }
   0x6   : > { %s26_s25 = sadd.s32 1, %s5577_s20  ;;  %s29_s26 = sadd.s32 1, %s5581_s21 }
   0x7   : > { %p27_p0 = scmp.ge.s32.totalorder %s26_s25, 2  ;;  %p45_p1 = scmp.ne.s32.totalorder %s5565_s17, %s5561_s16 }
   0x8   : > { %p46_p2 = scmp.eq.s32.totalorder %s5585_s22, 0  ;;  %p147_p5 = scmp.eq.s32.totalorder %s4671_s23, 3 }
   0x9   : > { %s7204_s25 = smov (%p27_p0, %s26_s25), 0  ;;  %s7206_s26 = smov (!%p27_p0, %s29_s26), %s5581_s21 }
   0xa   : > { %s34_s27 = ssub.s32 %s5577_s20, %s7204_s25  ;;  %p5677_p3 = por %p46_p2, %p45_p1 }
   0xb   : > { %p31_p4 = scmp.ge.s32.totalorder %s7206_s26, 2  ;;  %p152_p6 = scmp.ne.s32.totalorder %s5561_s16, %s5557_s15 }
   0xc   : > { %p153_p7 = scmp.eq.s32.totalorder %s4672_s24, 3  ;;  %p5685_p8 = por %p147_p5, %p45_p1 }
   0xd   : > { %s7208_s26 = smov (%p31_p4, %s7206_s26), 0  ;;  %s38_s7 = sadd.s32 1, %s5565_s17 }
   0xe   : > { %p5689_p9 = por %p153_p7, %p152_p6  ;;  %s33_s5 = ssub.s32 %s5581_s21, %s7208_s26 }
   0xf   : > { %s35_s6 = sor.u32 %s34_s27, %s33_s5  ;;  %p4674_p11 = scmp.ge.s32.totalorder %s5585_s22, 4 }
  0x10   : > { %p36_p10 = scmp.eq.s32.totalorder %s35_s6, 0 }
  0x11   : > { %175 = sbr.rel (%p4674_p11) target bundleno = 44 (0x2c), region = 24 }
  0x12   : > { %s5697_s8 = scalar_select %p36_p10, %s5565_s17, %s38_s7  }
  0x16   : > { %178 = sbr.rel (!%p5677_p3) target bundleno = 33 (0x21), region = 28  ;;  %s180_s9 = sand.u32 (%p5677_p3), 1, %s5565_s17  }
  0x17   : > { %s4677_s10 = sshll.u32 (%p5677_p3), %s5577_s20, 1  ;;  %s4675_s11 = sshll.u32 (%p5677_p3), %s180_s9, 6 }
  0x18   : > { %s4778_s12 = sshll.u32 (%p5677_p3), %s5581_s21, 4  ;;  %s182_s5 = scalar_lea.vmem (%p5677_p3), [#allocation3], %s4675_s11 }
  0x19   : > { %s186_s13 = sadd.s32 (%p5677_p3), %s4778_s12, %s4677_s10 }
  0x1a   : > { %s4679_s14 = sshll.u32 (%p5677_p3), %s186_s13, 3 }
  0x1b   : > { %s188_s27 = scalar_lea.vmem %s7140_s0, %s4679_s14 }
  0x1c   : > { %v231_v0 = vld [vmem:[%s188_s27] sm:$0xff]  ;;  %v233_v1 = vld [vmem:[%s188_s27 + $0x8] sm:$0xff] }
  0x1d   : > { %v235_v2 = vld [vmem:[%s188_s27 + $0x20] sm:$0xff]  ;;  %232 = vst [vmem:[%s182_s5] sm:$0xff] %v231_v0  ;;  %234 = vst [vmem:[%s182_s5 + $0x8] sm:$0xff] %v233_v1  ;;  %v237_v3 = vld [vmem:[%s188_s27 + $0x28] sm:$0xff] }
  0x1e   : > { %236 = vst [vmem:[%s182_s5 + $0x10] sm:$0xff] %v235_v2  ;;  %v239_v4 = vld [vmem:[%s188_s27 + $0x40] sm:$0xff]  ;;  %v241_v5 = vld [vmem:[%s188_s27 + $0x48] sm:$0xff]  ;;  %238 = vst [vmem:[%s182_s5 + $0x18] sm:$0xff] %v237_v3 }
  0x1f   : > { %240 = vst [vmem:[%s182_s5 + $0x20] sm:$0xff] %v239_v4  ;;  %242 = vst [vmem:[%s182_s5 + $0x28] sm:$0xff] %v241_v5  ;;  %v243_v6 = vld [vmem:[%s188_s27 + $0x60] sm:$0xff]  ;;  %v245_v7 = vld [vmem:[%s188_s27 + $0x68] sm:$0xff] }
  0x20   : > { %244 = vst [vmem:[%s182_s5 + $0x30] sm:$0xff] %v243_v6  ;;  %246 = vst [vmem:[%s182_s5 + $0x38] sm:$0xff] %v245_v7 }
  0x21 PF: > { %252 = sbr.rel (!%p5677_p3) target bundleno = 44 (0x2c), region = 66  ;;  %s254_s6 = sand.u32 (%p5677_p3), 1, %s5565_s17  }
  0x22   : > { %s4682_s7 = sshll.u32 (%p5677_p3), %s5577_s20, 1  ;;  %s4680_s9 = sshll.u32 (%p5677_p3), %s254_s6, 6 }
  0x23   : > { %s4779_s10 = sshll.u32 (%p5677_p3), %s5581_s21, 4  ;;  %s256_s24 = scalar_lea.vmem (%p5677_p3), [#allocation4], %s4680_s9 }
  0x24   : > { %s260_s11 = sadd.s32 (%p5677_p3), %s4779_s10, %s4682_s7 }
  0x25   : > { %s4684_s12 = sshll.u32 (%p5677_p3), %s260_s11, 3 }
  0x26   : > { %s262_s23 = scalar_lea.vmem %s7141_s1, %s4684_s12 }
  0x27   : > { %v305_v8 = vld [vmem:[%s262_s23] sm:$0xff]  ;;  %v307_v9 = vld [vmem:[%s262_s23 + $0x8] sm:$0xff] }
  0x28   : > { %v309_v10 = vld [vmem:[%s262_s23 + $0x20] sm:$0xff]  ;;  %306 = vst [vmem:[%s256_s24] sm:$0xff] %v305_v8  ;;  %308 = vst [vmem:[%s256_s24 + $0x8] sm:$0xff] %v307_v9  ;;  %v311_v11 = vld [vmem:[%s262_s23 + $0x28] sm:$0xff] }
  0x29   : > { %310 = vst [vmem:[%s256_s24 + $0x10] sm:$0xff] %v309_v10  ;;  %v313_v12 = vld [vmem:[%s262_s23 + $0x40] sm:$0xff]  ;;  %v315_v13 = vld [vmem:[%s262_s23 + $0x48] sm:$0xff]  ;;  %312 = vst [vmem:[%s256_s24 + $0x18] sm:$0xff] %v311_v11 }
  0x2a   : > { %314 = vst [vmem:[%s256_s24 + $0x20] sm:$0xff] %v313_v12  ;;  %316 = vst [vmem:[%s256_s24 + $0x28] sm:$0xff] %v315_v13  ;;  %v317_v14 = vld [vmem:[%s262_s23 + $0x60] sm:$0xff]  ;;  %v319_v15 = vld [vmem:[%s262_s23 + $0x68] sm:$0xff] }
  0x2b   : > { %318 = vst [vmem:[%s256_s24 + $0x30] sm:$0xff] %v317_v14  ;;  %320 = vst [vmem:[%s256_s24 + $0x38] sm:$0xff] %v319_v15 }
  0x2c PF: > { %p4685_p12 = scmp.ge.s32.totalorder %s5585_s22, 1  ;;  %p325_p13 = scmp.lt.s32.totalorder %s5585_s22, 5 }
  0x2e   : > { %p326_p0 = pnand %p4685_p12, %p325_p13 }
  0x30   : > { %329 = sbr.rel (%p326_p0) target bundleno = 13828 (0x3604), region = 104 }
  0x35   : > { %s332_s28 = sand.u32 1, %s5561_s16   ;;  %p4689_p1 = scmp.ne.s32.totalorder %s5569_s18, 0 }
  0x36   : > { %s4686_s27 = sshll.u32 %s332_s28, 6 }
  0x37   : > { %s5721_s5 = scalar_lea.vmem [#allocation3], %s4686_s27  ;;  %s5723_s6 = scalar_lea.vmem [#allocation4], %s4686_s27 }
  0x38   : > { %s5725_s7 = scalar_lea.vmem [#allocation5], %s4686_s27  ;;  %377 = sbr.rel (%p4689_p1) target bundleno = 63 (0x3f), region = 116 }
  0x3d   : > { %vm378_vm0 = vcmask 257024   ;;  %v5587_v16 = vmov 0.0  }
  0x3e   : > { %379 = vst.msk [vmem:[#allocation2] sm:$0xf] %vm378_vm0, %v5587_v16 }
  0x3f PF: > { %v5731_v17 = vld [vmem:[%s7143_s3 + $0x18] sm:$0xff]  ;;  %v7145_v18 = vmov 0.0   ;;  %v5737_v19 = vld [vmem:[%s7143_s3 + $0x10] sm:$0xff]  ;;  %vm5589_vm1 = vmmov 0   ;;  %v4695_v20 = vld [vmem:[%s7142_s2] ss:$0 sm:$0xff] }
  0x40   : > { %4861 = vmatprep.subr.mxu0 %v7145_v18  ;;  %4869 = vmatprep.mubr.msk.f32.mxu0 %vm5589_vm1, %v7145_v18  ;;  %s5590_s23 = smov 64   ;;  %v5750_v21 = vld [vmem:[%s7143_s3 + $0x8] sm:$0xff]  ;;  %v5759_v22 = vld [vmem:[%s7143_s3] sm:$0xff]  ;;  %vm390_vm2 = vcmask 261120   ;;  %v387_v32 = vld [vmem:[%s5721_s5 + $0x10] sm:$0x1] }
  0x41   : > { %4862 = vmatpush3.msra.mxu0 %v5731_v17  ;;  %505 = vrot.lane.b32.xlu0 %v4695_v20, %s5590_s23  ;;  %v388_v34 = vld [vmem:[%s5721_s5 + $0x20] sm:$0x1]  ;;  %v389_v39 = vld [vmem:[%s5721_s5 + $0x30] sm:$0x1]  ;;  %vm558_vm3 = vcmask 1041409   ;;  %vm561_vm4 = vcmask 1042434  }
  0x42   : > { %4863 = vmatprep.subr.mxu0 %v7145_v18  ;;  %4872 = vmatprep.subr.mxu1 %v7145_v18  ;;  %v386_v36 = vld [vmem:[%s5721_s5] sm:$0x1]  ;;  %vm564_vm5 = vcmask 1043459   ;;  %s5591_s11 = smov 32   ;;  %s5592_s12 = smov 96   ;;  %vm650_vm6 = vcmask 253952  }
  0x43   : > { %4864 = vmatpush3.msra.mxu0 %v5737_v19  ;;  %4873 = vmatpush3.msra.mxu1 %v5731_v17  ;;  %vm4523_vm7 = vcmask 257024  }
  0x44   : > { %4865 = vmatprep.subr.mxu0 %v7145_v18  ;;  %4874 = vmatprep.subr.mxu1 %v7145_v18 }
  0x45   : > { %4866 = vmatpush3.msra.mxu0 %v5750_v21  ;;  %v5763_v23 = vld [vmem:[#allocation2] sm:$0xf]  ;;  %4875 = vmatpush3.msra.mxu1 %v5737_v19 }
  0x46   : > { %4867 = vmatprep.subr.mxu0 %v7145_v18  ;;  %4876 = vmatprep.subr.mxu1 %v7145_v18 }
  0x47   : > { %4868 = vmatpush3.msra.mxu0 %v5759_v22  ;;  %4877 = vmatpush3.msra.mxu1 %v5750_v21 }
  0x48   : > { %4870 = vmatmul.mubr.msk.f32.vlgmr.msra.gmra.mxu0 %vm390_vm2, %v5763_v23  ;;  %4878 = vmatprep.subr.mxu1 %v7145_v18 }
  0x49   : > { %4879 = vmatpush3.msra.mxu1 %v5759_v22  ;;  %4880 = vmatprep.mubr.msk.f32.mxu1 %vm5589_vm1, %v7145_v18 }
  0x4a   : > { %4883 = vmatprep.subr.mxu0 %v7145_v18  ;;  %4891 = vmatprep.mubr.msk.f32.mxu0 %vm5589_vm1, %v7145_v18 }
  0x4b   : > { %4884 = vmatpush3.msra.mxu0 %v5731_v17  ;;  %4894 = vmatprep.subr.mxu1 %v7145_v18 }
  0x4c   : > { %4885 = vmatprep.subr.mxu0 %v7145_v18 }
  0x4d   : > { %4886 = vmatpush3.msra.mxu0 %v5737_v19 }
  0x4e   : > { %4887 = vmatprep.subr.mxu0 %v7145_v18 }
  0x4f   : > { %4888 = vmatpush3.msra.mxu0 %v5750_v21 }
  0x50   : > { %4889 = vmatprep.subr.mxu0 %v7145_v18 }
  0x51   : > { %4890 = vmatpush3.msra.mxu0 %v5759_v22 }
  0x52   : > { %4905 = vmatprep.subr.mxu0 %v7145_v18 }
  0xb3   : > { %v5788_v24 = vpop.permute.xlu0 %505 }
 0x108   : > { %v460_v25 = vpop.f32.mrf.mxu0 }
 0x109   : > { %v508_v27 = vadd.f32 %v5788_v24, %v460_v25  ;;  %v465_v31 = vrot.slane %v460_v25, 1  ;;  %v466_v33 = vrot.slane %v460_v25, 2  ;;  %v467_v37 = vrot.slane %v460_v25, 3 }
 0x10a   : > { %v4871_v26 = vpop.f32.mrf.mxu0  ;;  %v472_v40 = vadd.f32 %v460_v25, %v386_v36 }
 0x10b   : > { %v511_v28 = vrot.slane %v508_v27, 2  ;;  %v510_v29 = vrot.slane %v508_v27, 1  ;;  %v512_v30 = vrot.slane %v508_v27, 3  ;;  %v473_v35 = vadd.f32 %v465_v31, %v387_v32 }
 0x10c   : > { %v474_v38 = vadd.f32 %v466_v33, %v388_v34  ;;  %v475_v42 = vadd.f32 %v467_v37, %v389_v39  ;;  %v4691_v44 = vmul.f32 -1.442695, %v472_v40 }
 0x10d   : > { %517 = vrot.lane.b32.xlu1 %v511_v28, %s5590_s23  ;;  %515 = vrot.lane.b32.xlu0 %v510_v29, %s5590_s23  ;;  %v4692_v41 = vmul.f32 -1.442695, %v473_v35 }
 0x10e   : > { %v4693_v43 = vmul.f32 -1.442695, %v474_v38  ;;  %v4694_v45 = vmul.f32 -1.442695, %v475_v42 }
 0x10f   : > { %5127 = vpow2.f32 %v4692_v41 }
 0x110   : > { %5129 = vpow2.f32 %v4693_v43 }
 0x111   : > { %513 = vrot.lane.b32.xlu1 %v508_v27, %s5590_s23  ;;  %519 = vrot.lane.b32.xlu0 %v512_v30, %s5590_s23  ;;  %5131 = vpow2.f32 %v4691_v44 }
 0x112   : > { %5133 = vpow2.f32 %v4694_v45 }
 0x11c   : > { %v5128_v46 = vpop.eup %5127 }
 0x11d   : > { %v5130_v47 = vpop.eup %5129  ;;  %v489_v48 = vadd.f32 1.0, %v5128_v46 }
 0x11e   : > { %v5132_v49 = vpop.eup %5131  ;;  %v490_v50 = vadd.f32 1.0, %v5130_v47 }
 0x11f   : > { %v5134_v51 = vpop.eup %5133  ;;  %v488_v52 = vadd.f32 1.0, %v5132_v49  ;;  %5135 = vrcp.f32 %v489_v48 }
 0x120   : > { %v491_v53 = vadd.f32 1.0, %v5134_v51  ;;  %5137 = vrcp.f32 %v490_v50 }
 0x121   : > { %5139 = vrcp.f32 %v488_v52 }
 0x122   : > { %5141 = vrcp.f32 %v491_v53 }
 0x12c   : > { %v5136_v54 = vpop.eup %5135 }
 0x12d   : > { %v5138_v55 = vpop.eup %5137 }
 0x12e   : > { %v5140_v60 = vpop.eup %5139 }
 0x12f   : > { %v5142_v61 = vpop.eup %5141 }
 0x17f   : > { %v518_v56 = vpop.permute.xlu1 %517  ;;  %v516_v57 = vpop.permute.xlu0 %515 }
 0x180   : > { %v527_v58 = vmul.f32 %v5138_v55, %v518_v56  ;;  %v526_v59 = vmul.f32 %v5136_v54, %v516_v57 }
 0x182   : > { %537 = vrot.lane.b32.xlu0 %v527_v58, %s5590_s23  ;;  %535 = vrot.lane.b32.xlu1 %v526_v59, %s5590_s23 }
 0x183   : > { %v514_v62 = vpop.permute.xlu1 %513  ;;  %v520_v63 = vpop.permute.xlu0 %519 }
 0x184   : > { %v525_v0 = vmul.f32 %v5140_v60, %v514_v62  ;;  %v528_v1 = vmul.f32 %v5142_v61, %v520_v63  ;;  %v657_v63 = vld [vmem:[%s5721_s5 + $0x21] sm:$0x1] }
 0x186   : > { %533 = vrot.lane.b32.xlu1 %v525_v0, %s5590_s23  ;;  %539 = vrot.lane.b32.xlu0 %v528_v1, %s5590_s23  ;;  %v655_v1 = vld [vmem:[%s5721_s5 + $0x1] sm:$0x1] }
 0x1f4   : > { %v536_v2 = vpop.permute.xlu1 %535  ;;  %v538_v3 = vpop.permute.xlu0 %537 }
 0x1f5   : > { %v546_v4 = vadd.f32 %v536_v2, %v387_v32  ;;  %v547_v5 = vadd.f32 %v538_v3, %v388_v34 }
 0x1f7   : > { %5143 = vtanh.f32 %v546_v4  ;;  %v658_v4 = vld [vmem:[%s5721_s5 + $0x31] sm:$0x1] }
 0x1f8   : > { %5145 = vtanh.f32 %v547_v5  ;;  %v534_v6 = vpop.permute.xlu1 %533  ;;  %v540_v7 = vpop.permute.xlu0 %539 }
 0x1f9   : > { %v545_v8 = vadd.f32 %v534_v6, %v386_v36  ;;  %v548_v9 = vadd.f32 %v540_v7, %v389_v39 }
 0x1fb   : > { %5147 = vtanh.f32 %v545_v8 }
 0x1fc   : > { %5149 = vtanh.f32 %v548_v9 }
 0x204   : > { %v5144_v10 = vpop.eup %5143 }
 0x205   : > { %v5146_v11 = vpop.eup %5145  ;;  %v557_v12 = vrot.slane %v5144_v10, 7 }
 0x206   : > { %v560_v14 = vrot.slane %v5146_v11, 6 }
 0x208   : > { %v5148_v13 = vpop.eup %5147 }
 0x209   : > { %v5150_v15 = vpop.eup %5149  ;;  %v559_v16 = vsel %vm558_vm3, %v557_v12, %v5148_v13 }
 0x20a   : > { %v562_v20 = vsel %vm561_vm4, %v560_v14, %v559_v16  ;;  %v563_v25 = vrot.slane %v5150_v15, 5 }
 0x20c   : > { %v565_v26 = vsel %vm564_vm5, %v563_v25, %v562_v20 }
 0x20d   : > { %566 = vrot.lane.b32.xlu1 %v565_v26, %s5590_s23 }
 0x27f   : > { %v567_v27 = vpop.permute.xlu1 %566 }
 0x280   : > { %v569_v28 = vsub.f32 %v5763_v23, %v567_v27 }
 0x282   : > { %v572_v29 = vrot.slane %v569_v28, 2  ;;  %v571_v30 = vrot.slane %v569_v28, 1  ;;  %v573_v31 = vrot.slane %v569_v28, 3 }
 0x284   : > { %578 = vrot.lane.b32.xlu1 %v572_v29, %s5591_s11  ;;  %576 = vrot.lane.b32.xlu0 %v571_v30, %s5591_s11 }
 0x288   : > { %580 = vrot.lane.b32.xlu1 %v573_v31, %s5591_s11  ;;  %574 = vrot.lane.b32.xlu0 %v569_v28, %s5591_s11 }
 0x2f6   : > { %v579_v32 = vpop.permute.xlu1 %578  ;;  %v577_v33 = vpop.permute.xlu0 %576 }
 0x2f7   : > { %v588_v34 = vmul.f32 %v5138_v55, %v579_v32  ;;  %v587_v35 = vmul.f32 %v5136_v54, %v577_v33 }
 0x2f9   : > { %598 = vrot.lane.b32.xlu1 %v588_v34, %s5591_s11  ;;  %596 = vrot.lane.b32.xlu0 %v587_v35, %s5591_s11 }
 0x2fa   : > { %v581_v23 = vpop.permute.xlu1 %580  ;;  %v575_v36 = vpop.permute.xlu0 %574 }
 0x2fb   : > { %v589_v37 = vmul.f32 %v5142_v61, %v581_v23  ;;  %v586_v38 = vmul.f32 %v5140_v60, %v575_v36  ;;  %v656_v61 = vld [vmem:[%s5721_s5 + $0x11] sm:$0x1] }
 0x2fd   : > { %600 = vrot.lane.b32.xlu1 %v589_v37, %s5591_s11  ;;  %594 = vrot.lane.b32.xlu0 %v586_v38, %s5591_s11 }
 0x36b   : > { %v599_v39 = vpop.permute.xlu1 %598  ;;  %v597_v40 = vpop.permute.xlu0 %596 }
 0x36c   : > { %v5816_v41 = vadd.f32 %v5144_v10, %v597_v40  ;;  %v5818_v42 = vadd.f32 %v5146_v11, %v599_v39 }
 0x36e   : > { %v663_v45 = vrot.slane %v5816_v41, 7  ;;  %v665_v48 = vrot.slane %v5818_v42, 6 }
 0x36f   : > { %v601_v43 = vpop.permute.xlu1 %600  ;;  %v595_v44 = vpop.permute.xlu0 %594 }
 0x370   : > { %v5821_v46 = vadd.f32 %v5150_v15, %v601_v43  ;;  %v5823_v47 = vadd.f32 %v5148_v13, %v595_v44 }
 0x372   : > { %v664_v49 = vsel %vm558_vm3, %v663_v45, %v5823_v47  ;;  %v667_v50 = vrot.slane %v5821_v46, 5 }
 0x373   : > { %v666_v51 = vsel %vm561_vm4, %v665_v48, %v664_v49 }
 0x374   : > { %v668_v52 = vsel %vm564_vm5, %v667_v50, %v666_v51 }
 0x375   : > { %669 = vrot.lane.b32.xlu0 %v668_v52, %s5590_s23 }
 0x3e7   : > { %v670_v53 = vpop.permute.xlu0 %669 }
 0x3e8   : > { %4881 = vmatmul.mubr.msk.f32.vlgmr.msra.gmra.mxu1 %vm390_vm2, %v670_v53 }
 0x3e9   : > { %4895 = vmatpush3.msra.mxu1 %v5731_v17  ;;  %4902 = vmatprep.mubr.msk.f32.mxu1 %vm5589_vm1, %v7145_v18 }
 0x3ea   : > { %4896 = vmatprep.subr.mxu1 %v7145_v18 }
 0x3eb   : > { %4897 = vmatpush3.msra.mxu1 %v5737_v19 }
 0x3ec   : > { %4898 = vmatprep.subr.mxu1 %v7145_v18 }
 0x3ed   : > { %4899 = vmatpush3.msra.mxu1 %v5750_v21 }
 0x3ee   : > { %4900 = vmatprep.subr.mxu1 %v7145_v18 }
 0x3ef   : > { %4901 = vmatpush3.msra.mxu1 %v5759_v22 }
 0x3f0   : > { %4916 = vmatprep.subr.mxu1 %v7145_v18 }
 0x4a8   : > { %v739_v54 = vpop.f32.mrf.mxu1 }
 0x4a9   : > { %v779_v55 = vadd.f32 %v739_v54, %v5788_v24  ;;  %v744_v60 = vrot.slane %v739_v54, 1  ;;  %v745_v62 = vrot.slane %v739_v54, 2  ;;  %v746_v2 = vrot.slane %v739_v54, 3 }
 0x4aa   : > { %v4882_v56 = vpop.f32.mrf.mxu1  ;;  %v751_v5 = vadd.f32 %v739_v54, %v655_v1 }
 0x4ab   : > { %v782_v57 = vrot.slane %v779_v55, 2  ;;  %v781_v58 = vrot.slane %v779_v55, 1  ;;  %v783_v59 = vrot.slane %v779_v55, 3  ;;  %v752_v0 = vadd.f32 %v744_v60, %v656_v61 }
 0x4ac   : > { %v753_v3 = vadd.f32 %v745_v62, %v657_v63  ;;  %v754_v7 = vadd.f32 %v746_v2, %v658_v4  ;;  %v4697_v9 = vmul.f32 -1.442695, %v751_v5 }
 0x4ad   : > { %788 = vrot.lane.b32.xlu0 %v782_v57, %s5590_s23  ;;  %786 = vrot.lane.b32.xlu1 %v781_v58, %s5590_s23  ;;  %v4698_v6 = vmul.f32 -1.442695, %v752_v0 }
 0x4ae   : > { %v4699_v8 = vmul.f32 -1.442695, %v753_v3  ;;  %v4700_v10 = vmul.f32 -1.442695, %v754_v7 }
 0x4af   : > { %5151 = vpow2.f32 %v4698_v6 }
 0x4b0   : > { %5153 = vpow2.f32 %v4699_v8 }
 0x4b1   : > { %790 = vrot.lane.b32.xlu0 %v783_v59, %s5590_s23  ;;  %784 = vrot.lane.b32.xlu1 %v779_v55, %s5590_s23  ;;  %5155 = vpow2.f32 %v4697_v9 }
 0x4b2   : > { %5157 = vpow2.f32 %v4700_v10 }
 0x4bc   : > { %v5152_v11 = vpop.eup %5151 }
 0x4bd   : > { %v5154_v12 = vpop.eup %5153  ;;  %v768_v13 = vadd.f32 1.0, %v5152_v11 }
 0x4be   : > { %v5156_v14 = vpop.eup %5155  ;;  %v769_v15 = vadd.f32 1.0, %v5154_v12 }
 0x4bf   : > { %v5158_v16 = vpop.eup %5157  ;;  %v767_v20 = vadd.f32 1.0, %v5156_v14  ;;  %5159 = vrcp.f32 %v768_v13 }
 0x4c0   : > { %v770_v25 = vadd.f32 1.0, %v5158_v16  ;;  %5161 = vrcp.f32 %v769_v15 }
 0x4c1   : > { %5163 = vrcp.f32 %v767_v20 }
 0x4c2   : > { %5165 = vrcp.f32 %v770_v25 }
 0x4cc   : > { %v5160_v26 = vpop.eup %5159 }
 0x4cd   : > { %v5162_v27 = vpop.eup %5161 }
 0x4ce   : > { %v5164_v32 = vpop.eup %5163 }
 0x4cf   : > { %v5166_v33 = vpop.eup %5165 }
 0x51f   : > { %v789_v28 = vpop.permute.xlu0 %788  ;;  %v787_v29 = vpop.permute.xlu1 %786 }
 0x520   : > { %v798_v30 = vmul.f32 %v5162_v27, %v789_v28  ;;  %v797_v31 = vmul.f32 %v5160_v26, %v787_v29 }
 0x522   : > { %808 = vrot.lane.b32.xlu0 %v798_v30, %s5590_s23  ;;  %806 = vrot.lane.b32.xlu1 %v797_v31, %s5590_s23  ;;  %v913_v30 = vld [vmem:[%s5721_s5 + $0x12] sm:$0x1] }
 0x523   : > { %v791_v34 = vpop.permute.xlu0 %790  ;;  %v785_v35 = vpop.permute.xlu1 %784 }
 0x524   : > { %v799_v23 = vmul.f32 %v5166_v33, %v791_v34  ;;  %v796_v36 = vmul.f32 %v5164_v32, %v785_v35  ;;  %v912_v34 = vld [vmem:[%s5721_s5 + $0x2] sm:$0x1] }
 0x526   : > { %810 = vrot.lane.b32.xlu0 %v799_v23, %s5590_s23  ;;  %804 = vrot.lane.b32.xlu1 %v796_v36, %s5590_s23  ;;  %v915_v36 = vld [vmem:[%s5721_s5 + $0x32] sm:$0x1] }
 0x594   : > { %v809_v37 = vpop.permute.xlu0 %808  ;;  %v807_v38 = vpop.permute.xlu1 %806 }
 0x595   : > { %v818_v39 = vadd.f32 %v809_v37, %v657_v63  ;;  %v817_v40 = vadd.f32 %v807_v38, %v656_v61 }
 0x597   : > { %5167 = vtanh.f32 %v818_v39 }
 0x598   : > { %5169 = vtanh.f32 %v817_v40  ;;  %v811_v43 = vpop.permute.xlu0 %810  ;;  %v805_v44 = vpop.permute.xlu1 %804 }
 0x599   : > { %v819_v45 = vadd.f32 %v811_v43, %v658_v4  ;;  %v816_v48 = vadd.f32 %v805_v44, %v655_v1 }
 0x59b   : > { %5171 = vtanh.f32 %v819_v45 }
 0x59c   : > { %5173 = vtanh.f32 %v816_v48 }
 0x5a4   : > { %v5168_v49 = vpop.eup %5167 }
 0x5a5   : > { %v5170_v50 = vpop.eup %5169  ;;  %v826_v51 = vsub.f32 %v5818_v42, %v5168_v49 }
 0x5a6   : > { %v825_v52 = vsub.f32 %v5816_v41, %v5170_v50 }
 0x5a7   : > { %836 = vrot.lane.b32.xlu0 %v826_v51, %s5592_s12 }
 0x5a8   : > { %v5172_v53 = vpop.eup %5171  ;;  %834 = vrot.lane.b32.xlu1 %v825_v52, %s5592_s12 }
 0x5a9   : > { %v5174_v54 = vpop.eup %5173  ;;  %v827_v55 = vsub.f32 %v5821_v46, %v5172_v53 }
 0x5aa   : > { %v824_v56 = vsub.f32 %v5823_v47, %v5174_v54 }
 0x5ab   : > { %838 = vrot.lane.b32.xlu0 %v827_v55, %s5592_s12 }
 0x5ac   : > { %832 = vrot.lane.b32.xlu1 %v824_v56, %s5592_s12 }
 0x619   : > { %v837_v57 = vpop.permute.xlu0 %836 }
 0x61a   : > { %v846_v58 = vmul.f32 %v5162_v27, %v837_v57  ;;  %v835_v59 = vpop.permute.xlu1 %834 }
 0x61b   : > { %v845_v60 = vmul.f32 %v5160_v26, %v835_v59 }
 0x61c   : > { %856 = vrot.lane.b32.xlu0 %v846_v58, %s5591_s11 }
 0x61d   : > { %854 = vrot.lane.b32.xlu1 %v845_v60, %s5591_s11  ;;  %v839_v61 = vpop.permute.xlu0 %838 }
 0x61e   : > { %v847_v62 = vmul.f32 %v5166_v33, %v839_v61  ;;  %v833_v63 = vpop.permute.xlu1 %832 }
 0x61f   : > { %v844_v0 = vmul.f32 %v5164_v32, %v833_v63  ;;  %v914_v32 = vld [vmem:[%s5721_s5 + $0x22] sm:$0x1] }
 0x620   : > { %858 = vrot.lane.b32.xlu0 %v847_v62, %s5591_s11 }
 0x621   : > { %852 = vrot.lane.b32.xlu1 %v844_v0, %s5591_s11 }
 0x68e   : > { %v857_v1 = vpop.permute.xlu0 %856 }
 0x68f   : > { %v855_v2 = vpop.permute.xlu1 %854  ;;  %v5870_v4 = vadd.f32 %v5168_v49, %v857_v1 }
 0x690   : > { %v5868_v3 = vadd.f32 %v5170_v50, %v855_v2 }
 0x691   : > { %v922_v10 = vrot.slane %v5870_v4, 6 }
 0x692   : > { %v859_v5 = vpop.permute.xlu0 %858  ;;  %v920_v8 = vrot.slane %v5868_v3, 7 }
 0x693   : > { %v5872_v6 = vadd.f32 %v5172_v53, %v859_v5  ;;  %v853_v7 = vpop.permute.xlu1 %852 }
 0x694   : > { %v5875_v9 = vadd.f32 %v5174_v54, %v853_v7 }
 0x695   : > { %v924_v11 = vrot.slane %v5872_v6, 5 }
 0x696   : > { %v921_v12 = vsel %vm558_vm3, %v920_v8, %v5875_v9 }
 0x697   : > { %v923_v13 = vsel %vm561_vm4, %v922_v10, %v921_v12 }
 0x698   : > { %v925_v14 = vsel %vm564_vm5, %v924_v11, %v923_v13 }
 0x699   : > { %926 = vrot.lane.b32.xlu1 %v925_v14, %s5590_s23 }
 0x70b   : > { %v927_v15 = vpop.permute.xlu1 %926 }
 0x70c   : > { %4892 = vmatmul.mubr.msk.f32.vlgmr.msra.gmra.mxu0 %vm390_vm2, %v927_v15 }
 0x70d   : > { %4906 = vmatpush3.msra.mxu0 %v5731_v17  ;;  %4913 = vmatprep.mubr.msk.f32.mxu0 %vm5589_vm1, %v7145_v18 }
 0x70e   : > { %4907 = vmatprep.subr.mxu0 %v7145_v18 }
 0x70f   : > { %4908 = vmatpush3.msra.mxu0 %v5737_v19 }
 0x710   : > { %4909 = vmatprep.subr.mxu0 %v7145_v18 }
 0x711   : > { %4910 = vmatpush3.msra.mxu0 %v5750_v21 }
 0x712   : > { %4911 = vmatprep.subr.mxu0 %v7145_v18 }
 0x713   : > { %4912 = vmatpush3.msra.mxu0 %v5759_v22 }
 0x714   : > { %4927 = vmatprep.subr.mxu0 %v7145_v18 }
 0x7cc   : > { %v996_v16 = vpop.f32.mrf.mxu0 }
 0x7cd   : > { %v1036_v20 = vadd.f32 %v996_v16, %v5788_v24  ;;  %v1001_v29 = vrot.slane %v996_v16, 1  ;;  %v1002_v31 = vrot.slane %v996_v16, 2  ;;  %v1003_v35 = vrot.slane %v996_v16, 3 }
 0x7ce   : > { %v4893_v25 = vpop.f32.mrf.mxu0  ;;  %v1008_v37 = vadd.f32 %v996_v16, %v912_v34 }
 0x7cf   : > { %v1039_v26 = vrot.slane %v1036_v20, 2  ;;  %v1038_v27 = vrot.slane %v1036_v20, 1  ;;  %v1040_v28 = vrot.slane %v1036_v20, 3  ;;  %v1009_v33 = vadd.f32 %v1001_v29, %v913_v30 }
 0x7d0   : > { %v1010_v23 = vadd.f32 %v1002_v31, %v914_v32  ;;  %v1011_v39 = vadd.f32 %v1003_v35, %v915_v36  ;;  %v4702_v43 = vmul.f32 -1.442695, %v1008_v37 }
 0x7d1   : > { %1045 = vrot.lane.b32.xlu1 %v1039_v26, %s5590_s23  ;;  %1043 = vrot.lane.b32.xlu0 %v1038_v27, %s5590_s23  ;;  %v4703_v38 = vmul.f32 -1.442695, %v1009_v33 }
 0x7d2   : > { %v4704_v40 = vmul.f32 -1.442695, %v1010_v23  ;;  %v4705_v44 = vmul.f32 -1.442695, %v1011_v39 }
 0x7d3   : > { %5175 = vpow2.f32 %v4703_v38 }
 0x7d4   : > { %5177 = vpow2.f32 %v4704_v40 }
 0x7d5   : > { %1047 = vrot.lane.b32.xlu1 %v1040_v28, %s5590_s23  ;;  %1041 = vrot.lane.b32.xlu0 %v1036_v20, %s5590_s23  ;;  %5179 = vpow2.f32 %v4702_v43 }
 0x7d6   : > { %5181 = vpow2.f32 %v4705_v44 }
 0x7e0   : > { %v5176_v45 = vpop.eup %5175 }
 0x7e1   : > { %v5178_v48 = vpop.eup %5177  ;;  %v1025_v49 = vadd.f32 1.0, %v5176_v45 }
 0x7e2   : > { %v5180_v50 = vpop.eup %5179  ;;  %v1026_v51 = vadd.f32 1.0, %v5178_v48 }
 0x7e3   : > { %v5182_v52 = vpop.eup %5181  ;;  %v1024_v53 = vadd.f32 1.0, %v5180_v50  ;;  %5183 = vrcp.f32 %v1025_v49 }
 0x7e4   : > { %v1027_v54 = vadd.f32 1.0, %v5182_v52  ;;  %5185 = vrcp.f32 %v1026_v51 }
 0x7e5   : > { %5187 = vrcp.f32 %v1024_v53 }
 0x7e6   : > { %5189 = vrcp.f32 %v1027_v54 }
 0x7f0   : > { %v5184_v55 = vpop.eup %5183 }
 0x7f1   : > { %v5186_v56 = vpop.eup %5185 }
 0x7f2   : > { %v5188_v61 = vpop.eup %5187 }
 0x7f3   : > { %v5190_v62 = vpop.eup %5189 }
 0x843   : > { %v1046_v57 = vpop.permute.xlu1 %1045  ;;  %v1044_v58 = vpop.permute.xlu0 %1043 }
 0x844   : > { %v1055_v59 = vmul.f32 %v5186_v56, %v1046_v57  ;;  %v1054_v60 = vmul.f32 %v5184_v55, %v1044_v58 }
 0x846   : > { %1065 = vrot.lane.b32.xlu1 %v1055_v59, %s5590_s23  ;;  %1063 = vrot.lane.b32.xlu0 %v1054_v60, %s5590_s23  ;;  %v1170_v59 = vld [vmem:[%s5721_s5 + $0x13] sm:$0x1] }
 0x847   : > { %v1048_v63 = vpop.permute.xlu1 %1047  ;;  %v1042_v0 = vpop.permute.xlu0 %1041 }
 0x848   : > { %v1056_v1 = vmul.f32 %v5190_v62, %v1048_v63  ;;  %v1053_v2 = vmul.f32 %v5188_v61, %v1042_v0  ;;  %v1169_v63 = vld [vmem:[%s5721_s5 + $0x3] sm:$0x1] }
 0x84a   : > { %1067 = vrot.lane.b32.xlu1 %v1056_v1, %s5590_s23  ;;  %1061 = vrot.lane.b32.xlu0 %v1053_v2, %s5590_s23  ;;  %v1172_v2 = vld [vmem:[%s5721_s5 + $0x33] sm:$0x1] }
 0x8b8   : > { %v1066_v5 = vpop.permute.xlu1 %1065  ;;  %v1064_v7 = vpop.permute.xlu0 %1063 }
 0x8b9   : > { %v1075_v8 = vadd.f32 %v1066_v5, %v914_v32  ;;  %v1074_v10 = vadd.f32 %v1064_v7, %v913_v30 }
 0x8bb   : > { %5191 = vtanh.f32 %v1075_v8 }
 0x8bc   : > { %5193 = vtanh.f32 %v1074_v10  ;;  %v1068_v11 = vpop.permute.xlu1 %1067  ;;  %v1062_v12 = vpop.permute.xlu0 %1061 }
 0x8bd   : > { %v1076_v13 = vadd.f32 %v1068_v11, %v915_v36  ;;  %v1073_v14 = vadd.f32 %v1062_v12, %v912_v34 }
 0x8bf   : > { %5195 = vtanh.f32 %v1076_v13 }
 0x8c0   : > { %5197 = vtanh.f32 %v1073_v14 }
 0x8c8   : > { %v5192_v15 = vpop.eup %5191 }
 0x8c9   : > { %v5194_v16 = vpop.eup %5193  ;;  %v1083_v20 = vsub.f32 %v5870_v4, %v5192_v15 }
 0x8ca   : > { %v1082_v25 = vsub.f32 %v5868_v3, %v5194_v16 }
 0x8cb   : > { %1093 = vrot.lane.b32.xlu1 %v1083_v20, %s5592_s12 }
 0x8cc   : > { %v5196_v26 = vpop.eup %5195  ;;  %1091 = vrot.lane.b32.xlu0 %v1082_v25, %s5592_s12 }
 0x8cd   : > { %v5198_v27 = vpop.eup %5197  ;;  %v1084_v28 = vsub.f32 %v5872_v6, %v5196_v26 }
 0x8ce   : > { %v1081_v29 = vsub.f32 %v5875_v9, %v5198_v27 }
 0x8cf   : > { %1095 = vrot.lane.b32.xlu1 %v1084_v28, %s5592_s12 }
 0x8d0   : > { %1089 = vrot.lane.b32.xlu0 %v1081_v29, %s5592_s12 }
 0x93d   : > { %v1094_v30 = vpop.permute.xlu1 %1093 }
 0x93e   : > { %v1103_v31 = vmul.f32 %v5186_v56, %v1094_v30  ;;  %v1092_v32 = vpop.permute.xlu0 %1091 }
 0x93f   : > { %v1102_v33 = vmul.f32 %v5184_v55, %v1092_v32 }
 0x940   : > { %1113 = vrot.lane.b32.xlu1 %v1103_v31, %s5591_s11 }
 0x941   : > { %1111 = vrot.lane.b32.xlu0 %v1102_v33, %s5591_s11  ;;  %v1096_v34 = vpop.permute.xlu1 %1095 }
 0x942   : > { %v1104_v35 = vmul.f32 %v5190_v62, %v1096_v34  ;;  %v1090_v23 = vpop.permute.xlu0 %1089 }
 0x943   : > { %v1101_v36 = vmul.f32 %v5188_v61, %v1090_v23  ;;  %v1171_v61 = vld [vmem:[%s5721_s5 + $0x23] sm:$0x1] }
 0x944   : > { %1115 = vrot.lane.b32.xlu1 %v1104_v35, %s5591_s11 }
 0x945   : > { %1109 = vrot.lane.b32.xlu0 %v1101_v36, %s5591_s11 }
 0x9b2   : > { %v1114_v37 = vpop.permute.xlu1 %1113 }
 0x9b3   : > { %v1112_v38 = vpop.permute.xlu0 %1111  ;;  %v5922_v40 = vadd.f32 %v5192_v15, %v1114_v37 }
 0x9b4   : > { %v5920_v39 = vadd.f32 %v5194_v16, %v1112_v38 }
 0x9b5   : > { %v1179_v50 = vrot.slane %v5922_v40, 6 }
 0x9b6   : > { %v1116_v43 = vpop.permute.xlu1 %1115  ;;  %v1177_v48 = vrot.slane %v5920_v39, 7 }
 0x9b7   : > { %v5924_v44 = vadd.f32 %v5196_v26, %v1116_v43  ;;  %v1110_v45 = vpop.permute.xlu0 %1109 }
 0x9b8   : > { %v5927_v49 = vadd.f32 %v5198_v27, %v1110_v45 }
 0x9b9   : > { %v1181_v51 = vrot.slane %v5924_v44, 5 }
 0x9ba   : > { %v1178_v52 = vsel %vm558_vm3, %v1177_v48, %v5927_v49 }
 0x9bb   : > { %v1180_v53 = vsel %vm561_vm4, %v1179_v50, %v1178_v52 }
 0x9bc   : > { %v1182_v54 = vsel %vm564_vm5, %v1181_v51, %v1180_v53 }
 0x9bd   : > { %1183 = vrot.lane.b32.xlu0 %v1182_v54, %s5590_s23 }
 0xa2f   : > { %v1184_v55 = vpop.permute.xlu0 %1183 }
 0xa30   : > { %4903 = vmatmul.mubr.msk.f32.vlgmr.msra.gmra.mxu1 %vm390_vm2, %v1184_v55 }
 0xa31   : > { %4917 = vmatpush3.msra.mxu1 %v5731_v17  ;;  %4924 = vmatprep.mubr.msk.f32.mxu1 %vm5589_vm1, %v7145_v18 }
 0xa32   : > { %4918 = vmatprep.subr.mxu1 %v7145_v18 }
 0xa33   : > { %4919 = vmatpush3.msra.mxu1 %v5737_v19 }
 0xa34   : > { %4920 = vmatprep.subr.mxu1 %v7145_v18 }
 0xa35   : > { %4921 = vmatpush3.msra.mxu1 %v5750_v21 }
 0xa36   : > { %4922 = vmatprep.subr.mxu1 %v7145_v18 }
 0xa37   : > { %4923 = vmatpush3.msra.mxu1 %v5759_v22 }
 0xa38   : > { %4938 = vmatprep.subr.mxu1 %v7145_v18 }
 0xaf0   : > { %v1253_v17 = vpop.f32.mrf.mxu1 }
 0xaf1   : > { %v1293_v56 = vadd.f32 %v1253_v17, %v5788_v24  ;;  %v1258_v22 = vrot.slane %v1253_v17, 1  ;;  %v1259_v60 = vrot.slane %v1253_v17, 2  ;;  %v1260_v0 = vrot.slane %v1253_v17, 3 }
 0xaf2   : > { %v4904_v57 = vpop.f32.mrf.mxu1  ;;  %v1265_v5 = vadd.f32 %v1253_v17, %v1169_v63 }
 0xaf3   : > { %v1296_v58 = vrot.slane %v1293_v56, 2  ;;  %v1295_v19 = vrot.slane %v1293_v56, 1  ;;  %v1297_v21 = vrot.slane %v1293_v56, 3  ;;  %v1266_v62 = vadd.f32 %v1258_v22, %v1170_v59 }
 0xaf4   : > { %v1267_v1 = vadd.f32 %v1259_v60, %v1171_v61  ;;  %v1268_v8 = vadd.f32 %v1260_v0, %v1172_v2  ;;  %v4707_v11 = vmul.f32 -1.442695, %v1265_v5 }
 0xaf5   : > { %1302 = vrot.lane.b32.xlu0 %v1296_v58, %s5590_s23  ;;  %1300 = vrot.lane.b32.xlu1 %v1295_v19, %s5590_s23  ;;  %v4708_v7 = vmul.f32 -1.442695, %v1266_v62 }
 0xaf6   : > { %v4709_v10 = vmul.f32 -1.442695, %v1267_v1  ;;  %v4710_v12 = vmul.f32 -1.442695, %v1268_v8 }
 0xaf7   : > { %5199 = vpow2.f32 %v4708_v7 }
 0xaf8   : > { %5201 = vpow2.f32 %v4709_v10 }
 0xaf9   : > { %1304 = vrot.lane.b32.xlu0 %v1297_v21, %s5590_s23  ;;  %1298 = vrot.lane.b32.xlu1 %v1293_v56, %s5590_s23  ;;  %5203 = vpow2.f32 %v4707_v11 }
 0xafa   : > { %5205 = vpow2.f32 %v4710_v12 }
 0xb04   : > { %v5200_v13 = vpop.eup %5199 }
 0xb05   : > { %v5202_v14 = vpop.eup %5201  ;;  %v1282_v15 = vadd.f32 1.0, %v5200_v13 }
 0xb06   : > { %v5204_v16 = vpop.eup %5203  ;;  %v1283_v20 = vadd.f32 1.0, %v5202_v14 }
 0xb07   : > { %v5206_v25 = vpop.eup %5205  ;;  %v1281_v26 = vadd.f32 1.0, %v5204_v16  ;;  %5207 = vrcp.f32 %v1282_v15 }
 0xb08   : > { %v1284_v27 = vadd.f32 1.0, %v5206_v25  ;;  %5209 = vrcp.f32 %v1283_v20 }
 0xb09   : > { %5211 = vrcp.f32 %v1281_v26 }
 0xb0a   : > { %5213 = vrcp.f32 %v1284_v27 }
 0xb14   : > { %v5208_v28 = vpop.eup %5207 }
 0xb15   : > { %v5210_v29 = vpop.eup %5209 }
 0xb16   : > { %v5212_v34 = vpop.eup %5211 }
 0xb17   : > { %v5214_v35 = vpop.eup %5213 }
 0xb67   : > { %v1303_v30 = vpop.permute.xlu0 %1302  ;;  %v1301_v31 = vpop.permute.xlu1 %1300 }
 0xb68   : > { %v1312_v32 = vmul.f32 %v5210_v29, %v1303_v30  ;;  %v1311_v33 = vmul.f32 %v5208_v28, %v1301_v31  ;;  %v6001_v30 = vld [vmem:[%s7143_s3 + $0x10] sm:$0xff]  ;;  %v6008_v31 = vld [vmem:[%s7143_s3 + $0x8] sm:$0xff] }
 0xb6a   : > { %1322 = vrot.lane.b32.xlu0 %v1312_v32, %s5590_s23  ;;  %1320 = vrot.lane.b32.xlu1 %v1311_v33, %s5590_s23  ;;  %v6015_v32 = vld [vmem:[%s7143_s3] sm:$0xff] }
 0xb6b   : > { %v1305_v23 = vpop.permute.xlu0 %1304  ;;  %v1299_v36 = vpop.permute.xlu1 %1298 }
 0xb6c   : > { %v1313_v37 = vmul.f32 %v5214_v35, %v1305_v23  ;;  %v1310_v38 = vmul.f32 %v5212_v34, %v1299_v36 }
 0xb6e   : > { %1324 = vrot.lane.b32.xlu0 %v1313_v37, %s5590_s23  ;;  %1318 = vrot.lane.b32.xlu1 %v1310_v38, %s5590_s23 }
 0xbdc   : > { %v1323_v43 = vpop.permute.xlu0 %1322  ;;  %v1321_v45 = vpop.permute.xlu1 %1320 }
 0xbdd   : > { %v1332_v48 = vadd.f32 %v1323_v43, %v1171_v61  ;;  %v1331_v50 = vadd.f32 %v1321_v45, %v1170_v59  ;;  %v1427_v43 = vld [vmem:[%s5721_s5 + $0x14] sm:$0x1] }
 0xbdf   : > { %5215 = vtanh.f32 %v1332_v48  ;;  %v1428_v48 = vld [vmem:[%s5721_s5 + $0x24] sm:$0x1] }
 0xbe0   : > { %5217 = vtanh.f32 %v1331_v50  ;;  %v1325_v51 = vpop.permute.xlu0 %1324  ;;  %v1319_v52 = vpop.permute.xlu1 %1318 }
 0xbe1   : > { %v1333_v53 = vadd.f32 %v1325_v51, %v1172_v2  ;;  %v1330_v54 = vadd.f32 %v1319_v52, %v1169_v63  ;;  %v1426_v51 = vld [vmem:[%s5721_s5 + $0x4] sm:$0x1] }
 0xbe3   : > { %5219 = vtanh.f32 %v1333_v53 }
 0xbe4   : > { %5221 = vtanh.f32 %v1330_v54  ;;  %v1429_v54 = vld [vmem:[%s5721_s5 + $0x34] sm:$0x1] }
 0xbec   : > { %v5216_v55 = vpop.eup %5215 }
 0xbed   : > { %v5218_v17 = vpop.eup %5217  ;;  %v1340_v56 = vsub.f32 %v5922_v40, %v5216_v55 }
 0xbee   : > { %v1339_v57 = vsub.f32 %v5920_v39, %v5218_v17 }
 0xbef   : > { %1350 = vrot.lane.b32.xlu0 %v1340_v56, %s5592_s12 }
 0xbf0   : > { %v5220_v58 = vpop.eup %5219  ;;  %1348 = vrot.lane.b32.xlu1 %v1339_v57, %s5592_s12 }
 0xbf1   : > { %v5222_v19 = vpop.eup %5221  ;;  %v1341_v21 = vsub.f32 %v5924_v44, %v5220_v58 }
 0xbf2   : > { %v1338_v22 = vsub.f32 %v5927_v49, %v5222_v19 }
 0xbf3   : > { %1352 = vrot.lane.b32.xlu0 %v1341_v21, %s5592_s12 }
 0xbf4   : > { %1346 = vrot.lane.b32.xlu1 %v1338_v22, %s5592_s12 }
 0xc61   : > { %v1351_v59 = vpop.permute.xlu0 %1350 }
 0xc62   : > { %v1360_v60 = vmul.f32 %v5210_v29, %v1351_v59  ;;  %v1349_v61 = vpop.permute.xlu1 %1348  ;;  %v5992_v29 = vld [vmem:[%s7143_s3 + $0x18] sm:$0xff] }
 0xc63   : > { %v1359_v62 = vmul.f32 %v5208_v28, %v1349_v61 }
 0xc64   : > { %1370 = vrot.lane.b32.xlu0 %v1360_v60, %s5591_s11 }
 0xc65   : > { %1368 = vrot.lane.b32.xlu1 %v1359_v62, %s5591_s11  ;;  %v1353_v63 = vpop.permute.xlu0 %1352 }
 0xc66   : > { %v1361_v0 = vmul.f32 %v5214_v35, %v1353_v63  ;;  %v1347_v1 = vpop.permute.xlu1 %1346 }
 0xc67   : > { %v1358_v2 = vmul.f32 %v5212_v34, %v1347_v1 }
 0xc68   : > { %1372 = vrot.lane.b32.xlu0 %v1361_v0, %s5591_s11 }
 0xc69   : > { %1366 = vrot.lane.b32.xlu1 %v1358_v2, %s5591_s11 }
 0xcd6   : > { %v1371_v5 = vpop.permute.xlu0 %1370 }
 0xcd7   : > { %v1369_v7 = vpop.permute.xlu1 %1368  ;;  %v5974_v10 = vadd.f32 %v5216_v55, %v1371_v5 }
 0xcd8   : > { %v5972_v8 = vadd.f32 %v5218_v17, %v1369_v7 }
 0xcd9   : > { %v1436_v16 = vrot.slane %v5974_v10, 6 }
 0xcda   : > { %v1373_v11 = vpop.permute.xlu0 %1372  ;;  %v1434_v14 = vrot.slane %v5972_v8, 7 }
 0xcdb   : > { %v5976_v12 = vadd.f32 %v5220_v58, %v1373_v11  ;;  %v1367_v13 = vpop.permute.xlu1 %1366 }
 0xcdc   : > { %v5979_v15 = vadd.f32 %v5222_v19, %v1367_v13 }
 0xcdd   : > { %v1438_v20 = vrot.slane %v5976_v12, 5 }
 0xcde   : > { %v1435_v25 = vsel %vm558_vm3, %v1434_v14, %v5979_v15 }
 0xcdf   : > { %v1437_v26 = vsel %vm561_vm4, %v1436_v16, %v1435_v25 }
 0xce0   : > { %v1439_v27 = vsel %vm564_vm5, %v1438_v20, %v1437_v26 }
 0xce1   : > { %1440 = vrot.lane.b32.xlu1 %v1439_v27, %s5590_s23 }
 0xd53   : > { %v1441_v28 = vpop.permute.xlu1 %1440 }
 0xd54   : > { %4914 = vmatmul.mubr.msk.f32.vlgmr.msra.gmra.mxu0 %vm390_vm2, %v1441_v28 }
 0xd55   : > { %4928 = vmatpush3.msra.mxu0 %v5992_v29  ;;  %4935 = vmatprep.mubr.msk.f32.mxu0 %vm5589_vm1, %v7145_v18 }
 0xd56   : > { %4929 = vmatprep.subr.mxu0 %v7145_v18 }
 0xd57   : > { %4930 = vmatpush3.msra.mxu0 %v6001_v30 }
 0xd58   : > { %4931 = vmatprep.subr.mxu0 %v7145_v18 }
 0xd59   : > { %4932 = vmatpush3.msra.mxu0 %v6008_v31 }
 0xd5a   : > { %4933 = vmatprep.subr.mxu0 %v7145_v18 }
 0xd5b   : > { %4934 = vmatpush3.msra.mxu0 %v6015_v32 }
 0xd5c   : > { %4949 = vmatprep.subr.mxu0 %v7145_v18 }
 0xe14   : > { %v1510_v33 = vpop.f32.mrf.mxu0 }
 0xe15   : > { %v1550_v34 = vadd.f32 %v1510_v33, %v5788_v24  ;;  %v1515_v38 = vrot.slane %v1510_v33, 1  ;;  %v1516_v45 = vrot.slane %v1510_v33, 2  ;;  %v1517_v52 = vrot.slane %v1510_v33, 3 }
 0xe16   : > { %v4915_v35 = vpop.f32.mrf.mxu0  ;;  %v1522_v55 = vadd.f32 %v1510_v33, %v1426_v51 }
 0xe17   : > { %v1553_v23 = vrot.slane %v1550_v34, 2  ;;  %v1552_v36 = vrot.slane %v1550_v34, 1  ;;  %v1554_v37 = vrot.slane %v1550_v34, 3  ;;  %v1523_v50 = vadd.f32 %v1515_v38, %v1427_v43 }
 0xe18   : > { %v1524_v53 = vadd.f32 %v1516_v45, %v1428_v48  ;;  %v1525_v56 = vadd.f32 %v1517_v52, %v1429_v54  ;;  %v4712_v58 = vmul.f32 -1.442695, %v1522_v55 }
 0xe19   : > { %1559 = vrot.lane.b32.xlu1 %v1553_v23, %s5590_s23  ;;  %1557 = vrot.lane.b32.xlu0 %v1552_v36, %s5590_s23  ;;  %v4713_v17 = vmul.f32 -1.442695, %v1523_v50 }
 0xe1a   : > { %v4714_v57 = vmul.f32 -1.442695, %v1524_v53  ;;  %v4715_v19 = vmul.f32 -1.442695, %v1525_v56 }
 0xe1b   : > { %5223 = vpow2.f32 %v4713_v17 }
 0xe1c   : > { %5225 = vpow2.f32 %v4714_v57 }
 0xe1d   : > { %1561 = vrot.lane.b32.xlu1 %v1554_v37, %s5590_s23  ;;  %1555 = vrot.lane.b32.xlu0 %v1550_v34, %s5590_s23  ;;  %5227 = vpow2.f32 %v4712_v58 }
 0xe1e   : > { %5229 = vpow2.f32 %v4715_v19 }
 0xe28   : > { %v5224_v21 = vpop.eup %5223 }
 0xe29   : > { %v5226_v22 = vpop.eup %5225  ;;  %v1539_v59 = vadd.f32 1.0, %v5224_v21 }
 0xe2a   : > { %v5228_v60 = vpop.eup %5227  ;;  %v1540_v61 = vadd.f32 1.0, %v5226_v22 }
 0xe2b   : > { %v5230_v62 = vpop.eup %5229  ;;  %v1538_v63 = vadd.f32 1.0, %v5228_v60  ;;  %5231 = vrcp.f32 %v1539_v59 }
 0xe2c   : > { %v1541_v0 = vadd.f32 1.0, %v5230_v62  ;;  %5233 = vrcp.f32 %v1540_v61 }
 0xe2d   : > { %5235 = vrcp.f32 %v1538_v63 }
 0xe2e   : > { %5237 = vrcp.f32 %v1541_v0 }
 0xe38   : > { %v5232_v1 = vpop.eup %5231 }
 0xe39   : > { %v5234_v2 = vpop.eup %5233 }
 0xe3a   : > { %v5236_v14 = vpop.eup %5235 }
 0xe3b   : > { %v5238_v16 = vpop.eup %5237 }
 0xe8b   : > { %v1560_v5 = vpop.permute.xlu1 %1559  ;;  %v1558_v7 = vpop.permute.xlu0 %1557 }
 0xe8c   : > { %v1569_v11 = vmul.f32 %v5234_v2, %v1560_v5  ;;  %v1568_v13 = vmul.f32 %v5232_v1, %v1558_v7 }
 0xe8e   : > { %1579 = vrot.lane.b32.xlu1 %v1569_v11, %s5590_s23  ;;  %1577 = vrot.lane.b32.xlu0 %v1568_v13, %s5590_s23 }
 0xe8f   : > { %v1562_v20 = vpop.permute.xlu1 %1561  ;;  %v1556_v25 = vpop.permute.xlu0 %1555 }
 0xe90   : > { %v1570_v26 = vmul.f32 %v5238_v16, %v1562_v20  ;;  %v1567_v27 = vmul.f32 %v5236_v14, %v1556_v25 }
 0xe92   : > { %1581 = vrot.lane.b32.xlu1 %v1570_v26, %s5590_s23  ;;  %1575 = vrot.lane.b32.xlu0 %v1567_v27, %s5590_s23 }
 0xf00   : > { %v1580_v28 = vpop.permute.xlu1 %1579  ;;  %v1578_v33 = vpop.permute.xlu0 %1577 }
 0xf01   : > { %v1589_v34 = vadd.f32 %v1580_v28, %v1428_v48  ;;  %v1588_v35 = vadd.f32 %v1578_v33, %v1427_v43 }
 0xf03   : > { %5239 = vtanh.f32 %v1589_v34 }
 0xf04   : > { %5241 = vtanh.f32 %v1588_v35  ;;  %v1582_v23 = vpop.permute.xlu1 %1581  ;;  %v1576_v36 = vpop.permute.xlu0 %1575 }
 0xf05   : > { %v1590_v37 = vadd.f32 %v1582_v23, %v1429_v54  ;;  %v1587_v38 = vadd.f32 %v1576_v36, %v1426_v51  ;;  %v1684_v23 = vld [vmem:[%s5721_s5 + $0x15] sm:$0x1] }
 0xf07   : > { %5243 = vtanh.f32 %v1590_v37  ;;  %v1685_v37 = vld [vmem:[%s5721_s5 + $0x25] sm:$0x1] }
 0xf08   : > { %5245 = vtanh.f32 %v1587_v38 }
 0xf10   : > { %v5240_v45 = vpop.eup %5239 }
 0xf11   : > { %v5242_v50 = vpop.eup %5241  ;;  %v1597_v52 = vsub.f32 %v5974_v10, %v5240_v45 }
 0xf12   : > { %v1596_v53 = vsub.f32 %v5972_v8, %v5242_v50 }
 0xf13   : > { %1607 = vrot.lane.b32.xlu1 %v1597_v52, %s5592_s12 }
 0xf14   : > { %v5244_v55 = vpop.eup %5243  ;;  %1605 = vrot.lane.b32.xlu0 %v1596_v53, %s5592_s12  ;;  %v1686_v53 = vld [vmem:[%s5721_s5 + $0x35] sm:$0x1] }
 0xf15   : > { %v5246_v43 = vpop.eup %5245  ;;  %v1598_v48 = vsub.f32 %v5976_v12, %v5244_v55 }
 0xf16   : > { %v1595_v17 = vsub.f32 %v5979_v15, %v5246_v43 }
 0xf17   : > { %1609 = vrot.lane.b32.xlu1 %v1598_v48, %s5592_s12 }
 0xf18   : > { %1603 = vrot.lane.b32.xlu0 %v1595_v17, %s5592_s12 }
 0xf85   : > { %v1608_v51 = vpop.permute.xlu1 %1607 }
 0xf86   : > { %v1617_v54 = vmul.f32 %v5234_v2, %v1608_v51  ;;  %v1606_v56 = vpop.permute.xlu0 %1605 }
 0xf87   : > { %v1616_v57 = vmul.f32 %v5232_v1, %v1606_v56 }
 0xf88   : > { %1627 = vrot.lane.b32.xlu1 %v1617_v54, %s5591_s11 }
 0xf89   : > { %1625 = vrot.lane.b32.xlu0 %v1616_v57, %s5591_s11  ;;  %v1610_v58 = vpop.permute.xlu1 %1609 }
 0xf8a   : > { %v1618_v19 = vmul.f32 %v5238_v16, %v1610_v58  ;;  %v1604_v21 = vpop.permute.xlu0 %1603 }
 0xf8b   : > { %v1615_v22 = vmul.f32 %v5236_v14, %v1604_v21 }
 0xf8c   : > { %1629 = vrot.lane.b32.xlu1 %v1618_v19, %s5591_s11 }
 0xf8d   : > { %1623 = vrot.lane.b32.xlu0 %v1615_v22, %s5591_s11 }
 0xffa   : > { %v1628_v59 = vpop.permute.xlu1 %1627 }
 0xffb   : > { %v1626_v60 = vpop.permute.xlu0 %1625  ;;  %v6046_v62 = vadd.f32 %v5240_v45, %v1628_v59  ;;  %v1683_v45 = vld [vmem:[%s5721_s5 + $0x5] sm:$0x1] }
 0xffc   : > { %v6044_v61 = vadd.f32 %v5242_v50, %v1626_v60 }
 0xffd   : > { %v1693_v7 = vrot.slane %v6046_v62, 6 }
 0xffe   : > { %v1630_v63 = vpop.permute.xlu1 %1629  ;;  %v1691_v2 = vrot.slane %v6044_v61, 7 }
 0xfff   : > { %v6048_v0 = vadd.f32 %v5244_v55, %v1630_v63  ;;  %v1624_v1 = vpop.permute.xlu0 %1623 }
0x1000   : > { %v6051_v5 = vadd.f32 %v5246_v43, %v1624_v1 }
0x1001   : > { %v1695_v11 = vrot.slane %v6048_v0, 5 }
0x1002   : > { %v1692_v13 = vsel %vm558_vm3, %v1691_v2, %v6051_v5 }
0x1003   : > { %v1694_v14 = vsel %vm561_vm4, %v1693_v7, %v1692_v13 }
0x1004   : > { %v1696_v16 = vsel %vm564_vm5, %v1695_v11, %v1694_v14 }
0x1005   : > { %1697 = vrot.lane.b32.xlu0 %v1696_v16, %s5590_s23 }
0x1077   : > { %v1698_v20 = vpop.permute.xlu0 %1697 }
0x1078   : > { %4925 = vmatmul.mubr.msk.f32.vlgmr.msra.gmra.mxu1 %vm390_vm2, %v1698_v20 }
0x1079   : > { %4939 = vmatpush3.msra.mxu1 %v5992_v29  ;;  %4946 = vmatprep.mubr.msk.f32.mxu1 %vm5589_vm1, %v7145_v18 }
0x107a   : > { %4940 = vmatprep.subr.mxu1 %v7145_v18 }
0x107b   : > { %4941 = vmatpush3.msra.mxu1 %v6001_v30 }
0x107c   : > { %4942 = vmatprep.subr.mxu1 %v7145_v18 }
0x107d   : > { %4943 = vmatpush3.msra.mxu1 %v6008_v31 }
0x107e   : > { %4944 = vmatprep.subr.mxu1 %v7145_v18 }
0x107f   : > { %4945 = vmatpush3.msra.mxu1 %v6015_v32 }
0x1080   : > { %4960 = vmatprep.subr.mxu1 %v7145_v18 }
0x1138   : > { %v1767_v25 = vpop.f32.mrf.mxu1 }
0x1139   : > { %v1807_v26 = vadd.f32 %v1767_v25, %v5788_v24  ;;  %v1772_v35 = vrot.slane %v1767_v25, 1  ;;  %v1773_v36 = vrot.slane %v1767_v25, 2  ;;  %v1774_v50 = vrot.slane %v1767_v25, 3 }
0x113a   : > { %v4926_v27 = vpop.f32.mrf.mxu1  ;;  %v1779_v55 = vadd.f32 %v1767_v25, %v1683_v45 }
0x113b   : > { %v1810_v28 = vrot.slane %v1807_v26, 2  ;;  %v1809_v33 = vrot.slane %v1807_v26, 1  ;;  %v1811_v34 = vrot.slane %v1807_v26, 3  ;;  %v1780_v38 = vadd.f32 %v1772_v35, %v1684_v23 }
0x113c   : > { %v1781_v52 = vadd.f32 %v1773_v36, %v1685_v37  ;;  %v1782_v48 = vadd.f32 %v1774_v50, %v1686_v53  ;;  %v4717_v51 = vmul.f32 -1.442695, %v1779_v55 }
0x113d   : > { %1816 = vrot.lane.b32.xlu0 %v1810_v28, %s5590_s23  ;;  %1814 = vrot.lane.b32.xlu1 %v1809_v33, %s5590_s23  ;;  %v4718_v43 = vmul.f32 -1.442695, %v1780_v38 }
0x113e   : > { %v4719_v17 = vmul.f32 -1.442695, %v1781_v52  ;;  %v4720_v54 = vmul.f32 -1.442695, %v1782_v48 }
0x113f   : > { %5247 = vpow2.f32 %v4718_v43 }
0x1140   : > { %5249 = vpow2.f32 %v4719_v17 }
0x1141   : > { %1818 = vrot.lane.b32.xlu0 %v1811_v34, %s5590_s23  ;;  %1812 = vrot.lane.b32.xlu1 %v1807_v26, %s5590_s23  ;;  %5251 = vpow2.f32 %v4717_v51 }
0x1142   : > { %5253 = vpow2.f32 %v4720_v54 }
0x114c   : > { %v5248_v56 = vpop.eup %5247 }
0x114d   : > { %v5250_v57 = vpop.eup %5249  ;;  %v1796_v58 = vadd.f32 1.0, %v5248_v56 }
0x114e   : > { %v5252_v19 = vpop.eup %5251  ;;  %v1797_v21 = vadd.f32 1.0, %v5250_v57 }
0x114f   : > { %v5254_v22 = vpop.eup %5253  ;;  %v1795_v59 = vadd.f32 1.0, %v5252_v19  ;;  %5255 = vrcp.f32 %v1796_v58 }
0x1150   : > { %v1798_v60 = vadd.f32 1.0, %v5254_v22  ;;  %5257 = vrcp.f32 %v1797_v21 }
0x1151   : > { %5259 = vrcp.f32 %v1795_v59 }
0x1152   : > { %5261 = vrcp.f32 %v1798_v60 }
0x115c   : > { %v5256_v63 = vpop.eup %5255 }
0x115d   : > { %v5258_v1 = vpop.eup %5257 }
0x115e   : > { %v5260_v14 = vpop.eup %5259 }
0x115f   : > { %v5262_v16 = vpop.eup %5261 }
0x11af   : > { %v1817_v2 = vpop.permute.xlu0 %1816  ;;  %v1815_v7 = vpop.permute.xlu1 %1814 }
0x11b0   : > { %v1826_v11 = vmul.f32 %v5258_v1, %v1817_v2  ;;  %v1825_v13 = vmul.f32 %v5256_v63, %v1815_v7 }
0x11b2   : > { %1836 = vrot.lane.b32.xlu0 %v1826_v11, %s5590_s23  ;;  %1834 = vrot.lane.b32.xlu1 %v1825_v13, %s5590_s23 }
0x11b3   : > { %v1819_v20 = vpop.permute.xlu0 %1818  ;;  %v1813_v25 = vpop.permute.xlu1 %1812 }
0x11b4   : > { %v1827_v26 = vmul.f32 %v5262_v16, %v1819_v20  ;;  %v1824_v27 = vmul.f32 %v5260_v14, %v1813_v25 }
0x11b6   : > { %1838 = vrot.lane.b32.xlu0 %v1827_v26, %s5590_s23  ;;  %1832 = vrot.lane.b32.xlu1 %v1824_v27, %s5590_s23 }
0x1224   : > { %v1837_v28 = vpop.permute.xlu0 %1836  ;;  %v1835_v33 = vpop.permute.xlu1 %1834 }
0x1225   : > { %v1846_v34 = vadd.f32 %v1837_v28, %v1685_v37  ;;  %v1845_v35 = vadd.f32 %v1835_v33, %v1684_v23 }
0x1227   : > { %5263 = vtanh.f32 %v1846_v34 }
0x1228   : > { %5265 = vtanh.f32 %v1845_v35  ;;  %v1839_v36 = vpop.permute.xlu0 %1838  ;;  %v1833_v38 = vpop.permute.xlu1 %1832 }
0x1229   : > { %v1847_v50 = vadd.f32 %v1839_v36, %v1686_v53  ;;  %v1844_v52 = vadd.f32 %v1833_v38, %v1683_v45 }
0x122b   : > { %5267 = vtanh.f32 %v1847_v50 }
0x122c   : > { %5269 = vtanh.f32 %v1844_v52 }
0x1234   : > { %v5264_v55 = vpop.eup %5263 }
0x1235   : > { %v5266_v43 = vpop.eup %5265  ;;  %v1854_v48 = vsub.f32 %v6046_v62, %v5264_v55 }
0x1236   : > { %v1853_v17 = vsub.f32 %v6044_v61, %v5266_v43 }
0x1237   : > { %1864 = vrot.lane.b32.xlu0 %v1854_v48, %s5592_s12  ;;  %v1942_v48 = vld [vmem:[%s5721_s5 + $0x26] sm:$0x1] }
0x1238   : > { %v5268_v51 = vpop.eup %5267  ;;  %1862 = vrot.lane.b32.xlu1 %v1853_v17, %s5592_s12 }
0x1239   : > { %v5270_v23 = vpop.eup %5269  ;;  %v1855_v37 = vsub.f32 %v6048_v0, %v5268_v51 }
0x123a   : > { %v1852_v54 = vsub.f32 %v6051_v5, %v5270_v23 }
0x123b   : > { %1866 = vrot.lane.b32.xlu0 %v1855_v37, %s5592_s12 }
0x123c   : > { %1860 = vrot.lane.b32.xlu1 %v1852_v54, %s5592_s12  ;;  %v1943_v54 = vld [vmem:[%s5721_s5 + $0x36] sm:$0x1] }
0x12a9   : > { %v1865_v45 = vpop.permute.xlu0 %1864 }
0x12aa   : > { %v1874_v53 = vmul.f32 %v5258_v1, %v1865_v45  ;;  %v1863_v56 = vpop.permute.xlu1 %1862 }
0x12ab   : > { %v1873_v57 = vmul.f32 %v5256_v63, %v1863_v56 }
0x12ac   : > { %1884 = vrot.lane.b32.xlu0 %v1874_v53, %s5591_s11 }
0x12ad   : > { %1882 = vrot.lane.b32.xlu1 %v1873_v57, %s5591_s11  ;;  %v1867_v58 = vpop.permute.xlu0 %1866 }
0x12ae   : > { %v1875_v19 = vmul.f32 %v5262_v16, %v1867_v58  ;;  %v1861_v21 = vpop.permute.xlu1 %1860 }
0x12af   : > { %v1872_v22 = vmul.f32 %v5260_v14, %v1861_v21 }
0x12b0   : > { %1886 = vrot.lane.b32.xlu0 %v1875_v19, %s5591_s11 }
0x12b1   : > { %1880 = vrot.lane.b32.xlu1 %v1872_v22, %s5591_s11 }
0x131e   : > { %v1885_v59 = vpop.permute.xlu0 %1884 }
0x131f   : > { %v1883_v60 = vpop.permute.xlu1 %1882  ;;  %v6098_v7 = vadd.f32 %v5264_v55, %v1885_v59  ;;  %v1941_v55 = vld [vmem:[%s5721_s5 + $0x16] sm:$0x1] }
0x1320   : > { %v6096_v2 = vadd.f32 %v5266_v43, %v1883_v60 }
0x1321   : > { %v1950_v14 = vrot.slane %v6098_v7, 6 }
0x1322   : > { %v1887_v1 = vpop.permute.xlu0 %1886  ;;  %v1948_v13 = vrot.slane %v6096_v2, 7 }
0x1323   : > { %v6100_v63 = vadd.f32 %v5268_v51, %v1887_v1  ;;  %v1881_v11 = vpop.permute.xlu1 %1880  ;;  %v1940_v51 = vld [vmem:[%s5721_s5 + $0x6] sm:$0x1] }
0x1324   : > { %v6103_v20 = vadd.f32 %v5270_v23, %v1881_v11 }
0x1325   : > { %v1952_v16 = vrot.slane %v6100_v63, 5 }
0x1326   : > { %v1949_v25 = vsel %vm558_vm3, %v1948_v13, %v6103_v20 }
0x1327   : > { %v1951_v26 = vsel %vm561_vm4, %v1950_v14, %v1949_v25 }
0x1328   : > { %v1953_v27 = vsel %vm564_vm5, %v1952_v16, %v1951_v26 }
0x1329   : > { %1954 = vrot.lane.b32.xlu1 %v1953_v27, %s5590_s23 }
0x139b   : > { %v1955_v28 = vpop.permute.xlu1 %1954 }
0x139c   : > { %4936 = vmatmul.mubr.msk.f32.vlgmr.msra.gmra.mxu0 %vm390_vm2, %v1955_v28 }
0x139d   : > { %4950 = vmatpush3.msra.mxu0 %v5992_v29  ;;  %4957 = vmatprep.mubr.msk.f32.mxu0 %vm5589_vm1, %v7145_v18 }
0x139e   : > { %4951 = vmatprep.subr.mxu0 %v7145_v18 }
0x139f   : > { %4952 = vmatpush3.msra.mxu0 %v6001_v30 }
0x13a0   : > { %4953 = vmatprep.subr.mxu0 %v7145_v18 }
0x13a1   : > { %4954 = vmatpush3.msra.mxu0 %v6008_v31 }
0x13a2   : > { %4955 = vmatprep.subr.mxu0 %v7145_v18 }
0x13a3   : > { %4956 = vmatpush3.msra.mxu0 %v6015_v32 }
0x13a4   : > { %4971 = vmatprep.subr.mxu0 %v7145_v18 }
0x145c   : > { %v2024_v33 = vpop.f32.mrf.mxu0 }
0x145d   : > { %v2064_v34 = vadd.f32 %v2024_v33, %v5788_v24  ;;  %v2029_v52 = vrot.slane %v2024_v33, 1  ;;  %v2030_v43 = vrot.slane %v2024_v33, 2  ;;  %v2031_v23 = vrot.slane %v2024_v33, 3 }
0x145e   : > { %v4937_v35 = vpop.f32.mrf.mxu0  ;;  %v2036_v45 = vadd.f32 %v2024_v33, %v1940_v51 }
0x145f   : > { %v2067_v36 = vrot.slane %v2064_v34, 2  ;;  %v2066_v38 = vrot.slane %v2064_v34, 1  ;;  %v2068_v50 = vrot.slane %v2064_v34, 3  ;;  %v2037_v17 = vadd.f32 %v2029_v52, %v1941_v55 }
0x1460   : > { %v2038_v37 = vadd.f32 %v2030_v43, %v1942_v48  ;;  %v2039_v56 = vadd.f32 %v2031_v23, %v1943_v54  ;;  %v4722_v58 = vmul.f32 -1.442695, %v2036_v45 }
0x1461   : > { %2073 = vrot.lane.b32.xlu1 %v2067_v36, %s5590_s23  ;;  %2071 = vrot.lane.b32.xlu0 %v2066_v38, %s5590_s23  ;;  %v4723_v53 = vmul.f32 -1.442695, %v2037_v17 }
0x1462   : > { %v4724_v57 = vmul.f32 -1.442695, %v2038_v37  ;;  %v4725_v19 = vmul.f32 -1.442695, %v2039_v56 }
0x1463   : > { %5271 = vpow2.f32 %v4723_v53 }
0x1464   : > { %5273 = vpow2.f32 %v4724_v57 }
0x1465   : > { %2075 = vrot.lane.b32.xlu1 %v2068_v50, %s5590_s23  ;;  %2069 = vrot.lane.b32.xlu0 %v2064_v34, %s5590_s23  ;;  %5275 = vpow2.f32 %v4722_v58 }
0x1466   : > { %5277 = vpow2.f32 %v4725_v19 }
0x1470   : > { %v5272_v21 = vpop.eup %5271 }
0x1471   : > { %v5274_v22 = vpop.eup %5273  ;;  %v2053_v59 = vadd.f32 1.0, %v5272_v21 }
0x1472   : > { %v5276_v60 = vpop.eup %5275  ;;  %v2054_v1 = vadd.f32 1.0, %v5274_v22 }
0x1473   : > { %v5278_v11 = vpop.eup %5277  ;;  %v2052_v13 = vadd.f32 1.0, %v5276_v60  ;;  %5279 = vrcp.f32 %v2053_v59 }
0x1474   : > { %v2055_v14 = vadd.f32 1.0, %v5278_v11  ;;  %5281 = vrcp.f32 %v2054_v1 }
0x1475   : > { %5283 = vrcp.f32 %v2052_v13 }
0x1476   : > { %5285 = vrcp.f32 %v2055_v14 }
0x1480   : > { %v5280_v16 = vpop.eup %5279 }
0x1481   : > { %v5282_v25 = vpop.eup %5281 }
0x1482   : > { %v5284_v34 = vpop.eup %5283 }
0x1483   : > { %v5286_v35 = vpop.eup %5285 }
0x14d3   : > { %v2074_v26 = vpop.permute.xlu1 %2073  ;;  %v2072_v27 = vpop.permute.xlu0 %2071 }
0x14d4   : > { %v2083_v28 = vmul.f32 %v5282_v25, %v2074_v26  ;;  %v2082_v33 = vmul.f32 %v5280_v16, %v2072_v27 }
0x14d6   : > { %2093 = vrot.lane.b32.xlu1 %v2083_v28, %s5590_s23  ;;  %2091 = vrot.lane.b32.xlu0 %v2082_v33, %s5590_s23 }
0x14d7   : > { %v2076_v36 = vpop.permute.xlu1 %2075  ;;  %v2070_v38 = vpop.permute.xlu0 %2069 }
0x14d8   : > { %v2084_v50 = vmul.f32 %v5286_v35, %v2076_v36  ;;  %v2081_v52 = vmul.f32 %v5284_v34, %v2070_v38 }
0x14da   : > { %2095 = vrot.lane.b32.xlu1 %v2084_v50, %s5590_s23  ;;  %2089 = vrot.lane.b32.xlu0 %v2081_v52, %s5590_s23 }
0x1548   : > { %v2094_v43 = vpop.permute.xlu1 %2093  ;;  %v2092_v17 = vpop.permute.xlu0 %2091 }
0x1549   : > { %v2103_v23 = vadd.f32 %v2094_v43, %v1942_v48  ;;  %v2102_v37 = vadd.f32 %v2092_v17, %v1941_v55 }
0x154b   : > { %5287 = vtanh.f32 %v2103_v23 }
0x154c   : > { %5289 = vtanh.f32 %v2102_v37  ;;  %v2096_v45 = vpop.permute.xlu1 %2095  ;;  %v2090_v53 = vpop.permute.xlu0 %2089 }
0x154d   : > { %v2104_v56 = vadd.f32 %v2096_v45, %v1943_v54  ;;  %v2101_v57 = vadd.f32 %v2090_v53, %v1940_v51 }
0x154f   : > { %5291 = vtanh.f32 %v2104_v56 }
0x1550   : > { %5293 = vtanh.f32 %v2101_v57 }
0x1558   : > { %v5288_v58 = vpop.eup %5287 }
0x1559   : > { %v5290_v19 = vpop.eup %5289  ;;  %v2111_v21 = vsub.f32 %v6098_v7, %v5288_v58 }
0x155a   : > { %v2110_v22 = vsub.f32 %v6096_v2, %v5290_v19 }
0x155b   : > { %2121 = vrot.lane.b32.xlu1 %v2111_v21, %s5592_s12 }
0x155c   : > { %v5292_v59 = vpop.eup %5291  ;;  %2119 = vrot.lane.b32.xlu0 %v2110_v22, %s5592_s12 }
0x155d   : > { %v5294_v55 = vpop.eup %5293  ;;  %v2112_v48 = vsub.f32 %v6100_v63, %v5292_v59 }
0x155e   : > { %v2109_v60 = vsub.f32 %v6103_v20, %v5294_v55 }
0x155f   : > { %2123 = vrot.lane.b32.xlu1 %v2112_v48, %s5592_s12  ;;  %v2199_v48 = vld [vmem:[%s5721_s5 + $0x27] sm:$0x1] }
0x1560   : > { %2117 = vrot.lane.b32.xlu0 %v2109_v60, %s5592_s12 }
0x15cd   : > { %v2122_v51 = vpop.permute.xlu1 %2121 }
0x15ce   : > { %v2131_v54 = vmul.f32 %v5282_v25, %v2122_v51  ;;  %v2120_v1 = vpop.permute.xlu0 %2119  ;;  %v2197_v51 = vld [vmem:[%s5721_s5 + $0x7] sm:$0x1] }
0x15cf   : > { %v2130_v11 = vmul.f32 %v5280_v16, %v2120_v1 }
0x15d0   : > { %2141 = vrot.lane.b32.xlu1 %v2131_v54, %s5591_s11 }
0x15d1   : > { %2139 = vrot.lane.b32.xlu0 %v2130_v11, %s5591_s11  ;;  %v2124_v13 = vpop.permute.xlu1 %2123  ;;  %v2200_v11 = vld [vmem:[%s5721_s5 + $0x37] sm:$0x1] }
0x15d2   : > { %v2132_v14 = vmul.f32 %v5286_v35, %v2124_v13  ;;  %v2118_v26 = vpop.permute.xlu0 %2117 }
0x15d3   : > { %v2129_v27 = vmul.f32 %v5284_v34, %v2118_v26 }
0x15d4   : > { %2143 = vrot.lane.b32.xlu1 %v2132_v14, %s5591_s11 }
0x15d5   : > { %2137 = vrot.lane.b32.xlu0 %v2129_v27, %s5591_s11 }
0x1642   : > { %v2142_v28 = vpop.permute.xlu1 %2141 }
0x1643   : > { %v2140_v33 = vpop.permute.xlu0 %2139  ;;  %v6150_v38 = vadd.f32 %v5288_v58, %v2142_v28 }
0x1644   : > { %v6148_v36 = vadd.f32 %v5290_v19, %v2140_v33 }
0x1645   : > { %v2207_v34 = vrot.slane %v6150_v38, 6 }
0x1646   : > { %v2144_v25 = vpop.permute.xlu1 %2143  ;;  %v2205_v52 = vrot.slane %v6148_v36, 7 }
0x1647   : > { %v6152_v16 = vadd.f32 %v5292_v59, %v2144_v25  ;;  %v2138_v50 = vpop.permute.xlu0 %2137  ;;  %v2198_v59 = vld [vmem:[%s5721_s5 + $0x17] sm:$0x1] }
0x1648   : > { %v6155_v43 = vadd.f32 %v5294_v55, %v2138_v50 }
0x1649   : > { %v2209_v35 = vrot.slane %v6152_v16, 5 }
0x164a   : > { %v2206_v17 = vsel %vm558_vm3, %v2205_v52, %v6155_v43 }
0x164b   : > { %v2208_v23 = vsel %vm561_vm4, %v2207_v34, %v2206_v17 }
0x164c   : > { %v2210_v37 = vsel %vm564_vm5, %v2209_v35, %v2208_v23 }
0x164d   : > { %2211 = vrot.lane.b32.xlu0 %v2210_v37, %s5590_s23 }
0x16bf   : > { %v2212_v45 = vpop.permute.xlu0 %2211 }
0x16c0   : > { %4947 = vmatmul.mubr.msk.f32.vlgmr.msra.gmra.mxu1 %vm390_vm2, %v2212_v45 }
0x16c1   : > { %4961 = vmatpush3.msra.mxu1 %v5992_v29  ;;  %4968 = vmatprep.mubr.msk.f32.mxu1 %vm5589_vm1, %v7145_v18 }
0x16c2   : > { %4962 = vmatprep.subr.mxu1 %v7145_v18 }
0x16c3   : > { %4963 = vmatpush3.msra.mxu1 %v6001_v30 }
0x16c4   : > { %4964 = vmatprep.subr.mxu1 %v7145_v18 }
0x16c5   : > { %4965 = vmatpush3.msra.mxu1 %v6008_v31 }
0x16c6   : > { %4966 = vmatprep.subr.mxu1 %v7145_v18 }
0x16c7   : > { %4967 = vmatpush3.msra.mxu1 %v6015_v32 }
0x16c8   : > { %4982 = vmatprep.subr.mxu1 %v7145_v18 }
0x1780   : > { %v2281_v53 = vpop.f32.mrf.mxu1 }
0x1781   : > { %v2321_v56 = vadd.f32 %v2281_v53, %v5788_v24  ;;  %v2286_v22 = vrot.slane %v2281_v53, 1  ;;  %v2287_v55 = vrot.slane %v2281_v53, 2  ;;  %v2288_v54 = vrot.slane %v2281_v53, 3 }
0x1782   : > { %v4948_v57 = vpop.f32.mrf.mxu1  ;;  %v2293_v13 = vadd.f32 %v2281_v53, %v2197_v51 }
0x1783   : > { %v2324_v58 = vrot.slane %v2321_v56, 2  ;;  %v2323_v19 = vrot.slane %v2321_v56, 1  ;;  %v2325_v21 = vrot.slane %v2321_v56, 3  ;;  %v2294_v60 = vadd.f32 %v2286_v22, %v2198_v59 }
0x1784   : > { %v2295_v1 = vadd.f32 %v2287_v55, %v2199_v48  ;;  %v2296_v26 = vadd.f32 %v2288_v54, %v2200_v11  ;;  %v4727_v28 = vmul.f32 -1.442695, %v2293_v13 }
0x1785   : > { %2330 = vrot.lane.b32.xlu0 %v2324_v58, %s5590_s23  ;;  %2328 = vrot.lane.b32.xlu1 %v2323_v19, %s5590_s23  ;;  %v4728_v14 = vmul.f32 -1.442695, %v2294_v60 }
0x1786   : > { %v4729_v27 = vmul.f32 -1.442695, %v2295_v1  ;;  %v4730_v33 = vmul.f32 -1.442695, %v2296_v26 }
0x1787   : > { %5295 = vpow2.f32 %v4728_v14 }
0x1788   : > { %5297 = vpow2.f32 %v4729_v27 }
0x1789   : > { %2332 = vrot.lane.b32.xlu0 %v2325_v21, %s5590_s23  ;;  %2326 = vrot.lane.b32.xlu1 %v2321_v56, %s5590_s23  ;;  %5299 = vpow2.f32 %v4727_v28 }
0x178a   : > { %5301 = vpow2.f32 %v4730_v33 }
0x1794   : > { %v5296_v25 = vpop.eup %5295 }
0x1795   : > { %v5298_v50 = vpop.eup %5297  ;;  %v2310_v52 = vadd.f32 1.0, %v5296_v25 }
0x1796   : > { %v5300_v34 = vpop.eup %5299  ;;  %v2311_v35 = vadd.f32 1.0, %v5298_v50 }
0x1797   : > { %v5302_v17 = vpop.eup %5301  ;;  %v2309_v23 = vadd.f32 1.0, %v5300_v34  ;;  %5303 = vrcp.f32 %v2310_v52 }
0x1798   : > { %v2312_v37 = vadd.f32 1.0, %v5302_v17  ;;  %5305 = vrcp.f32 %v2311_v35 }
0x1799   : > { %5307 = vrcp.f32 %v2309_v23 }
0x179a   : > { %5309 = vrcp.f32 %v2312_v37 }
0x17a4   : > { %v5304_v45 = vpop.eup %5303 }
0x17a5   : > { %v5306_v53 = vpop.eup %5305 }
0x17a6   : > { %v5308_v21 = vpop.eup %5307 }
0x17a7   : > { %v5310_v22 = vpop.eup %5309 }
0x17f7   : > { %v2331_v56 = vpop.permute.xlu0 %2330  ;;  %v2329_v57 = vpop.permute.xlu1 %2328 }
0x17f8   : > { %v2340_v58 = vmul.f32 %v5306_v53, %v2331_v56  ;;  %v2339_v19 = vmul.f32 %v5304_v45, %v2329_v57 }
0x17fa   : > { %2350 = vrot.lane.b32.xlu0 %v2340_v58, %s5590_s23  ;;  %2348 = vrot.lane.b32.xlu1 %v2339_v19, %s5590_s23 }
0x17fb   : > { %v2333_v55 = vpop.permute.xlu0 %2332  ;;  %v2327_v60 = vpop.permute.xlu1 %2326 }
0x17fc   : > { %v2341_v54 = vmul.f32 %v5310_v22, %v2333_v55  ;;  %v2338_v1 = vmul.f32 %v5308_v21, %v2327_v60 }
0x17fe   : > { %2352 = vrot.lane.b32.xlu0 %v2341_v54, %s5590_s23  ;;  %2346 = vrot.lane.b32.xlu1 %v2338_v1, %s5590_s23 }
0x186c   : > { %v2351_v13 = vpop.permute.xlu0 %2350  ;;  %v2349_v14 = vpop.permute.xlu1 %2348 }
0x186d   : > { %v2360_v26 = vadd.f32 %v2351_v13, %v2199_v48  ;;  %v2359_v27 = vadd.f32 %v2349_v14, %v2198_v59 }
0x186f   : > { %5311 = vtanh.f32 %v2360_v26 }
0x1870   : > { %5313 = vtanh.f32 %v2359_v27  ;;  %v2353_v28 = vpop.permute.xlu0 %2352  ;;  %v2347_v33 = vpop.permute.xlu1 %2346 }
0x1871   : > { %v2361_v25 = vadd.f32 %v2353_v28, %v2200_v11  ;;  %v2358_v50 = vadd.f32 %v2347_v33, %v2197_v51 }
0x1873   : > { %5315 = vtanh.f32 %v2361_v25 }
0x1874   : > { %5317 = vtanh.f32 %v2358_v50 }
0x187c   : > { %v5312_v52 = vpop.eup %5311 }
0x187d   : > { %v5314_v34 = vpop.eup %5313  ;;  %v2368_v35 = vsub.f32 %v6150_v38, %v5312_v52 }
0x187e   : > { %v2367_v17 = vsub.f32 %v6148_v36, %v5314_v34 }
0x187f   : > { %2378 = vrot.lane.b32.xlu0 %v2368_v35, %s5592_s12 }
0x1880   : > { %v5316_v23 = vpop.eup %5315  ;;  %2376 = vrot.lane.b32.xlu1 %v2367_v17, %s5592_s12 }
0x1881   : > { %v5318_v59 = vpop.eup %5317  ;;  %v2369_v48 = vsub.f32 %v6152_v16, %v5316_v23 }
0x1882   : > { %v2366_v37 = vsub.f32 %v6155_v43, %v5318_v59 }
0x1883   : > { %2380 = vrot.lane.b32.xlu0 %v2369_v48, %s5592_s12  ;;  %v2456_v48 = vld [vmem:[%s5721_s5 + $0x28] sm:$0x1] }
0x1884   : > { %2374 = vrot.lane.b32.xlu1 %v2366_v37, %s5592_s12 }
0x18f1   : > { %v2379_v51 = vpop.permute.xlu0 %2378 }
0x18f2   : > { %v2388_v11 = vmul.f32 %v5306_v53, %v2379_v51  ;;  %v2377_v56 = vpop.permute.xlu1 %2376  ;;  %v2454_v51 = vld [vmem:[%s5721_s5 + $0x8] sm:$0x1] }
0x18f3   : > { %v2387_v57 = vmul.f32 %v5304_v45, %v2377_v56 }
0x18f4   : > { %2398 = vrot.lane.b32.xlu0 %v2388_v11, %s5591_s11 }
0x18f5   : > { %2396 = vrot.lane.b32.xlu1 %v2387_v57, %s5591_s11  ;;  %v2381_v58 = vpop.permute.xlu0 %2380  ;;  %v2457_v57 = vld [vmem:[%s5721_s5 + $0x38] sm:$0x1] }
0x18f6   : > { %v2389_v19 = vmul.f32 %v5310_v22, %v2381_v58  ;;  %v2375_v55 = vpop.permute.xlu1 %2374 }
0x18f7   : > { %v2386_v60 = vmul.f32 %v5308_v21, %v2375_v55 }
0x18f8   : > { %2400 = vrot.lane.b32.xlu0 %v2389_v19, %s5591_s11 }
0x18f9   : > { %2394 = vrot.lane.b32.xlu1 %v2386_v60, %s5591_s11 }
0x1966   : > { %v2399_v54 = vpop.permute.xlu0 %2398 }
0x1967   : > { %v2397_v1 = vpop.permute.xlu1 %2396  ;;  %v6202_v14 = vadd.f32 %v5312_v52, %v2399_v54 }
0x1968   : > { %v6200_v13 = vadd.f32 %v5314_v34, %v2397_v1 }
0x1969   : > { %v2464_v21 = vrot.slane %v6202_v14, 6 }
0x196a   : > { %v2401_v53 = vpop.permute.xlu0 %2400  ;;  %v2462_v27 = vrot.slane %v6200_v13, 7 }
0x196b   : > { %v6204_v45 = vadd.f32 %v5316_v23, %v2401_v53  ;;  %v2395_v26 = vpop.permute.xlu1 %2394  ;;  %v2455_v23 = vld [vmem:[%s5721_s5 + $0x18] sm:$0x1] }
0x196c   : > { %v6207_v28 = vadd.f32 %v5318_v59, %v2395_v26 }
0x196d   : > { %v2466_v22 = vrot.slane %v6204_v45, 5 }
0x196e   : > { %v2463_v33 = vsel %vm558_vm3, %v2462_v27, %v6207_v28 }
0x196f   : > { %v2465_v25 = vsel %vm561_vm4, %v2464_v21, %v2463_v33 }
0x1970   : > { %v2467_v50 = vsel %vm564_vm5, %v2466_v22, %v2465_v25 }
0x1971   : > { %2468 = vrot.lane.b32.xlu1 %v2467_v50, %s5590_s23 }
0x19e3   : > { %v2469_v52 = vpop.permute.xlu1 %2468 }
0x19e4   : > { %4958 = vmatmul.mubr.msk.f32.vlgmr.msra.gmra.mxu0 %vm390_vm2, %v2469_v52 }
0x19e5   : > { %4972 = vmatpush3.msra.mxu0 %v5992_v29  ;;  %4979 = vmatprep.mubr.msk.f32.mxu0 %vm5589_vm1, %v7145_v18 }
0x19e6   : > { %4973 = vmatprep.subr.mxu0 %v7145_v18 }
0x19e7   : > { %4974 = vmatpush3.msra.mxu0 %v6001_v30 }
0x19e8   : > { %4975 = vmatprep.subr.mxu0 %v7145_v18 }
0x19e9   : > { %4976 = vmatpush3.msra.mxu0 %v6008_v31 }
0x19ea   : > { %4977 = vmatprep.subr.mxu0 %v7145_v18 }
0x19eb   : > { %4978 = vmatpush3.msra.mxu0 %v6015_v32 }
0x19ec   : > { %4993 = vmatprep.subr.mxu0 %v7145_v18 }
0x1aa4   : > { %v2538_v29 = vpop.f32.mrf.mxu0 }
0x1aa5   : > { %v2578_v34 = vadd.f32 %v2538_v29, %v5788_v24  ;;  %v2543_v32 = vrot.slane %v2538_v29, 1  ;;  %v2544_v59 = vrot.slane %v2538_v29, 2  ;;  %v2545_v11 = vrot.slane %v2538_v29, 3 }
0x1aa6   : > { %v4959_v35 = vpop.f32.mrf.mxu0  ;;  %v2550_v58 = vadd.f32 %v2538_v29, %v2454_v51 }
0x1aa7   : > { %v2581_v17 = vrot.slane %v2578_v34, 2  ;;  %v2580_v30 = vrot.slane %v2578_v34, 1  ;;  %v2582_v31 = vrot.slane %v2578_v34, 3  ;;  %v2551_v37 = vadd.f32 %v2543_v32, %v2455_v23 }
0x1aa8   : > { %v2552_v56 = vadd.f32 %v2544_v59, %v2456_v48  ;;  %v2553_v55 = vadd.f32 %v2545_v11, %v2457_v57  ;;  %v4732_v54 = vmul.f32 -1.442695, %v2550_v58 }
0x1aa9   : > { %2587 = vrot.lane.b32.xlu1 %v2581_v17, %s5590_s23  ;;  %2585 = vrot.lane.b32.xlu0 %v2580_v30, %s5590_s23  ;;  %v4733_v19 = vmul.f32 -1.442695, %v2551_v37 }
0x1aaa   : > { %v4734_v60 = vmul.f32 -1.442695, %v2552_v56  ;;  %v4735_v1 = vmul.f32 -1.442695, %v2553_v55 }
0x1aab   : > { %5319 = vpow2.f32 %v4733_v19 }
0x1aac   : > { %5321 = vpow2.f32 %v4734_v60 }
0x1aad   : > { %2589 = vrot.lane.b32.xlu1 %v2582_v31, %s5590_s23  ;;  %2583 = vrot.lane.b32.xlu0 %v2578_v34, %s5590_s23  ;;  %5323 = vpow2.f32 %v4732_v54 }
0x1aae   : > { %5325 = vpow2.f32 %v4735_v1 }
0x1ab8   : > { %v5320_v53 = vpop.eup %5319 }
0x1ab9   : > { %v5322_v26 = vpop.eup %5321  ;;  %v2567_v27 = vadd.f32 1.0, %v5320_v53 }
0x1aba   : > { %v5324_v21 = vpop.eup %5323  ;;  %v2568_v22 = vadd.f32 1.0, %v5322_v26 }
0x1abb   : > { %v5326_v33 = vpop.eup %5325  ;;  %v2566_v25 = vadd.f32 1.0, %v5324_v21  ;;  %5327 = vrcp.f32 %v2567_v27 }
0x1abc   : > { %v2569_v50 = vadd.f32 1.0, %v5326_v33  ;;  %5329 = vrcp.f32 %v2568_v22 }
0x1abd   : > { %5331 = vrcp.f32 %v2566_v25 }
0x1abe   : > { %5333 = vrcp.f32 %v2569_v50 }
0x1ac8   : > { %v5328_v52 = vpop.eup %5327 }
0x1ac9   : > { %v5330_v29 = vpop.eup %5329 }
0x1aca   : > { %v5332_v31 = vpop.eup %5331 }
0x1acb   : > { %v5334_v32 = vpop.eup %5333 }
0x1b1b   : > { %v2588_v34 = vpop.permute.xlu1 %2587  ;;  %v2586_v35 = vpop.permute.xlu0 %2585 }
0x1b1c   : > { %v2597_v17 = vmul.f32 %v5330_v29, %v2588_v34  ;;  %v2596_v30 = vmul.f32 %v5328_v52, %v2586_v35 }
0x1b1e   : > { %2607 = vrot.lane.b32.xlu1 %v2597_v17, %s5590_s23  ;;  %2605 = vrot.lane.b32.xlu0 %v2596_v30, %s5590_s23 }
0x1b1f   : > { %v2590_v59 = vpop.permute.xlu1 %2589  ;;  %v2584_v37 = vpop.permute.xlu0 %2583 }
0x1b20   : > { %v2598_v11 = vmul.f32 %v5334_v32, %v2590_v59  ;;  %v2595_v56 = vmul.f32 %v5332_v31, %v2584_v37 }
0x1b22   : > { %2609 = vrot.lane.b32.xlu1 %v2598_v11, %s5590_s23  ;;  %2603 = vrot.lane.b32.xlu0 %v2595_v56, %s5590_s23 }
0x1b90   : > { %v2608_v58 = vpop.permute.xlu1 %2607  ;;  %v2606_v19 = vpop.permute.xlu0 %2605 }
0x1b91   : > { %v2617_v55 = vadd.f32 %v2608_v58, %v2456_v48  ;;  %v2616_v60 = vadd.f32 %v2606_v19, %v2455_v23 }
0x1b93   : > { %5335 = vtanh.f32 %v2617_v55 }
0x1b94   : > { %5337 = vtanh.f32 %v2616_v60  ;;  %v2610_v54 = vpop.permute.xlu1 %2609  ;;  %v2604_v1 = vpop.permute.xlu0 %2603 }
0x1b95   : > { %v2618_v53 = vadd.f32 %v2610_v54, %v2457_v57  ;;  %v2615_v26 = vadd.f32 %v2604_v1, %v2454_v51 }
0x1b97   : > { %5339 = vtanh.f32 %v2618_v53 }
0x1b98   : > { %5341 = vtanh.f32 %v2615_v26 }
0x1ba0   : > { %v5336_v27 = vpop.eup %5335 }
0x1ba1   : > { %v5338_v21 = vpop.eup %5337  ;;  %v2625_v22 = vsub.f32 %v6202_v14, %v5336_v27 }
0x1ba2   : > { %v2624_v33 = vsub.f32 %v6200_v13, %v5338_v21 }
0x1ba3   : > { %2635 = vrot.lane.b32.xlu1 %v2625_v22, %s5592_s12  ;;  %v6281_v22 = vld [vmem:[%s7143_s3 + $0x10] sm:$0xff] }
0x1ba4   : > { %v5340_v25 = vpop.eup %5339  ;;  %2633 = vrot.lane.b32.xlu0 %v2624_v33, %s5592_s12  ;;  %v6288_v33 = vld [vmem:[%s7143_s3 + $0x8] sm:$0xff] }
0x1ba5   : > { %v5342_v23 = vpop.eup %5341  ;;  %v2626_v48 = vsub.f32 %v6204_v45, %v5340_v25 }
0x1ba6   : > { %v2623_v50 = vsub.f32 %v6207_v28, %v5342_v23 }
0x1ba7   : > { %2637 = vrot.lane.b32.xlu1 %v2626_v48, %s5592_s12 }
0x1ba8   : > { %2631 = vrot.lane.b32.xlu0 %v2623_v50, %s5592_s12 }
0x1c15   : > { %v2636_v51 = vpop.permute.xlu1 %2635 }
0x1c16   : > { %v2645_v57 = vmul.f32 %v5330_v29, %v2636_v51  ;;  %v2634_v34 = vpop.permute.xlu0 %2633 }
0x1c17   : > { %v2644_v35 = vmul.f32 %v5328_v52, %v2634_v34 }
0x1c18   : > { %2655 = vrot.lane.b32.xlu1 %v2645_v57, %s5591_s11 }
0x1c19   : > { %2653 = vrot.lane.b32.xlu0 %v2644_v35, %s5591_s11  ;;  %v2638_v17 = vpop.permute.xlu1 %2637 }
0x1c1a   : > { %v2646_v30 = vmul.f32 %v5334_v32, %v2638_v17  ;;  %v2632_v59 = vpop.permute.xlu0 %2631  ;;  %v2712_v17 = vld [vmem:[%s5721_s5 + $0x19] sm:$0x1] }
0x1c1b   : > { %v2643_v37 = vmul.f32 %v5332_v31, %v2632_v59  ;;  %v2713_v59 = vld [vmem:[%s5721_s5 + $0x29] sm:$0x1] }
0x1c1c   : > { %2657 = vrot.lane.b32.xlu1 %v2646_v30, %s5591_s11 }
0x1c1d   : > { %2651 = vrot.lane.b32.xlu0 %v2643_v37, %s5591_s11 }
0x1c8a   : > { %v2656_v11 = vpop.permute.xlu1 %2655 }
0x1c8b   : > { %v2654_v56 = vpop.permute.xlu0 %2653  ;;  %v6254_v19 = vadd.f32 %v5336_v27, %v2656_v11  ;;  %v2711_v11 = vld [vmem:[%s5721_s5 + $0x9] sm:$0x1] }
0x1c8c   : > { %v6252_v58 = vadd.f32 %v5338_v21, %v2654_v56  ;;  %v6272_v21 = vld [vmem:[%s7143_s3 + $0x18] sm:$0xff] }
0x1c8d   : > { %7166 = vst [vmem:[#allocation11_spill] sm:$0xff] %v6254_v19  ;;  %v2721_v31 = vrot.slane %v6254_v19, 6 }
0x1c8e   : > { %7165 = vst [vmem:[#allocation10_spill] sm:$0xff] %v6252_v58  ;;  %v2658_v29 = vpop.permute.xlu1 %2657  ;;  %v2719_v60 = vrot.slane %v6252_v58, 7 }
0x1c8f   : > { %v6256_v52 = vadd.f32 %v5340_v25, %v2658_v29  ;;  %v2652_v55 = vpop.permute.xlu0 %2651  ;;  %v6295_v25 = vld [vmem:[%s7143_s3] sm:$0xff] }
0x1c90   : > { %v6259_v54 = vadd.f32 %v5342_v23, %v2652_v55  ;;  %v2714_v55 = vld [vmem:[%s5721_s5 + $0x39] sm:$0x1] }
0x1c91   : > { %7167 = vst [vmem:[#allocation12_spill] sm:$0xff] %v6256_v52  ;;  %v2723_v32 = vrot.slane %v6256_v52, 5 }
0x1c92   : > { %7168 = vst [vmem:[#allocation13_spill] sm:$0xff] %v6259_v54  ;;  %v2720_v1 = vsel %vm558_vm3, %v2719_v60, %v6259_v54 }
0x1c93   : > { %v2722_v53 = vsel %vm561_vm4, %v2721_v31, %v2720_v1 }
0x1c94   : > { %v2724_v26 = vsel %vm564_vm5, %v2723_v32, %v2722_v53 }
0x1c95   : > { %2725 = vrot.lane.b32.xlu0 %v2724_v26, %s5590_s23 }
0x1d07   : > { %v2726_v27 = vpop.permute.xlu0 %2725 }
0x1d08   : > { %4969 = vmatmul.mubr.msk.f32.vlgmr.msra.gmra.mxu1 %vm390_vm2, %v2726_v27 }
0x1d09   : > { %4983 = vmatpush3.msra.mxu1 %v6272_v21  ;;  %4990 = vmatprep.mubr.msk.f32.mxu1 %vm5589_vm1, %v7145_v18 }
0x1d0a   : > { %4984 = vmatprep.subr.mxu1 %v7145_v18 }
0x1d0b   : > { %4985 = vmatpush3.msra.mxu1 %v6281_v22 }
0x1d0c   : > { %4986 = vmatprep.subr.mxu1 %v7145_v18 }
0x1d0d   : > { %4987 = vmatpush3.msra.mxu1 %v6288_v33 }
0x1d0e   : > { %4988 = vmatprep.subr.mxu1 %v7145_v18 }
0x1d0f   : > { %4989 = vmatpush3.msra.mxu1 %v6295_v25 }
0x1d10   : > { %5004 = vmatprep.subr.mxu1 %v7145_v18 }
0x1dc8   : > { %v2795_v23 = vpop.f32.mrf.mxu1 }
0x1dc9   : > { %v2835_v48 = vadd.f32 %v2795_v23, %v5788_v24  ;;  %v2800_v35 = vrot.slane %v2795_v23, 1  ;;  %v2801_v30 = vrot.slane %v2795_v23, 2  ;;  %v2802_v56 = vrot.slane %v2795_v23, 3 }
0x1dca   : > { %v4970_v50 = vpop.f32.mrf.mxu1  ;;  %v2807_v60 = vadd.f32 %v2795_v23, %v2711_v11 }
0x1dcb   : > { %v2838_v51 = vrot.slane %v2835_v48, 2  ;;  %v2837_v57 = vrot.slane %v2835_v48, 1  ;;  %v2839_v34 = vrot.slane %v2835_v48, 3  ;;  %v2808_v37 = vadd.f32 %v2800_v35, %v2712_v17 }
0x1dcc   : > { %v2809_v29 = vadd.f32 %v2801_v30, %v2713_v59  ;;  %v2810_v32 = vadd.f32 %v2802_v56, %v2714_v55  ;;  %v4737_v53 = vmul.f32 -1.442695, %v2807_v60 }
0x1dcd   : > { %2844 = vrot.lane.b32.xlu0 %v2838_v51, %s5590_s23  ;;  %2842 = vrot.lane.b32.xlu1 %v2837_v57, %s5590_s23  ;;  %v4738_v31 = vmul.f32 -1.442695, %v2808_v37 }
0x1dce   : > { %v4739_v1 = vmul.f32 -1.442695, %v2809_v29  ;;  %v4740_v26 = vmul.f32 -1.442695, %v2810_v32 }
0x1dcf   : > { %5343 = vpow2.f32 %v4738_v31 }
0x1dd0   : > { %5345 = vpow2.f32 %v4739_v1 }
0x1dd1   : > { %2846 = vrot.lane.b32.xlu0 %v2839_v34, %s5590_s23  ;;  %2840 = vrot.lane.b32.xlu1 %v2835_v48, %s5590_s23  ;;  %5347 = vpow2.f32 %v4737_v53 }
0x1dd2   : > { %5349 = vpow2.f32 %v4740_v26 }
0x1ddc   : > { %v5344_v27 = vpop.eup %5343 }
0x1ddd   : > { %v5346_v48 = vpop.eup %5345  ;;  %v2824_v50 = vadd.f32 1.0, %v5344_v27 }
0x1dde   : > { %v5348_v51 = vpop.eup %5347  ;;  %v2825_v57 = vadd.f32 1.0, %v5346_v48 }
0x1ddf   : > { %v5350_v34 = vpop.eup %5349  ;;  %v2823_v35 = vadd.f32 1.0, %v5348_v51  ;;  %5351 = vrcp.f32 %v2824_v50 }
0x1de0   : > { %v2826_v30 = vadd.f32 1.0, %v5350_v34  ;;  %5353 = vrcp.f32 %v2825_v57 }
0x1de1   : > { %5355 = vrcp.f32 %v2823_v35 }
0x1de2   : > { %5357 = vrcp.f32 %v2826_v30 }
0x1dec   : > { %v5352_v23 = vpop.eup %5351 }
0x1ded   : > { %v5354_v37 = vpop.eup %5353 }
0x1dee   : > { %v5356_v32 = vpop.eup %5355 }
0x1def   : > { %v5358_v1 = vpop.eup %5357 }
0x1e3f   : > { %v2845_v56 = vpop.permute.xlu0 %2844  ;;  %v2843_v29 = vpop.permute.xlu1 %2842 }
0x1e40   : > { %v2854_v60 = vmul.f32 %v5354_v37, %v2845_v56  ;;  %v2853_v31 = vmul.f32 %v5352_v23, %v2843_v29 }
0x1e42   : > { %2864 = vrot.lane.b32.xlu0 %v2854_v60, %s5590_s23  ;;  %2862 = vrot.lane.b32.xlu1 %v2853_v31, %s5590_s23 }
0x1e43   : > { %v2847_v53 = vpop.permute.xlu0 %2846  ;;  %v2841_v26 = vpop.permute.xlu1 %2840 }
0x1e44   : > { %v2855_v27 = vmul.f32 %v5358_v1, %v2847_v53  ;;  %v2852_v48 = vmul.f32 %v5356_v32, %v2841_v26 }
0x1e46   : > { %2866 = vrot.lane.b32.xlu0 %v2855_v27, %s5590_s23  ;;  %2860 = vrot.lane.b32.xlu1 %v2852_v48, %s5590_s23 }
0x1eb4   : > { %v2865_v50 = vpop.permute.xlu0 %2864  ;;  %v2863_v51 = vpop.permute.xlu1 %2862 }
0x1eb5   : > { %v2874_v57 = vadd.f32 %v2865_v50, %v2713_v59  ;;  %v2873_v34 = vadd.f32 %v2863_v51, %v2712_v17 }
0x1eb7   : > { %5359 = vtanh.f32 %v2874_v57 }
0x1eb8   : > { %5361 = vtanh.f32 %v2873_v34  ;;  %v2867_v35 = vpop.permute.xlu0 %2866  ;;  %v2861_v30 = vpop.permute.xlu1 %2860 }
0x1eb9   : > { %v2875_v56 = vadd.f32 %v2867_v35, %v2714_v55  ;;  %v2872_v29 = vadd.f32 %v2861_v30, %v2711_v11 }
0x1ebb   : > { %5363 = vtanh.f32 %v2875_v56 }
0x1ebc   : > { %5365 = vtanh.f32 %v2872_v29 }
0x1ec4   : > { %v5360_v60 = vpop.eup %5359 }
0x1ec5   : > { %v5362_v31 = vpop.eup %5361  ;;  %v2882_v53 = vsub.f32 %v6254_v19, %v5360_v60 }
0x1ec6   : > { %v2881_v26 = vsub.f32 %v6252_v58, %v5362_v31 }
0x1ec7   : > { %2892 = vrot.lane.b32.xlu0 %v2882_v53, %s5592_s12 }
0x1ec8   : > { %v5364_v27 = vpop.eup %5363  ;;  %2890 = vrot.lane.b32.xlu1 %v2881_v26, %s5592_s12 }
0x1ec9   : > { %v5366_v17 = vpop.eup %5365  ;;  %v2883_v59 = vsub.f32 %v6256_v52, %v5364_v27 }
0x1eca   : > { %v2880_v48 = vsub.f32 %v6259_v54, %v5366_v17 }
0x1ecb   : > { %2894 = vrot.lane.b32.xlu0 %v2883_v59, %s5592_s12 }
0x1ecc   : > { %2888 = vrot.lane.b32.xlu1 %v2880_v48, %s5592_s12 }
0x1f39   : > { %v2893_v11 = vpop.permute.xlu0 %2892 }
0x1f3a   : > { %v2902_v55 = vmul.f32 %v5354_v37, %v2893_v11  ;;  %v2891_v50 = vpop.permute.xlu1 %2890 }
0x1f3b   : > { %v2901_v51 = vmul.f32 %v5352_v23, %v2891_v50 }
0x1f3c   : > { %2912 = vrot.lane.b32.xlu0 %v2902_v55, %s5591_s11 }
0x1f3d   : > { %2910 = vrot.lane.b32.xlu1 %v2901_v51, %s5591_s11  ;;  %v2895_v57 = vpop.permute.xlu0 %2894 }
0x1f3e   : > { %v2903_v34 = vmul.f32 %v5358_v1, %v2895_v57  ;;  %v2889_v35 = vpop.permute.xlu1 %2888 }
0x1f3f   : > { %v2900_v30 = vmul.f32 %v5356_v32, %v2889_v35 }
0x1f40   : > { %2914 = vrot.lane.b32.xlu0 %v2903_v34, %s5591_s11 }
0x1f41   : > { %2908 = vrot.lane.b32.xlu1 %v2900_v30, %s5591_s11 }
0x1fae   : > { %v2913_v56 = vpop.permute.xlu0 %2912 }
0x1faf   : > { %v2911_v29 = vpop.permute.xlu1 %2910  ;;  %v6326_v26 = vadd.f32 %v5360_v60, %v2913_v56  ;;  %v2969_v56 = vld [vmem:[%s5721_s5 + $0x1a] sm:$0x1] }
0x1fb0   : > { %v6324_v53 = vadd.f32 %v5362_v31, %v2911_v29 }
0x1fb1   : > { %7170 = vst [vmem:[#allocation15_spill] sm:$0xff] %v6326_v26  ;;  %v2978_v32 = vrot.slane %v6326_v26, 6 }
0x1fb2   : > { %7169 = vst [vmem:[#allocation14_spill] sm:$0xff] %v6324_v53  ;;  %v2915_v37 = vpop.permute.xlu0 %2914  ;;  %v2976_v48 = vrot.slane %v6324_v53, 7 }
0x1fb3   : > { %v6328_v23 = vadd.f32 %v5364_v27, %v2915_v37  ;;  %v2909_v59 = vpop.permute.xlu1 %2908  ;;  %v2970_v37 = vld [vmem:[%s5721_s5 + $0x2a] sm:$0x1] }
0x1fb4   : > { %v6331_v11 = vadd.f32 %v5366_v17, %v2909_v59 }
0x1fb5   : > { %7171 = vst [vmem:[#allocation16_spill] sm:$0xff] %v6328_v23  ;;  %v2980_v1 = vrot.slane %v6328_v23, 5 }
0x1fb6   : > { %7172 = vst [vmem:[#allocation17_spill] sm:$0xff] %v6331_v11  ;;  %v2977_v55 = vsel %vm558_vm3, %v2976_v48, %v6331_v11  ;;  %v2968_v48 = vld [vmem:[%s5721_s5 + $0xa] sm:$0x1] }
0x1fb7   : > { %v2979_v31 = vsel %vm561_vm4, %v2978_v32, %v2977_v55  ;;  %v2971_v55 = vld [vmem:[%s5721_s5 + $0x3a] sm:$0x1] }
0x1fb8   : > { %v2981_v60 = vsel %vm564_vm5, %v2980_v1, %v2979_v31 }
0x1fb9   : > { %2982 = vrot.lane.b32.xlu1 %v2981_v60, %s5590_s23 }
0x202b   : > { %v2983_v27 = vpop.permute.xlu1 %2982 }
0x202c   : > { %4980 = vmatmul.mubr.msk.f32.vlgmr.msra.gmra.mxu0 %vm390_vm2, %v2983_v27 }
0x202d   : > { %4994 = vmatpush3.msra.mxu0 %v6272_v21  ;;  %5001 = vmatprep.mubr.msk.f32.mxu0 %vm5589_vm1, %v7145_v18 }
0x202e   : > { %4995 = vmatprep.subr.mxu0 %v7145_v18 }
0x202f   : > { %4996 = vmatpush3.msra.mxu0 %v6281_v22 }
0x2030   : > { %4997 = vmatprep.subr.mxu0 %v7145_v18 }
0x2031   : > { %4998 = vmatpush3.msra.mxu0 %v6288_v33 }
0x2032   : > { %4999 = vmatprep.subr.mxu0 %v7145_v18 }
0x2033   : > { %5000 = vmatpush3.msra.mxu0 %v6295_v25 }
0x2034   : > { %5015 = vmatprep.subr.mxu0 %v7145_v18 }
0x20ec   : > { %v3052_v17 = vpop.f32.mrf.mxu0 }
0x20ed   : > { %v3092_v50 = vadd.f32 %v3052_v17, %v5788_v24  ;;  %v3057_v30 = vrot.slane %v3052_v17, 1  ;;  %v3058_v29 = vrot.slane %v3052_v17, 2  ;;  %v3059_v32 = vrot.slane %v3052_v17, 3 }
0x20ee   : > { %v4981_v51 = vpop.f32.mrf.mxu0  ;;  %v3064_v31 = vadd.f32 %v3052_v17, %v2968_v48 }
0x20ef   : > { %v3095_v57 = vrot.slane %v3092_v50, 2  ;;  %v3094_v34 = vrot.slane %v3092_v50, 1  ;;  %v3096_v35 = vrot.slane %v3092_v50, 3  ;;  %v3065_v59 = vadd.f32 %v3057_v30, %v2969_v56 }
0x20f0   : > { %v3066_v1 = vadd.f32 %v3058_v29, %v2970_v37  ;;  %v3067_v27 = vadd.f32 %v3059_v32, %v2971_v55 }
0x20f1   : > { %3101 = vrot.lane.b32.xlu1 %v3095_v57, %s5590_s23  ;;  %3099 = vrot.lane.b32.xlu0 %v3094_v34, %s5590_s23  ;;  %v4743_v60 = vmul.f32 -1.442695, %v3065_v59  ;;  %v4742_v57 = vmul.f32 -1.442695, %v3064_v31 }
0x20f2   : > { %v4744_v51 = vmul.f32 -1.442695, %v3066_v1  ;;  %v4745_v34 = vmul.f32 -1.442695, %v3067_v27 }
0x20f3   : > { %5367 = vpow2.f32 %v4743_v60 }
0x20f4   : > { %5369 = vpow2.f32 %v4744_v51 }
0x20f5   : > { %3103 = vrot.lane.b32.xlu1 %v3096_v35, %s5590_s23  ;;  %3097 = vrot.lane.b32.xlu0 %v3092_v50, %s5590_s23  ;;  %5371 = vpow2.f32 %v4742_v57 }
0x20f6   : > { %5373 = vpow2.f32 %v4745_v34 }
0x2100   : > { %v5368_v50 = vpop.eup %5367 }
0x2101   : > { %v5370_v35 = vpop.eup %5369  ;;  %v3081_v18 = vadd.f32 1.0, %v5368_v50 }
0x2102   : > { %v5372_v19 = vpop.eup %5371  ;;  %v3082_v54 = vadd.f32 1.0, %v5370_v35 }
0x2103   : > { %v5374_v30 = vpop.eup %5373  ;;  %v3080_v52 = vadd.f32 1.0, %v5372_v19  ;;  %5375 = vrcp.f32 %v3081_v18 }
0x2104   : > { %v3083_v29 = vadd.f32 1.0, %v5374_v30  ;;  %5377 = vrcp.f32 %v3082_v54 }
0x2105   : > { %5379 = vrcp.f32 %v3080_v52 }
0x2106   : > { %5381 = vrcp.f32 %v3083_v29 }
0x2110   : > { %v5376_v17 = vpop.eup %5375 }
0x2111   : > { %v5378_v59 = vpop.eup %5377 }
0x2112   : > { %v5380_v27 = vpop.eup %5379 }
0x2113   : > { %v5382_v51 = vpop.eup %5381 }
0x2163   : > { %v3102_v32 = vpop.permute.xlu1 %3101  ;;  %v3100_v1 = vpop.permute.xlu0 %3099 }
0x2164   : > { %v3111_v31 = vmul.f32 %v5378_v59, %v3102_v32  ;;  %v3110_v60 = vmul.f32 %v5376_v17, %v3100_v1 }
0x2166   : > { %3121 = vrot.lane.b32.xlu1 %v3111_v31, %s5590_s23  ;;  %3119 = vrot.lane.b32.xlu0 %v3110_v60, %s5590_s23 }
0x2167   : > { %v3104_v57 = vpop.permute.xlu1 %3103  ;;  %v3098_v34 = vpop.permute.xlu0 %3097 }
0x2168   : > { %v3112_v19 = vmul.f32 %v5382_v51, %v3104_v57  ;;  %v3109_v18 = vmul.f32 %v5380_v27, %v3098_v34 }
0x216a   : > { %3123 = vrot.lane.b32.xlu1 %v3112_v19, %s5590_s23  ;;  %3117 = vrot.lane.b32.xlu0 %v3109_v18, %s5590_s23 }
0x21d8   : > { %v3122_v52 = vpop.permute.xlu1 %3121  ;;  %v3120_v54 = vpop.permute.xlu0 %3119 }
0x21d9   : > { %v3131_v50 = vadd.f32 %v3122_v52, %v2970_v37  ;;  %v3130_v35 = vadd.f32 %v3120_v54, %v2969_v56 }
0x21db   : > { %5383 = vtanh.f32 %v3131_v50 }
0x21dc   : > { %5385 = vtanh.f32 %v3130_v35  ;;  %v3124_v30 = vpop.permute.xlu1 %3123  ;;  %v3118_v29 = vpop.permute.xlu0 %3117 }
0x21dd   : > { %v3132_v32 = vadd.f32 %v3124_v30, %v2971_v55  ;;  %v3129_v1 = vadd.f32 %v3118_v29, %v2968_v48 }
0x21df   : > { %5387 = vtanh.f32 %v3132_v32 }
0x21e0   : > { %5389 = vtanh.f32 %v3129_v1 }
0x21e8   : > { %v5384_v31 = vpop.eup %5383 }
0x21e9   : > { %v5386_v60 = vpop.eup %5385  ;;  %v3139_v57 = vsub.f32 %v6326_v26, %v5384_v31 }
0x21ea   : > { %v3138_v34 = vsub.f32 %v6324_v53, %v5386_v60 }
0x21eb   : > { %3149 = vrot.lane.b32.xlu1 %v3139_v57, %s5592_s12 }
0x21ec   : > { %v5388_v19 = vpop.eup %5387  ;;  %3147 = vrot.lane.b32.xlu0 %v3138_v34, %s5592_s12 }
0x21ed   : > { %v5390_v56 = vpop.eup %5389  ;;  %v3140_v37 = vsub.f32 %v6328_v23, %v5388_v19 }
0x21ee   : > { %v3137_v18 = vsub.f32 %v6331_v11, %v5390_v56 }
0x21ef   : > { %3151 = vrot.lane.b32.xlu1 %v3140_v37, %s5592_s12 }
0x21f0   : > { %3145 = vrot.lane.b32.xlu0 %v3137_v18, %s5592_s12 }
0x225d   : > { %v3150_v48 = vpop.permute.xlu1 %3149 }
0x225e   : > { %v3159_v55 = vmul.f32 %v5378_v59, %v3150_v48  ;;  %v3148_v52 = vpop.permute.xlu0 %3147 }
0x225f   : > { %v3158_v54 = vmul.f32 %v5376_v17, %v3148_v52 }
0x2260   : > { %3169 = vrot.lane.b32.xlu1 %v3159_v55, %s5591_s11 }
0x2261   : > { %3167 = vrot.lane.b32.xlu0 %v3158_v54, %s5591_s11  ;;  %v3152_v50 = vpop.permute.xlu1 %3151 }
0x2262   : > { %v3160_v35 = vmul.f32 %v5382_v51, %v3152_v50  ;;  %v3146_v30 = vpop.permute.xlu0 %3145 }
0x2263   : > { %v3157_v29 = vmul.f32 %v5380_v27, %v3146_v30 }
0x2264   : > { %3171 = vrot.lane.b32.xlu1 %v3160_v35, %s5591_s11 }
0x2265   : > { %3165 = vrot.lane.b32.xlu0 %v3157_v29, %s5591_s11 }
0x22d2   : > { %v3170_v32 = vpop.permute.xlu1 %3169 }
0x22d3   : > { %v3168_v1 = vpop.permute.xlu0 %3167  ;;  %v6378_v34 = vadd.f32 %v5384_v31, %v3170_v32 }
0x22d4   : > { %v6376_v57 = vadd.f32 %v5386_v60, %v3168_v1  ;;  %v3226_v1 = vld [vmem:[%s5721_s5 + $0x1b] sm:$0x1] }
0x22d5   : > { %7174 = vst [vmem:[#allocation19_spill] sm:$0xff] %v6378_v34  ;;  %v3235_v27 = vrot.slane %v6378_v34, 6 }
0x22d6   : > { %7173 = vst [vmem:[#allocation18_spill] sm:$0xff] %v6376_v57  ;;  %v3172_v59 = vpop.permute.xlu1 %3171  ;;  %v3233_v18 = vrot.slane %v6376_v57, 7 }
0x22d7   : > { %v6380_v17 = vadd.f32 %v5388_v19, %v3172_v59  ;;  %v3166_v37 = vpop.permute.xlu0 %3165 }
0x22d8   : > { %v6383_v48 = vadd.f32 %v5390_v56, %v3166_v37  ;;  %v7177_v56 = vmov 0.0   ;;  %v3227_v37 = vld [vmem:[%s5721_s5 + $0x2b] sm:$0x1] }
0x22d9   : > { %7175 = vst [vmem:[#allocation20_spill] sm:$0xff] %v6380_v17  ;;  %v3237_v51 = vrot.slane %v6380_v17, 5 }
0x22da   : > { %7176 = vst [vmem:[#allocation21_spill] sm:$0xff] %v6383_v48  ;;  %v3234_v55 = vsel %vm558_vm3, %v3233_v18, %v6383_v48 }
0x22db   : > { %v3236_v60 = vsel %vm561_vm4, %v3235_v27, %v3234_v55  ;;  %v3225_v27 = vld [vmem:[%s5721_s5 + $0xb] sm:$0x1] }
0x22dc   : > { %v3238_v31 = vsel %vm564_vm5, %v3237_v51, %v3236_v60  ;;  %v3228_v60 = vld [vmem:[%s5721_s5 + $0x3b] sm:$0x1] }
0x22dd   : > { %3239 = vrot.lane.b32.xlu0 %v3238_v31, %s5590_s23 }
0x234f   : > { %v3240_v19 = vpop.permute.xlu0 %3239 }
0x2350   : > { %4991 = vmatmul.mubr.msk.f32.vlgmr.msra.gmra.mxu1 %vm390_vm2, %v3240_v19 }
0x2351   : > { %5005 = vmatpush3.msra.mxu1 %v6272_v21  ;;  %5012 = vmatprep.mubr.msk.f32.mxu1 %vm5589_vm1, %v7177_v56 }
0x2352   : > { %5006 = vmatprep.subr.mxu1 %v7177_v56 }
0x2353   : > { %5007 = vmatpush3.msra.mxu1 %v6281_v22 }
0x2354   : > { %5008 = vmatprep.subr.mxu1 %v7177_v56 }
0x2355   : > { %5009 = vmatpush3.msra.mxu1 %v6288_v33 }
0x2356   : > { %5010 = vmatprep.subr.mxu1 %v7177_v56 }
0x2357   : > { %5011 = vmatpush3.msra.mxu1 %v6295_v25 }
0x2358   : > { %5026 = vmatprep.subr.mxu1 %v7177_v56 }
0x2410   : > { %v3309_v52 = vpop.f32.mrf.mxu1 }
0x2411   : > { %v3349_v54 = vadd.f32 %v3309_v52, %v5788_v24  ;;  %v3314_v32 = vrot.slane %v3309_v52, 1  ;;  %v3315_v59 = vrot.slane %v3309_v52, 2  ;;  %v3316_v51 = vrot.slane %v3309_v52, 3 }
0x2412   : > { %v4992_v50 = vpop.f32.mrf.mxu1  ;;  %v3321_v31 = vadd.f32 %v3309_v52, %v3225_v27 }
0x2413   : > { %v3352_v35 = vrot.slane %v3349_v54, 2  ;;  %v3351_v30 = vrot.slane %v3349_v54, 1  ;;  %v3353_v29 = vrot.slane %v3349_v54, 3  ;;  %v3322_v18 = vadd.f32 %v3314_v32, %v3226_v1 }
0x2414   : > { %v3323_v55 = vadd.f32 %v3315_v59, %v3227_v37  ;;  %v3324_v50 = vadd.f32 %v3316_v51, %v3228_v60  ;;  %v4747_v26 = vmul.f32 -1.442695, %v3321_v31 }
0x2415   : > { %3358 = vrot.lane.b32.xlu0 %v3352_v35, %s5590_s23  ;;  %3356 = vrot.lane.b32.xlu1 %v3351_v30, %s5590_s23  ;;  %v4748_v19 = vmul.f32 -1.442695, %v3322_v18 }
0x2416   : > { %v4749_v35 = vmul.f32 -1.442695, %v3323_v55  ;;  %v4750_v30 = vmul.f32 -1.442695, %v3324_v50 }
0x2417   : > { %5391 = vpow2.f32 %v4748_v19 }
0x2418   : > { %5393 = vpow2.f32 %v4749_v35 }
0x2419   : > { %3360 = vrot.lane.b32.xlu0 %v3353_v29, %s5590_s23  ;;  %3354 = vrot.lane.b32.xlu1 %v3349_v54, %s5590_s23  ;;  %5395 = vpow2.f32 %v4747_v26 }
0x241a   : > { %5397 = vpow2.f32 %v4750_v30 }
0x2424   : > { %v5392_v54 = vpop.eup %5391 }
0x2425   : > { %v5394_v29 = vpop.eup %5393  ;;  %v3338_v11 = vadd.f32 1.0, %v5392_v54 }
0x2426   : > { %v5396_v23 = vpop.eup %5395  ;;  %v3339_v53 = vadd.f32 1.0, %v5394_v29 }
0x2427   : > { %v5398_v32 = vpop.eup %5397  ;;  %v3337_v58 = vadd.f32 1.0, %v5396_v23  ;;  %5399 = vrcp.f32 %v3338_v11 }
0x2428   : > { %v3340_v59 = vadd.f32 1.0, %v5398_v32  ;;  %5401 = vrcp.f32 %v3339_v53 }
0x2429   : > { %5403 = vrcp.f32 %v3337_v58 }
0x242a   : > { %5405 = vrcp.f32 %v3340_v59 }
0x2434   : > { %v5400_v52 = vpop.eup %5399 }
0x2435   : > { %v5402_v18 = vpop.eup %5401 }
0x2436   : > { %v5404_v26 = vpop.eup %5403 }
0x2437   : > { %v5406_v50 = vpop.eup %5405 }
0x2487   : > { %v3359_v51 = vpop.permute.xlu0 %3358  ;;  %v3357_v55 = vpop.permute.xlu1 %3356 }
0x2488   : > { %v3368_v31 = vmul.f32 %v5402_v18, %v3359_v51  ;;  %v3367_v19 = vmul.f32 %v5400_v52, %v3357_v55 }
0x248a   : > { %3378 = vrot.lane.b32.xlu0 %v3368_v31, %s5590_s23  ;;  %3376 = vrot.lane.b32.xlu1 %v3367_v19, %s5590_s23 }
0x248b   : > { %v3361_v35 = vpop.permute.xlu0 %3360  ;;  %v3355_v30 = vpop.permute.xlu1 %3354 }
0x248c   : > { %v3369_v23 = vmul.f32 %v5406_v50, %v3361_v35  ;;  %v3366_v11 = vmul.f32 %v5404_v26, %v3355_v30 }
0x248e   : > { %3380 = vrot.lane.b32.xlu0 %v3369_v23, %s5590_s23  ;;  %3374 = vrot.lane.b32.xlu1 %v3366_v11, %s5590_s23 }
0x24fc   : > { %v3379_v58 = vpop.permute.xlu0 %3378  ;;  %v3377_v53 = vpop.permute.xlu1 %3376 }
0x24fd   : > { %v3388_v54 = vadd.f32 %v3379_v58, %v3227_v37  ;;  %v3387_v29 = vadd.f32 %v3377_v53, %v3226_v1 }
0x24ff   : > { %5407 = vtanh.f32 %v3388_v54 }
0x2500   : > { %5409 = vtanh.f32 %v3387_v29  ;;  %v3381_v32 = vpop.permute.xlu0 %3380  ;;  %v3375_v59 = vpop.permute.xlu1 %3374 }
0x2501   : > { %v3389_v51 = vadd.f32 %v3381_v32, %v3228_v60  ;;  %v3386_v55 = vadd.f32 %v3375_v59, %v3225_v27 }
0x2503   : > { %5411 = vtanh.f32 %v3389_v51 }
0x2504   : > { %5413 = vtanh.f32 %v3386_v55 }
0x250c   : > { %v5408_v31 = vpop.eup %5407 }
0x250d   : > { %v5410_v19 = vpop.eup %5409  ;;  %v3396_v35 = vsub.f32 %v6378_v34, %v5408_v31 }
0x250e   : > { %v3395_v30 = vsub.f32 %v6376_v57, %v5410_v19 }
0x250f   : > { %3406 = vrot.lane.b32.xlu0 %v3396_v35, %s5592_s12 }
0x2510   : > { %v5412_v23 = vpop.eup %5411  ;;  %3404 = vrot.lane.b32.xlu1 %v3395_v30, %s5592_s12 }
0x2511   : > { %v5414_v1 = vpop.eup %5413  ;;  %v3397_v37 = vsub.f32 %v6380_v17, %v5412_v23 }
0x2512   : > { %v3394_v11 = vsub.f32 %v6383_v48, %v5414_v1 }
0x2513   : > { %3408 = vrot.lane.b32.xlu0 %v3397_v37, %s5592_s12 }
0x2514   : > { %3402 = vrot.lane.b32.xlu1 %v3394_v11, %s5592_s12 }
0x2581   : > { %v3407_v27 = vpop.permute.xlu0 %3406 }
0x2582   : > { %v3416_v60 = vmul.f32 %v5402_v18, %v3407_v27  ;;  %v3405_v58 = vpop.permute.xlu1 %3404 }
0x2583   : > { %v3415_v53 = vmul.f32 %v5400_v52, %v3405_v58 }
0x2584   : > { %3426 = vrot.lane.b32.xlu0 %v3416_v60, %s5591_s11 }
0x2585   : > { %3424 = vrot.lane.b32.xlu1 %v3415_v53, %s5591_s11  ;;  %v3409_v54 = vpop.permute.xlu0 %3408 }
0x2586   : > { %v3417_v29 = vmul.f32 %v5406_v50, %v3409_v54  ;;  %v3403_v32 = vpop.permute.xlu1 %3402 }
0x2587   : > { %v3414_v59 = vmul.f32 %v5404_v26, %v3403_v32 }
0x2588   : > { %3428 = vrot.lane.b32.xlu0 %v3417_v29, %s5591_s11 }
0x2589   : > { %3422 = vrot.lane.b32.xlu1 %v3414_v59, %s5591_s11 }
0x25f6   : > { %v3427_v51 = vpop.permute.xlu0 %3426 }
0x25f7   : > { %v3425_v55 = vpop.permute.xlu1 %3424  ;;  %v6430_v30 = vadd.f32 %v5408_v31, %v3427_v51  ;;  %v3483_v51 = vld [vmem:[%s5721_s5 + $0x1c] sm:$0x1] }
0x25f8   : > { %v6428_v35 = vadd.f32 %v5410_v19, %v3425_v55 }
0x25f9   : > { %7178 = vst [vmem:[#allocation22_spill] sm:$0xff] %v6430_v30  ;;  %v3492_v26 = vrot.slane %v6430_v30, 6 }
0x25fa   : > { %v3429_v18 = vpop.permute.xlu0 %3428  ;;  %v3490_v11 = vrot.slane %v6428_v35, 7 }
0x25fb   : > { %v6432_v52 = vadd.f32 %v5412_v23, %v3429_v18  ;;  %v3423_v37 = vpop.permute.xlu1 %3422  ;;  %v3484_v18 = vld [vmem:[%s5721_s5 + $0x2c] sm:$0x1] }
0x25fc   : > { %v6435_v27 = vadd.f32 %v5414_v1, %v3423_v37 }
0x25fd   : > { %v3494_v50 = vrot.slane %v6432_v52, 5 }
0x25fe   : > { %v3491_v60 = vsel %vm558_vm3, %v3490_v11, %v6435_v27  ;;  %v3482_v11 = vld [vmem:[%s5721_s5 + $0xc] sm:$0x1] }
0x25ff   : > { %v3493_v19 = vsel %vm561_vm4, %v3492_v26, %v3491_v60  ;;  %v3485_v60 = vld [vmem:[%s5721_s5 + $0x3c] sm:$0x1] }
0x2600   : > { %v3495_v31 = vsel %vm564_vm5, %v3494_v50, %v3493_v19 }
0x2601   : > { %3496 = vrot.lane.b32.xlu1 %v3495_v31, %s5590_s23 }
0x2673   : > { %v3497_v23 = vpop.permute.xlu1 %3496 }
0x2674   : > { %5002 = vmatmul.mubr.msk.f32.vlgmr.msra.gmra.mxu0 %vm390_vm2, %v3497_v23 }
0x2675   : > { %5016 = vmatpush3.msra.mxu0 %v6272_v21  ;;  %5023 = vmatprep.mubr.msk.f32.mxu0 %vm5589_vm1, %v7177_v56 }
0x2676   : > { %5017 = vmatprep.subr.mxu0 %v7177_v56 }
0x2677   : > { %5018 = vmatpush3.msra.mxu0 %v6281_v22 }
0x2678   : > { %5019 = vmatprep.subr.mxu0 %v7177_v56 }
0x2679   : > { %5020 = vmatpush3.msra.mxu0 %v6288_v33 }
0x267a   : > { %5021 = vmatprep.subr.mxu0 %v7177_v56 }
0x267b   : > { %5022 = vmatpush3.msra.mxu0 %v6295_v25 }
0x2734   : > { %v3566_v1 = vpop.f32.mrf.mxu0 }
0x2735   : > { %v3606_v58 = vadd.f32 %v3566_v1, %v5788_v24  ;;  %v3571_v59 = vrot.slane %v3566_v1, 1  ;;  %v3572_v55 = vrot.slane %v3566_v1, 2  ;;  %v3573_v26 = vrot.slane %v3566_v1, 3 }
0x2736   : > { %v5003_v53 = vpop.f32.mrf.mxu0  ;;  %v3578_v19 = vadd.f32 %v3566_v1, %v3482_v11 }
0x2737   : > { %v3609_v54 = vrot.slane %v3606_v58, 2  ;;  %v3608_v29 = vrot.slane %v3606_v58, 1  ;;  %v3610_v32 = vrot.slane %v3606_v58, 3  ;;  %v3579_v37 = vadd.f32 %v3571_v59, %v3483_v51 }
0x2738   : > { %v3580_v50 = vadd.f32 %v3572_v55, %v3484_v18  ;;  %v3581_v23 = vadd.f32 %v3573_v26, %v3485_v60 }
0x2739   : > { %3615 = vrot.lane.b32.xlu1 %v3609_v54, %s5590_s23  ;;  %3613 = vrot.lane.b32.xlu0 %v3608_v29, %s5590_s23  ;;  %v4753_v31 = vmul.f32 -1.442695, %v3579_v37  ;;  %v4752_v54 = vmul.f32 -1.442695, %v3578_v19 }
0x273a   : > { %v4754_v53 = vmul.f32 -1.442695, %v3580_v50  ;;  %v4755_v29 = vmul.f32 -1.442695, %v3581_v23 }
0x273b   : > { %5415 = vpow2.f32 %v4753_v31 }
0x273c   : > { %5417 = vpow2.f32 %v4754_v53 }
0x273d   : > { %3617 = vrot.lane.b32.xlu1 %v3610_v32, %s5590_s23  ;;  %3611 = vrot.lane.b32.xlu0 %v3606_v58, %s5590_s23  ;;  %5419 = vpow2.f32 %v4752_v54 }
0x273e   : > { %5421 = vpow2.f32 %v4755_v29 }
0x2748   : > { %v5416_v58 = vpop.eup %5415 }
0x2749   : > { %v5418_v32 = vpop.eup %5417  ;;  %v3595_v34 = vadd.f32 1.0, %v5416_v58 }
0x274a   : > { %v5420_v48 = vpop.eup %5419  ;;  %v3596_v17 = vadd.f32 1.0, %v5418_v32 }
0x274b   : > { %v5422_v59 = vpop.eup %5421  ;;  %v3594_v57 = vadd.f32 1.0, %v5420_v48  ;;  %5423 = vrcp.f32 %v3595_v34 }
0x274c   : > { %v3597_v55 = vadd.f32 1.0, %v5422_v59  ;;  %5425 = vrcp.f32 %v3596_v17 }
0x274d   : > { %5427 = vrcp.f32 %v3594_v57 }
0x274e   : > { %5429 = vrcp.f32 %v3597_v55 }
0x2758   : > { %v5424_v1 = vpop.eup %5423 }
0x2759   : > { %v5426_v37 = vpop.eup %5425 }
0x275a   : > { %v5428_v23 = vpop.eup %5427 }
0x275b   : > { %v5430_v53 = vpop.eup %5429 }
0x27ab   : > { %v3616_v26 = vpop.permute.xlu1 %3615  ;;  %v3614_v50 = vpop.permute.xlu0 %3613 }
0x27ac   : > { %v3625_v19 = vmul.f32 %v5426_v37, %v3616_v26  ;;  %v3624_v31 = vmul.f32 %v5424_v1, %v3614_v50 }
0x27ae   : > { %3635 = vrot.lane.b32.xlu1 %v3625_v19, %s5590_s23  ;;  %3633 = vrot.lane.b32.xlu0 %v3624_v31, %s5590_s23 }
0x27af   : > { %v3618_v54 = vpop.permute.xlu1 %3617  ;;  %v3612_v29 = vpop.permute.xlu0 %3611 }
0x27b0   : > { %v3626_v48 = vmul.f32 %v5430_v53, %v3618_v54  ;;  %v3623_v34 = vmul.f32 %v5428_v23, %v3612_v29 }
0x27b2   : > { %3637 = vrot.lane.b32.xlu1 %v3626_v48, %s5590_s23  ;;  %3631 = vrot.lane.b32.xlu0 %v3623_v34, %s5590_s23 }
0x2820   : > { %v3636_v57 = vpop.permute.xlu1 %3635  ;;  %v3634_v17 = vpop.permute.xlu0 %3633 }
0x2821   : > { %v3645_v58 = vadd.f32 %v3636_v57, %v3484_v18  ;;  %v3644_v32 = vadd.f32 %v3634_v17, %v3483_v51 }
0x2823   : > { %5431 = vtanh.f32 %v3645_v58 }
0x2824   : > { %5433 = vtanh.f32 %v3644_v32  ;;  %v3638_v59 = vpop.permute.xlu1 %3637  ;;  %v3632_v55 = vpop.permute.xlu0 %3631 }
0x2825   : > { %v3646_v26 = vadd.f32 %v3638_v59, %v3485_v60  ;;  %v3643_v50 = vadd.f32 %v3632_v55, %v3482_v11 }
0x2827   : > { %5435 = vtanh.f32 %v3646_v26 }
0x2828   : > { %5437 = vtanh.f32 %v3643_v50 }
0x2830   : > { %v5432_v19 = vpop.eup %5431 }
0x2831   : > { %v5434_v31 = vpop.eup %5433  ;;  %v3653_v54 = vsub.f32 %v6430_v30, %v5432_v19 }
0x2832   : > { %v3652_v29 = vsub.f32 %v6428_v35, %v5434_v31 }
0x2833   : > { %3663 = vrot.lane.b32.xlu1 %v3653_v54, %s5592_s12 }
0x2834   : > { %v5436_v48 = vpop.eup %5435  ;;  %3661 = vrot.lane.b32.xlu0 %v3652_v29, %s5592_s12 }
0x2835   : > { %v5438_v51 = vpop.eup %5437  ;;  %v3654_v18 = vsub.f32 %v6432_v52, %v5436_v48 }
0x2836   : > { %v3651_v34 = vsub.f32 %v6435_v27, %v5438_v51 }
0x2837   : > { %3665 = vrot.lane.b32.xlu1 %v3654_v18, %s5592_s12 }
0x2838   : > { %3659 = vrot.lane.b32.xlu0 %v3651_v34, %s5592_s12 }
0x28a5   : > { %v3664_v11 = vpop.permute.xlu1 %3663 }
0x28a6   : > { %v3673_v60 = vmul.f32 %v5426_v37, %v3664_v11  ;;  %v3662_v57 = vpop.permute.xlu0 %3661 }
0x28a7   : > { %v3672_v17 = vmul.f32 %v5424_v1, %v3662_v57 }
0x28a8   : > { %3683 = vrot.lane.b32.xlu1 %v3673_v60, %s5591_s11 }
0x28a9   : > { %3681 = vrot.lane.b32.xlu0 %v3672_v17, %s5591_s11  ;;  %v3666_v58 = vpop.permute.xlu1 %3665 }
0x28aa   : > { %v3674_v32 = vmul.f32 %v5430_v53, %v3666_v58  ;;  %v3660_v59 = vpop.permute.xlu0 %3659 }
0x28ab   : > { %v3671_v55 = vmul.f32 %v5428_v23, %v3660_v59 }
0x28ac   : > { %3685 = vrot.lane.b32.xlu1 %v3674_v32, %s5591_s11  ;;  %v3741_v32 = vld [vmem:[%s5721_s5 + $0x2d] sm:$0x1] }
0x28ad   : > { %3679 = vrot.lane.b32.xlu0 %v3671_v55, %s5591_s11  ;;  %v3739_v55 = vld [vmem:[%s5721_s5 + $0xd] sm:$0x1] }
0x291a   : > { %v3684_v26 = vpop.permute.xlu1 %3683 }
0x291b   : > { %v3682_v50 = vpop.permute.xlu0 %3681  ;;  %v6481_v29 = vadd.f32 %v5432_v19, %v3684_v26 }
0x291c   : > { %v6479_v54 = vadd.f32 %v5434_v31, %v3682_v50 }
0x291d   : > { %7179 = vst [vmem:[#allocation23_spill] sm:$0xff] %v6481_v29  ;;  %v3749_v23 = vrot.slane %v6481_v29, 6 }
0x291e   : > { %v3686_v37 = vpop.permute.xlu1 %3685  ;;  %v3747_v34 = vrot.slane %v6479_v54, 7 }
0x291f   : > { %v6483_v1 = vadd.f32 %v5436_v48, %v3686_v37  ;;  %v3680_v18 = vpop.permute.xlu0 %3679  ;;  %v3742_v37 = vld [vmem:[%s5721_s5 + $0x3d] sm:$0x1] }
0x2920   : > { %v6486_v11 = vadd.f32 %v5438_v51, %v3680_v18 }
0x2921   : > { %v3751_v53 = vrot.slane %v6483_v1, 5 }
0x2922   : > { %7180 = vst [vmem:[#allocation24_spill] sm:$0xff] %v6486_v11  ;;  %v3748_v60 = vsel %vm558_vm3, %v3747_v34, %v6486_v11 }
0x2923   : > { %v3750_v31 = vsel %vm561_vm4, %v3749_v23, %v3748_v60 }
0x2924   : > { %v3752_v19 = vsel %vm564_vm5, %v3751_v53, %v3750_v31 }
0x2925   : > { %3753 = vrot.lane.b32.xlu0 %v3752_v19, %s5590_s23 }
0x2997   : > { %v3754_v48 = vpop.permute.xlu0 %3753 }
0x2998   : > { %5013 = vmatmul.mubr.msk.f32.vlgmr.msra.gmra.mxu1 %vm390_vm2, %v3754_v48 }
0x2999   : > { %5027 = vmatpush3.msra.mxu1 %v6272_v21  ;;  %5034 = vmatprep.mubr.msk.f32.mxu1 %vm5589_vm1, %v7177_v56 }
0x299a   : > { %5028 = vmatprep.subr.mxu1 %v7177_v56 }
0x299b   : > { %5029 = vmatpush3.msra.mxu1 %v6281_v22 }
0x299c   : > { %5030 = vmatprep.subr.mxu1 %v7177_v56 }
0x299d   : > { %5031 = vmatpush3.msra.mxu1 %v6288_v33 }
0x299e   : > { %5032 = vmatprep.subr.mxu1 %v7177_v56  ;;  %v3740_v56 = vld [vmem:[%s5721_s5 + $0x1d] sm:$0x1] }
0x299f   : > { %5033 = vmatpush3.msra.mxu1 %v6295_v25 }
0x2a58   : > { %v3823_v51 = vpop.f32.mrf.mxu1 }
0x2a59   : > { %v3863_v21 = vadd.f32 %v3823_v51, %v5788_v24  ;;  %v3828_v33 = vrot.slane %v3823_v51, 1  ;;  %v3829_v25 = vrot.slane %v3823_v51, 2  ;;  %v3830_v26 = vrot.slane %v3823_v51, 3 }
0x2a5a   : > { %v5014_v57 = vpop.f32.mrf.mxu1  ;;  %v3835_v18 = vadd.f32 %v3823_v51, %v3739_v55 }
0x2a5b   : > { %v3866_v17 = vrot.slane %v3863_v21, 2  ;;  %v3865_v58 = vrot.slane %v3863_v21, 1  ;;  %v3867_v22 = vrot.slane %v3863_v21, 3  ;;  %v3836_v59 = vadd.f32 %v3828_v33, %v3740_v56 }
0x2a5c   : > { %v3837_v50 = vadd.f32 %v3829_v25, %v3741_v32  ;;  %v3838_v23 = vadd.f32 %v3830_v26, %v3742_v37  ;;  %v4757_v60 = vmul.f32 -1.442695, %v3835_v18 }
0x2a5d   : > { %3872 = vrot.lane.b32.xlu0 %v3866_v17, %s5590_s23  ;;  %3870 = vrot.lane.b32.xlu1 %v3865_v58, %s5590_s23  ;;  %v4758_v34 = vmul.f32 -1.442695, %v3836_v59 }
0x2a5e   : > { %v4759_v53 = vmul.f32 -1.442695, %v3837_v50  ;;  %v4760_v31 = vmul.f32 -1.442695, %v3838_v23 }
0x2a5f   : > { %5439 = vpow2.f32 %v4758_v34 }
0x2a60   : > { %5441 = vpow2.f32 %v4759_v53 }
0x2a61   : > { %3874 = vrot.lane.b32.xlu0 %v3867_v22, %s5590_s23  ;;  %3868 = vrot.lane.b32.xlu1 %v3863_v21, %s5590_s23  ;;  %5443 = vpow2.f32 %v4757_v60 }
0x2a62   : > { %5445 = vpow2.f32 %v4760_v31 }
0x2a6c   : > { %v5440_v19 = vpop.eup %5439 }
0x2a6d   : > { %v5442_v48 = vpop.eup %5441  ;;  %v3852_v21 = vadd.f32 1.0, %v5440_v19 }
0x2a6e   : > { %v5444_v57 = vpop.eup %5443  ;;  %v3853_v17 = vadd.f32 1.0, %v5442_v48 }
0x2a6f   : > { %v5446_v58 = vpop.eup %5445  ;;  %v3851_v22 = vadd.f32 1.0, %v5444_v57  ;;  %5447 = vrcp.f32 %v3852_v21 }
0x2a70   : > { %v3854_v33 = vadd.f32 1.0, %v5446_v58  ;;  %5449 = vrcp.f32 %v3853_v17 }
0x2a71   : > { %5451 = vrcp.f32 %v3851_v22 }
0x2a72   : > { %5453 = vrcp.f32 %v3854_v33 }
0x2a7c   : > { %v5448_v51 = vpop.eup %5447 }
0x2a7d   : > { %v5450_v25 = vpop.eup %5449 }
0x2a7e   : > { %v5452_v34 = vpop.eup %5451 }
0x2a7f   : > { %v5454_v23 = vpop.eup %5453 }
0x2acf   : > { %v3873_v59 = vpop.permute.xlu0 %3872  ;;  %v3871_v26 = vpop.permute.xlu1 %3870 }
0x2ad0   : > { %v3882_v50 = vmul.f32 %v5450_v25, %v3873_v59  ;;  %v3881_v18 = vmul.f32 %v5448_v51, %v3871_v26 }
0x2ad2   : > { %3892 = vrot.lane.b32.xlu0 %v3882_v50, %s5590_s23  ;;  %3890 = vrot.lane.b32.xlu1 %v3881_v18, %s5590_s23 }
0x2ad3   : > { %v3875_v53 = vpop.permute.xlu0 %3874  ;;  %v3869_v60 = vpop.permute.xlu1 %3868 }
0x2ad4   : > { %v3883_v31 = vmul.f32 %v5454_v23, %v3875_v53  ;;  %v3880_v19 = vmul.f32 %v5452_v34, %v3869_v60 }
0x2ad6   : > { %3894 = vrot.lane.b32.xlu0 %v3883_v31, %s5590_s23  ;;  %3888 = vrot.lane.b32.xlu1 %v3880_v19, %s5590_s23 }
0x2b44   : > { %v3893_v48 = vpop.permute.xlu0 %3892  ;;  %v3891_v21 = vpop.permute.xlu1 %3890 }
0x2b45   : > { %v3902_v57 = vadd.f32 %v3893_v48, %v3741_v32  ;;  %v3901_v17 = vadd.f32 %v3891_v21, %v3740_v56 }
0x2b47   : > { %5455 = vtanh.f32 %v3902_v57 }
0x2b48   : > { %5457 = vtanh.f32 %v3901_v17  ;;  %v3895_v58 = vpop.permute.xlu0 %3894  ;;  %v3889_v22 = vpop.permute.xlu1 %3888 }
0x2b49   : > { %v3903_v33 = vadd.f32 %v3895_v58, %v3742_v37  ;;  %v3900_v59 = vadd.f32 %v3889_v22, %v3739_v55 }
0x2b4b   : > { %5459 = vtanh.f32 %v3903_v33 }
0x2b4c   : > { %5461 = vtanh.f32 %v3900_v59 }
0x2b54   : > { %v5456_v26 = vpop.eup %5455 }
0x2b55   : > { %v5458_v50 = vpop.eup %5457  ;;  %v3910_v18 = vsub.f32 %v6481_v29, %v5456_v26 }
0x2b56   : > { %v3909_v53 = vsub.f32 %v6479_v54, %v5458_v50 }
0x2b57   : > { %3920 = vrot.lane.b32.xlu0 %v3910_v18, %s5592_s12 }
0x2b58   : > { %v5460_v60 = vpop.eup %5459  ;;  %3918 = vrot.lane.b32.xlu1 %v3909_v53, %s5592_s12 }
0x2b59   : > { %v5462_v56 = vpop.eup %5461  ;;  %v3911_v32 = vsub.f32 %v6483_v1, %v5460_v60 }
0x2b5a   : > { %v3908_v31 = vsub.f32 %v6486_v11, %v5462_v56 }
0x2b5b   : > { %3922 = vrot.lane.b32.xlu0 %v3911_v32, %s5592_s12 }
0x2b5c   : > { %3916 = vrot.lane.b32.xlu1 %v3908_v31, %s5592_s12 }
0x2bc9   : > { %v3921_v55 = vpop.permute.xlu0 %3920 }
0x2bca   : > { %v3930_v37 = vmul.f32 %v5450_v25, %v3921_v55  ;;  %v3919_v19 = vpop.permute.xlu1 %3918 }
0x2bcb   : > { %v3929_v48 = vmul.f32 %v5448_v51, %v3919_v19 }
0x2bcc   : > { %3940 = vrot.lane.b32.xlu0 %v3930_v37, %s5591_s11 }
0x2bcd   : > { %3938 = vrot.lane.b32.xlu1 %v3929_v48, %s5591_s11  ;;  %v3923_v21 = vpop.permute.xlu0 %3922 }
0x2bce   : > { %v3931_v57 = vmul.f32 %v5454_v23, %v3923_v21  ;;  %v3917_v17 = vpop.permute.xlu1 %3916 }
0x2bcf   : > { %v3928_v58 = vmul.f32 %v5452_v34, %v3917_v17 }
0x2bd0   : > { %3942 = vrot.lane.b32.xlu0 %v3931_v57, %s5591_s11 }
0x2bd1   : > { %3936 = vrot.lane.b32.xlu1 %v3928_v58, %s5591_s11  ;;  %v3997_v58 = vld [vmem:[%s5721_s5 + $0x1e] sm:$0x1] }
0x2c3e   : > { %v3941_v22 = vpop.permute.xlu0 %3940 }
0x2c3f   : > { %v3939_v33 = vpop.permute.xlu1 %3938  ;;  %v6532_v18 = vadd.f32 %v5456_v26, %v3941_v22 }
0x2c40   : > { %v6530_v59 = vadd.f32 %v5458_v50, %v3939_v33  ;;  %v3998_v33 = vld [vmem:[%s5721_s5 + $0x2e] sm:$0x1] }
0x2c41   : > { %v4006_v34 = vrot.slane %v6532_v18, 6 }
0x2c42   : > { %v3943_v25 = vpop.permute.xlu0 %3942  ;;  %v4004_v32 = vrot.slane %v6530_v59, 7 }
0x2c43   : > { %v6534_v51 = vadd.f32 %v5460_v60, %v3943_v25  ;;  %v3937_v53 = vpop.permute.xlu1 %3936 }
0x2c44   : > { %v6537_v31 = vadd.f32 %v5462_v56, %v3937_v53  ;;  %v3996_v53 = vld [vmem:[%s5721_s5 + $0xe] sm:$0x1] }
0x2c45   : > { %v4008_v23 = vrot.slane %v6534_v51, 5 }
0x2c46   : > { %v4005_v55 = vsel %vm558_vm3, %v4004_v32, %v6537_v31 }
0x2c47   : > { %v4007_v50 = vsel %vm561_vm4, %v4006_v34, %v4005_v55 }
0x2c48   : > { %v4009_v26 = vsel %vm564_vm5, %v4008_v23, %v4007_v50  ;;  %v3999_v23 = vld [vmem:[%s5721_s5 + $0x3e] sm:$0x1] }
0x2c49   : > { %4010 = vrot.lane.b32.xlu1 %v4009_v26, %s5590_s23 }
0x2cbb   : > { %v4011_v60 = vpop.permute.xlu1 %4010 }
0x2cbc   : > { %5024 = vmatmul.mubr.msk.f32.vlgmr.msra.gmra.mxu0 %vm390_vm2, %v4011_v60 }
0x2d7c   : > { %v4080_v56 = vpop.f32.mrf.mxu0 }
0x2d7d   : > { %v4120_v37 = vadd.f32 %v4080_v56, %v5788_v24  ;;  %v4085_v17 = vrot.slane %v4080_v56, 1  ;;  %v4086_v22 = vrot.slane %v4080_v56, 2  ;;  %v4087_v32 = vrot.slane %v4080_v56, 3 }
0x2d7e   : > { %v5025_v19 = vpop.f32.mrf.mxu0  ;;  %v4092_v55 = vadd.f32 %v4080_v56, %v3996_v53 }
0x2d7f   : > { %v4123_v48 = vrot.slane %v4120_v37, 2  ;;  %v4122_v21 = vrot.slane %v4120_v37, 1  ;;  %v4124_v57 = vrot.slane %v4120_v37, 3  ;;  %v4093_v25 = vadd.f32 %v4085_v17, %v3997_v58 }
0x2d80   : > { %v4094_v34 = vadd.f32 %v4086_v22, %v3998_v33  ;;  %v4095_v26 = vadd.f32 %v4087_v32, %v3999_v23  ;;  %v4762_v19 = vmul.f32 -1.442695, %v4092_v55 }
0x2d81   : > { %4129 = vrot.lane.b32.xlu1 %v4123_v48, %s5590_s23  ;;  %4127 = vrot.lane.b32.xlu0 %v4122_v21, %s5590_s23  ;;  %v4763_v50 = vmul.f32 -1.442695, %v4093_v25 }
0x2d82   : > { %v4764_v60 = vmul.f32 -1.442695, %v4094_v34  ;;  %v4765_v48 = vmul.f32 -1.442695, %v4095_v26 }
0x2d83   : > { %5463 = vpow2.f32 %v4763_v50 }
0x2d84   : > { %5465 = vpow2.f32 %v4764_v60 }
0x2d85   : > { %4131 = vrot.lane.b32.xlu1 %v4124_v57, %s5590_s23  ;;  %4125 = vrot.lane.b32.xlu0 %v4120_v37, %s5590_s23  ;;  %5467 = vpow2.f32 %v4762_v19 }
0x2d86   : > { %5469 = vpow2.f32 %v4765_v48 }
0x2d90   : > { %v5464_v37 = vpop.eup %5463 }
0x2d91   : > { %v5466_v21 = vpop.eup %5465  ;;  %v4109_v57 = vadd.f32 1.0, %v5464_v37 }
0x2d92   : > { %v5468_v29 = vpop.eup %5467  ;;  %v4110_v11 = vadd.f32 1.0, %v5466_v21 }
0x2d93   : > { %v5470_v17 = vpop.eup %5469  ;;  %v4108_v30 = vadd.f32 1.0, %v5468_v29  ;;  %5471 = vrcp.f32 %v4109_v57 }
0x2d94   : > { %v4111_v22 = vadd.f32 1.0, %v5470_v17  ;;  %5473 = vrcp.f32 %v4110_v11 }
0x2d95   : > { %5475 = vrcp.f32 %v4108_v30 }
0x2d96   : > { %5477 = vrcp.f32 %v4111_v22 }
0x2da0   : > { %v5472_v56 = vpop.eup %5471 }
0x2da1   : > { %v5474_v25 = vpop.eup %5473 }
0x2da2   : > { %v5476_v26 = vpop.eup %5475 }
0x2da3   : > { %v5478_v60 = vpop.eup %5477 }
0x2df3   : > { %v4130_v32 = vpop.permute.xlu1 %4129  ;;  %v4128_v34 = vpop.permute.xlu0 %4127 }
0x2df4   : > { %v4139_v55 = vmul.f32 %v5474_v25, %v4130_v32  ;;  %v4138_v50 = vmul.f32 %v5472_v56, %v4128_v34 }
0x2df6   : > { %4149 = vrot.lane.b32.xlu1 %v4139_v55, %s5590_s23  ;;  %4147 = vrot.lane.b32.xlu0 %v4138_v50, %s5590_s23 }
0x2df7   : > { %v4132_v19 = vpop.permute.xlu1 %4131  ;;  %v4126_v48 = vpop.permute.xlu0 %4125 }
0x2df8   : > { %v4140_v29 = vmul.f32 %v5478_v60, %v4132_v19  ;;  %v4137_v37 = vmul.f32 %v5476_v26, %v4126_v48 }
0x2dfa   : > { %4151 = vrot.lane.b32.xlu1 %v4140_v29, %s5590_s23  ;;  %4145 = vrot.lane.b32.xlu0 %v4137_v37, %s5590_s23 }
0x2e68   : > { %v4150_v30 = vpop.permute.xlu1 %4149  ;;  %v4148_v11 = vpop.permute.xlu0 %4147 }
0x2e69   : > { %v4159_v21 = vadd.f32 %v4150_v30, %v3998_v33  ;;  %v4158_v57 = vadd.f32 %v4148_v11, %v3997_v58 }
0x2e6b   : > { %5479 = vtanh.f32 %v4159_v21 }
0x2e6c   : > { %5481 = vtanh.f32 %v4158_v57  ;;  %v4152_v17 = vpop.permute.xlu1 %4151  ;;  %v4146_v22 = vpop.permute.xlu0 %4145 }
0x2e6d   : > { %v4160_v32 = vadd.f32 %v4152_v17, %v3999_v23  ;;  %v4157_v34 = vadd.f32 %v4146_v22, %v3996_v53 }
0x2e6f   : > { %5483 = vtanh.f32 %v4160_v32  ;;  %v610_v32 = vld [vmem:[%s5723_s6] sm:$0x1] }
0x2e70   : > { %5485 = vtanh.f32 %v4157_v34  ;;  %v612_v34 = vld [vmem:[%s5723_s6 + $0x20] sm:$0x1] }
0x2e78   : > { %v5480_v55 = vpop.eup %5479 }
0x2e79   : > { %v5482_v50 = vpop.eup %5481  ;;  %v4167_v19 = vsub.f32 %v6532_v18, %v5480_v55 }
0x2e7a   : > { %v4166_v48 = vsub.f32 %v6530_v59, %v5482_v50 }
0x2e7b   : > { %4177 = vrot.lane.b32.xlu1 %v4167_v19, %s5592_s12 }
0x2e7c   : > { %v5484_v29 = vpop.eup %5483  ;;  %4175 = vrot.lane.b32.xlu0 %v4166_v48, %s5592_s12 }
0x2e7d   : > { %v5486_v58 = vpop.eup %5485  ;;  %v4168_v33 = vsub.f32 %v6534_v51, %v5484_v29 }
0x2e7e   : > { %v4165_v23 = vsub.f32 %v6537_v31, %v5486_v58 }
0x2e7f   : > { %4179 = vrot.lane.b32.xlu1 %v4168_v33, %s5592_s12 }
0x2e80   : > { %4173 = vrot.lane.b32.xlu0 %v4165_v23, %s5592_s12 }
0x2eed   : > { %v4178_v53 = vpop.permute.xlu1 %4177 }
0x2eee   : > { %v4187_v37 = vmul.f32 %v5474_v25, %v4178_v53  ;;  %v4176_v30 = vpop.permute.xlu0 %4175 }
0x2eef   : > { %v4186_v11 = vmul.f32 %v5472_v56, %v4176_v30 }
0x2ef0   : > { %4197 = vrot.lane.b32.xlu1 %v4187_v37, %s5591_s11 }
0x2ef1   : > { %4195 = vrot.lane.b32.xlu0 %v4186_v11, %s5591_s11  ;;  %v4180_v21 = vpop.permute.xlu1 %4179 }
0x2ef2   : > { %v4188_v57 = vmul.f32 %v5478_v60, %v4180_v21  ;;  %v4174_v17 = vpop.permute.xlu0 %4173 }
0x2ef3   : > { %v4185_v22 = vmul.f32 %v5476_v26, %v4174_v17 }
0x2ef4   : > { %4199 = vrot.lane.b32.xlu1 %v4188_v57, %s5591_s11  ;;  %v611_v57 = vld [vmem:[%s5723_s6 + $0x10] sm:$0x1] }
0x2ef5   : > { %4193 = vrot.lane.b32.xlu0 %v4185_v22, %s5591_s11  ;;  %v613_v22 = vld [vmem:[%s5723_s6 + $0x30] sm:$0x1] }
0x2ef8   : > { %618 = vrot.lane.b32.xlu1 %v610_v32, %s5590_s23 }
0x2efc   : > { %622 = vrot.lane.b32.xlu1 %v612_v34, %s5590_s23 }
0x2f62   : > { %v4198_v25 = vpop.permute.xlu1 %4197 }
0x2f63   : > { %v4196_v56 = vpop.permute.xlu0 %4195  ;;  %v6578_v48 = vadd.f32 %v5480_v55, %v4198_v25 }
0x2f64   : > { %v6576_v19 = vadd.f32 %v5482_v50, %v4196_v56 }
0x2f65   : > { %v4263_v37 = vrot.slane %v6578_v48, 6 }
0x2f66   : > { %v4200_v60 = vpop.permute.xlu1 %4199  ;;  %v4261_v23 = vrot.slane %v6576_v19, 7 }
0x2f67   : > { %v6580_v33 = vadd.f32 %v5484_v29, %v4200_v60  ;;  %v4194_v26 = vpop.permute.xlu0 %4193 }
0x2f68   : > { %v6583_v53 = vadd.f32 %v5486_v58, %v4194_v26 }
0x2f69   : > { %v4265_v30 = vrot.slane %v6580_v33, 5 }
0x2f6a   : > { %v4262_v50 = vsel %vm558_vm3, %v4261_v23, %v6583_v53  ;;  %v619_v55 = vpop.permute.xlu1 %618  ;;  %v869_v23 = vld [vmem:[%s5723_s6 + $0x11] sm:$0x1] }
0x2f6b   : > { %v630_v11 = vadd.f32 %v619_v55, %v5823_v47  ;;  %v4264_v29 = vsel %vm561_vm4, %v4263_v37, %v4262_v50  ;;  %v868_v47 = vld [vmem:[%s5723_s6 + $0x1] sm:$0x1]  ;;  %v871_v37 = vld [vmem:[%s5723_s6 + $0x31] sm:$0x1] }
0x2f6c   : > { %v4266_v21 = vsel %vm564_vm5, %v4265_v30, %v4264_v29 }
0x2f6d   : > { %4267 = vrot.lane.b32.xlu0 %v4266_v21, %s5590_s23  ;;  %638 = vrot.lane.b32.xlu1 %v630_v11, %s5590_s23 }
0x2f6e   : > { %v623_v58 = vpop.permute.xlu1 %622 }
0x2f6f   : > { %v632_v17 = vadd.f32 %v623_v58, %v5818_v42 }
0x2f71   : > { %620 = vrot.lane.b32.xlu0 %v611_v57, %s5590_s23  ;;  %642 = vrot.lane.b32.xlu1 %v632_v17, %s5590_s23  ;;  %v870_v57 = vld [vmem:[%s5723_s6 + $0x21] sm:$0x1] }
0x2f75   : > { %624 = vrot.lane.b32.xlu0 %v613_v22, %s5590_s23  ;;  %876 = vrot.lane.b32.xlu1 %v868_v47, %s5590_s23 }
0x2fdf   : > { %v4268_v32 = vpop.permute.xlu0 %4267  ;;  %v639_v34 = vpop.permute.xlu1 %638 }
0x2fe0   : > { %651 = vst.msk [vmem:[%s5725_s7] sm:$0x1] %vm650_vm6, %v639_v34  ;;  %5035 = vmatmul.mubr.msk.f32.vlgmr.msra.gmra.mxu1 %vm390_vm2, %v4268_v32  ;;  %v1126_v34 = vld [vmem:[%s5723_s6 + $0x12] sm:$0x1] }
0x2fe3   : > { %v621_v42 = vpop.permute.xlu0 %620  ;;  %v643_v25 = vpop.permute.xlu1 %642 }
0x2fe4   : > { %v631_v56 = vadd.f32 %v621_v42, %v5816_v41  ;;  %653 = vst.msk [vmem:[%s5725_s7 + $0x20] sm:$0x1] %vm650_vm6, %v643_v25 }
0x2fe6   : > { %640 = vrot.lane.b32.xlu0 %v631_v56, %s5590_s23 }
0x2fe7   : > { %v625_v60 = vpop.permute.xlu0 %624  ;;  %v877_v17 = vpop.permute.xlu1 %876 }
0x2fe8   : > { %v633_v26 = vadd.f32 %v625_v60, %v5821_v46  ;;  %v888_v47 = vadd.f32 %v877_v17, %v5875_v9 }
0x2fea   : > { %644 = vrot.lane.b32.xlu0 %v633_v26, %s5590_s23 }
0x2fee   : > { %878 = vrot.lane.b32.xlu0 %v869_v23, %s5590_s23 }
0x2ff2   : > { %882 = vrot.lane.b32.xlu0 %v871_v37, %s5590_s23  ;;  %v1125_v37 = vld [vmem:[%s5723_s6 + $0x2] sm:$0x1] }
0x3058   : > { %v641_v30 = vpop.permute.xlu0 %640 }
0x3059   : > { %652 = vst.msk [vmem:[%s5725_s7 + $0x10] sm:$0x1] %vm650_vm6, %v641_v30 }
0x305c   : > { %v645_v41 = vpop.permute.xlu0 %644 }
0x305d   : > { %654 = vst.msk [vmem:[%s5725_s7 + $0x30] sm:$0x1] %vm650_vm6, %v645_v41  ;;  %v1127_v41 = vld [vmem:[%s5723_s6 + $0x22] sm:$0x1] }
0x3060   : > { %v879_v21 = vpop.permute.xlu0 %878 }
0x3061   : > { %v889_v22 = vadd.f32 %v879_v21, %v5868_v3  ;;  %v1128_v3 = vld [vmem:[%s5723_s6 + $0x32] sm:$0x1]  ;;  %v1385_v21 = vld [vmem:[%s5723_s6 + $0x33] sm:$0x1] }
0x30a0   : > { %v6619_v50 = vpop.f32.mrf.mxu1 }
0x30a1   : > { %v4377_v46 = vadd.f32 %v6619_v50, %v5788_v24  ;;  %v883_v24 = vpop.permute.xlu0 %882 }
0x30a2   : > { %v5036_v55 = vpop.f32.mrf.mxu1  ;;  %v891_v32 = vadd.f32 %v883_v24, %v5872_v6  ;;  %v1382_v24 = vld [vmem:[%s5723_s6 + $0x3] sm:$0x1] }
0x30a3   : > { %4382 = vrot.lane.b32.xlu1 %v4377_v46, %s5590_s23  ;;  %v4380_v11 = vrot.slane %v4377_v46, 2  ;;  %v4379_v29 = vrot.slane %v4377_v46, 1  ;;  %v4381_v58 = vrot.slane %v4377_v46, 3 }
0x30a5   : > { %4386 = vrot.lane.b32.xlu0 %v4380_v11, %s5590_s23 }
0x30a7   : > { %4384 = vrot.lane.b32.xlu1 %v4379_v29, %s5590_s23  ;;  %v1383_v29 = vld [vmem:[%s5723_s6 + $0x13] sm:$0x1] }
0x30a9   : > { %4388 = vrot.lane.b32.xlu0 %v4381_v58, %s5590_s23 }
0x30ab   : > { %880 = vrot.lane.b32.xlu1 %v870_v57, %s5590_s23 }
0x30ad   : > { %898 = vrot.lane.b32.xlu0 %v889_v22, %s5590_s23 }
0x30af   : > { %896 = vrot.lane.b32.xlu1 %v888_v47, %s5590_s23 }
0x30b1   : > { %902 = vrot.lane.b32.xlu0 %v891_v32, %s5590_s23 }
0x30b5   : > { %1135 = vrot.lane.b32.xlu0 %v1126_v34, %s5590_s23 }
0x30b9   : > { %1139 = vrot.lane.b32.xlu0 %v1128_v3, %s5590_s23 }
0x3115   : > { %v6639_v9 = vpop.permute.xlu1 %4382 }
0x3117   : > { %v6641_v42 = vpop.permute.xlu0 %4386 }
0x3119   : > { %v6643_v25 = vpop.permute.xlu1 %4384 }
0x311b   : > { %v6645_v6 = vpop.permute.xlu0 %4388 }
0x311d   : > { %v881_v56 = vpop.permute.xlu1 %880 }
0x311e   : > { %v890_v60 = vadd.f32 %v881_v56, %v5870_v4  ;;  %v1640_v56 = vld [vmem:[%s5723_s6 + $0x14] sm:$0x1] }
0x311f   : > { %v899_v26 = vpop.permute.xlu0 %898 }
0x3120   : > { %909 = vst.msk [vmem:[%s5725_s7 + $0x11] sm:$0x1] %vm650_vm6, %v899_v26  ;;  %900 = vrot.lane.b32.xlu1 %v890_v60, %s5590_s23  ;;  %v1642_v60 = vld [vmem:[%s5723_s6 + $0x34] sm:$0x1]  ;;  %v6690_v26 = vld [vmem:[%s5721_s5 + $0xf] sm:$0x1] }
0x3121   : > { %v897_v23 = vpop.permute.xlu1 %896 }
0x3122   : > { %908 = vst.msk [vmem:[%s5725_s7 + $0x1] sm:$0x1] %vm650_vm6, %v897_v23  ;;  %v6694_v23 = vld [vmem:[%s5721_s5 + $0x2f] sm:$0x1] }
0x3123   : > { %v903_v30 = vpop.permute.xlu0 %902 }
0x3124   : > { %911 = vst.msk [vmem:[%s5725_s7 + $0x31] sm:$0x1] %vm650_vm6, %v903_v30  ;;  %1133 = vrot.lane.b32.xlu1 %v1125_v37, %s5590_s23  ;;  %v4342_v37 = vrot.slane %v6619_v50, 1  ;;  %v4349_v30 = vadd.f32 %v6619_v50, %v6690_v26 }
0x3127   : > { %v1136_v55 = vpop.permute.xlu0 %1135 }
0x3128   : > { %v1146_v4 = vadd.f32 %v1136_v55, %v5920_v39  ;;  %1137 = vrot.lane.b32.xlu1 %v1127_v41, %s5590_s23  ;;  %v4344_v41 = vrot.slane %v6619_v50, 3 }
0x312a   : > { %1155 = vrot.lane.b32.xlu0 %v1146_v4, %s5590_s23  ;;  %v6705_v4 = vld [vmem:[%s5721_s5 + $0x3f] sm:$0x1] }
0x312b   : > { %v1140_v46 = vpop.permute.xlu0 %1139 }
0x312c   : > { %v1148_v11 = vadd.f32 %v1140_v46, %v5924_v44 }
0x312e   : > { %1159 = vrot.lane.b32.xlu0 %v1148_v11, %s5590_s23  ;;  %v4767_v11 = vmul.f32 -1.442695, %v4349_v30  ;;  %v1641_v30 = vld [vmem:[%s5723_s6 + $0x24] sm:$0x1] }
0x3130   : > { %5487 = vpow2.f32 %v4767_v11 }
0x3132   : > { %1392 = vrot.lane.b32.xlu0 %v1383_v29, %s5590_s23  ;;  %v4352_v29 = vadd.f32 %v4344_v41, %v6705_v4 }
0x3136   : > { %1396 = vrot.lane.b32.xlu0 %v1385_v21, %s5590_s23 }
0x3192   : > { %v901_v39 = vpop.permute.xlu1 %900 }
0x3193   : > { %910 = vst.msk [vmem:[%s5725_s7 + $0x21] sm:$0x1] %vm650_vm6, %v901_v39 }
0x3196   : > { %v1134_v58 = vpop.permute.xlu1 %1133 }
0x3197   : > { %v1145_v57 = vadd.f32 %v1134_v58, %v5927_v49  ;;  %v1384_v49 = vld [vmem:[%s5723_s6 + $0x23] sm:$0x1]  ;;  %v4770_v58 = vmul.f32 -1.442695, %v4352_v29 }
0x3199   : > { %1153 = vrot.lane.b32.xlu1 %v1145_v57, %s5590_s23 }
0x319a   : > { %v1138_v44 = vpop.permute.xlu1 %1137 }
0x319b   : > { %v1147_v17 = vadd.f32 %v1138_v44, %v5922_v40 }
0x319c   : > { %v1156_v22 = vpop.permute.xlu0 %1155 }
0x319d   : > { %1166 = vst.msk [vmem:[%s5725_s7 + $0x12] sm:$0x1] %vm650_vm6, %v1156_v22  ;;  %1157 = vrot.lane.b32.xlu1 %v1147_v17, %s5590_s23 }
0x31a0   : > { %v1160_v47 = vpop.permute.xlu0 %1159 }
0x31a1   : > { %1168 = vst.msk [vmem:[%s5725_s7 + $0x32] sm:$0x1] %vm650_vm6, %v1160_v47  ;;  %1390 = vrot.lane.b32.xlu1 %v1382_v24, %s5590_s23 }
0x31a4   : > { %v1393_v32 = vpop.permute.xlu0 %1392 }
0x31a5   : > { %v1403_v40 = vadd.f32 %v1393_v32, %v5972_v8  ;;  %1394 = vrot.lane.b32.xlu1 %v1384_v49, %s5590_s23  ;;  %v4343_v8 = vrot.slane %v6619_v50, 2  ;;  %v5488_v50 = vpop.eup %5487 }
0x31a6   : > { %v4365_v22 = vadd.f32 1.0, %v5488_v50 }
0x31a7   : > { %1412 = vrot.lane.b32.xlu0 %v1403_v40, %s5590_s23  ;;  %v4351_v55 = vadd.f32 %v4343_v8, %v6694_v23 }
0x31a8   : > { %v1397_v34 = vpop.permute.xlu0 %1396 }
0x31a9   : > { %v1405_v3 = vadd.f32 %v1397_v34, %v5976_v12  ;;  %v6700_v12 = vld [vmem:[%s5721_s5 + $0x1f] sm:$0x1]  ;;  %v4769_v21 = vmul.f32 -1.442695, %v4351_v55  ;;  %s4526_s5 = scalar_lea.sflag [#allocation6], %s332_s28 }
0x31aa   : > { %v4350_v46 = vadd.f32 %v4342_v37, %v6700_v12  ;;  %v1639_v37 = vld [vmem:[%s5723_s6 + $0x4] sm:$0x1] }
0x31ab   : > { %1416 = vrot.lane.b32.xlu0 %v1405_v3, %s5590_s23  ;;  %5489 = vpow2.f32 %v4769_v21 }
0x31ac   : > { %v4768_v39 = vmul.f32 -1.442695, %v4350_v46 }
0x31ae   : > { %5491 = vpow2.f32 %v4768_v39 }
0x31af   : > { %1649 = vrot.lane.b32.xlu0 %v1640_v56, %s5590_s23  ;;  %5493 = vpow2.f32 %v4770_v58 }
0x31b0   : > { %5495 = vrcp.f32 %v4365_v22 }
0x31b3   : > { %1653 = vrot.lane.b32.xlu0 %v1642_v60, %s5590_s23 }
0x31b8   : > { %v5490_v17 = vpop.eup %5489 }
0x31b9   : > { %v4367_v49 = vadd.f32 1.0, %v5490_v17 }
0x31bb   : > { %v5492_v24 = vpop.eup %5491  ;;  %5497 = vrcp.f32 %v4367_v49 }
0x31bc   : > { %v5494_v40 = vpop.eup %5493  ;;  %v4366_v34 = vadd.f32 1.0, %v5492_v24 }
0x31bd   : > { %v4368_v56 = vadd.f32 1.0, %v5494_v40 }
0x31be   : > { %5499 = vrcp.f32 %v4366_v34 }
0x31bf   : > { %5501 = vrcp.f32 %v4368_v56 }
0x320b   : > { %v1154_v57 = vpop.permute.xlu1 %1153 }
0x320c   : > { %1165 = vst.msk [vmem:[%s5725_s7 + $0x2] sm:$0x1] %vm650_vm6, %v1154_v57  ;;  %v1897_v57 = vld [vmem:[%s5723_s6 + $0x15] sm:$0x1] }
0x320f   : > { %v1158_v44 = vpop.permute.xlu1 %1157 }
0x3210   : > { %1167 = vst.msk [vmem:[%s5725_s7 + $0x22] sm:$0x1] %vm650_vm6, %v1158_v44 }
0x3213   : > { %v1391_v47 = vpop.permute.xlu1 %1390 }
0x3214   : > { %v1402_v32 = vadd.f32 %v1391_v47, %v5979_v15  ;;  %v1896_v47 = vld [vmem:[%s5723_s6 + $0x5] sm:$0x1] }
0x3216   : > { %1410 = vrot.lane.b32.xlu1 %v1402_v32, %s5590_s23  ;;  %v1898_v32 = vld [vmem:[%s5723_s6 + $0x25] sm:$0x1] }
0x3217   : > { %v1395_v3 = vpop.permute.xlu1 %1394 }
0x3218   : > { %v1404_v60 = vadd.f32 %v1395_v3, %v5974_v10  ;;  %v6726_v10 = vpop.eup %5495 }
0x3219   : > { %v1413_v8 = vpop.permute.xlu0 %1412  ;;  %v4394_v46 = vmul.f32 %v6726_v10, %v6639_v9  ;;  %v6731_v11 = vpop.eup %5497 }
0x321a   : > { %1423 = vst.msk [vmem:[%s5725_s7 + $0x13] sm:$0x1] %vm650_vm6, %v1413_v8  ;;  %1414 = vrot.lane.b32.xlu1 %v1404_v60, %s5590_s23  ;;  %v4396_v29 = vmul.f32 %v6731_v11, %v6641_v42  ;;  %v2154_v60 = vld [vmem:[%s5723_s6 + $0x16] sm:$0x1] }
0x321b   : > { %v2156_v8 = vld [vmem:[%s5723_s6 + $0x36] sm:$0x1] }
0x321d   : > { %v1417_v15 = vpop.permute.xlu0 %1416 }
0x321e   : > { %1425 = vst.msk [vmem:[%s5725_s7 + $0x33] sm:$0x1] %vm650_vm6, %v1417_v15  ;;  %1647 = vrot.lane.b32.xlu1 %v1639_v37, %s5590_s23 }
0x3221   : > { %v1650_v41 = vpop.permute.xlu0 %1649 }
0x3222   : > { %v1660_v55 = vadd.f32 %v1650_v41, %v6044_v61  ;;  %1651 = vrot.lane.b32.xlu1 %v1641_v30, %s5590_s23  ;;  %v6736_v61 = vpop.eup %5499 }
0x3223   : > { %v4395_v21 = vmul.f32 %v6736_v61, %v6643_v25  ;;  %v6741_v9 = vpop.eup %5501  ;;  %v1899_v25 = vld [vmem:[%s5723_s6 + $0x35] sm:$0x1] }
0x3224   : > { %1669 = vrot.lane.b32.xlu0 %v1660_v55, %s5590_s23  ;;  %v4397_v39 = vmul.f32 %v6741_v9, %v6645_v6 }
0x3225   : > { %v1654_v58 = vpop.permute.xlu0 %1653 }
0x3226   : > { %4402 = vrot.lane.b32.xlu1 %v4394_v46, %s5590_s23  ;;  %v1662_v42 = vadd.f32 %v1654_v58, %v6048_v0 }
0x3228   : > { %4406 = vrot.lane.b32.xlu0 %v4396_v29, %s5590_s23  ;;  %v2153_v29 = vld [vmem:[%s5723_s6 + $0x6] sm:$0x1] }
0x322a   : > { %4404 = vrot.lane.b32.xlu1 %v4395_v21, %s5590_s23  ;;  %v2155_v21 = vld [vmem:[%s5723_s6 + $0x26] sm:$0x1] }
0x322c   : > { %4408 = vrot.lane.b32.xlu0 %v4397_v39, %s5590_s23 }
0x3230   : > { %1673 = vrot.lane.b32.xlu0 %v1662_v42, %s5590_s23 }
0x3234   : > { %1906 = vrot.lane.b32.xlu0 %v1897_v57, %s5590_s23 }
0x3238   : > { %1910 = vrot.lane.b32.xlu0 %v1899_v25, %s5590_s23  ;;  %v2411_v25 = vld [vmem:[%s5723_s6 + $0x17] sm:$0x1] }
0x3288   : > { %v1411_v50 = vpop.permute.xlu1 %1410 }
0x3289   : > { %1422 = vst.msk [vmem:[%s5725_s7 + $0x3] sm:$0x1] %vm650_vm6, %v1411_v50  ;;  %v2413_v50 = vld [vmem:[%s5723_s6 + $0x37] sm:$0x1] }
0x328c   : > { %v1415_v6 = vpop.permute.xlu1 %1414 }
0x328d   : > { %1424 = vst.msk [vmem:[%s5725_s7 + $0x23] sm:$0x1] %vm650_vm6, %v1415_v6 }
0x3290   : > { %v1648_v44 = vpop.permute.xlu1 %1647 }
0x3291   : > { %v1659_v0 = vadd.f32 %v1648_v44, %v6051_v5 }
0x3293   : > { %1667 = vrot.lane.b32.xlu1 %v1659_v0, %s5590_s23 }
0x3294   : > { %v1652_v17 = vpop.permute.xlu1 %1651 }
0x3295   : > { %v1661_v22 = vadd.f32 %v1652_v17, %v6046_v62 }
0x3296   : > { %v1670_v24 = vpop.permute.xlu0 %1669 }
0x3297   : > { %1680 = vst.msk [vmem:[%s5725_s7 + $0x14] sm:$0x1] %vm650_vm6, %v1670_v24  ;;  %1671 = vrot.lane.b32.xlu1 %v1661_v22, %s5590_s23  ;;  %v2410_v22 = vld [vmem:[%s5723_s6 + $0x7] sm:$0x1] }
0x3298   : > { %v6781_v37 = vpop.permute.xlu1 %4402  ;;  %v2412_v24 = vld [vmem:[%s5723_s6 + $0x27] sm:$0x1] }
0x329a   : > { %v6764_v49 = vpop.permute.xlu0 %4406 }
0x329b   : > { %1904 = vrot.lane.b32.xlu1 %v1896_v47, %s5590_s23 }
0x329c   : > { %v6783_v15 = vpop.permute.xlu1 %4404 }
0x329e   : > { %v6768_v40 = vpop.permute.xlu0 %4408 }
0x329f   : > { %1908 = vrot.lane.b32.xlu1 %v1898_v32, %s5590_s23 }
0x32a2   : > { %v1674_v5 = vpop.permute.xlu0 %1673 }
0x32a3   : > { %1682 = vst.msk [vmem:[%s5725_s7 + $0x34] sm:$0x1] %vm650_vm6, %v1674_v5 }
0x32a6   : > { %v1907_v62 = vpop.permute.xlu0 %1906 }
0x32a7   : > { %v1917_v34 = vadd.f32 %v1907_v62, %v6096_v2 }
0x32a9   : > { %1926 = vrot.lane.b32.xlu0 %v1917_v34, %s5590_s23  ;;  %v2668_v34 = vld [vmem:[%s5723_s6 + $0x18] sm:$0x1] }
0x32aa   : > { %v1911_v3 = vpop.permute.xlu0 %1910 }
0x32ab   : > { %v1919_v56 = vadd.f32 %v1911_v3, %v6100_v63  ;;  %v2670_v3 = vld [vmem:[%s5723_s6 + $0x38] sm:$0x1] }
0x32ad   : > { %1930 = vrot.lane.b32.xlu0 %v1919_v56, %s5590_s23 }
0x32b1   : > { %2163 = vrot.lane.b32.xlu0 %v2154_v60, %s5590_s23 }
0x32b5   : > { %2167 = vrot.lane.b32.xlu0 %v2156_v8, %s5590_s23 }
0x3305   : > { %v1668_v2 = vpop.permute.xlu1 %1667 }
0x3306   : > { %1679 = vst.msk [vmem:[%s5725_s7 + $0x4] sm:$0x1] %vm650_vm6, %v1668_v2 }
0x3309   : > { %v1672_v63 = vpop.permute.xlu1 %1671 }
0x330a   : > { %1681 = vst.msk [vmem:[%s5725_s7 + $0x24] sm:$0x1] %vm650_vm6, %v1672_v63  ;;  %v2667_v63 = vld [vmem:[%s5723_s6 + $0x8] sm:$0x1] }
0x330d   : > { %v1905_v30 = vpop.permute.xlu1 %1904 }
0x330e   : > { %v1916_v41 = vadd.f32 %v1905_v30, %v6103_v20  ;;  %v4416_v30 = vadd.f32 %v6764_v49, %v6694_v23  ;;  %v7181_v23 = vld [vmem:[#allocation10_spill] sm:$0xff] }
0x3310   : > { %1924 = vrot.lane.b32.xlu1 %v1916_v41, %s5590_s23  ;;  %v2669_v41 = vld [vmem:[%s5723_s6 + $0x28] sm:$0x1]  ;;  %5503 = vtanh.f32 %v4416_v30 }
0x3311   : > { %v1909_v55 = vpop.permute.xlu1 %1908 }
0x3312   : > { %v1918_v46 = vadd.f32 %v1909_v55, %v6098_v7 }
0x3314   : > { %1928 = vrot.lane.b32.xlu1 %v1918_v46, %s5590_s23 }
0x3318   : > { %2161 = vrot.lane.b32.xlu1 %v2153_v29, %s5590_s23 }
0x331b   : > { %v1927_v39 = vpop.permute.xlu0 %1926 }
0x331c   : > { %1937 = vst.msk [vmem:[%s5725_s7 + $0x15] sm:$0x1] %vm650_vm6, %v1927_v39  ;;  %2165 = vrot.lane.b32.xlu1 %v2155_v21, %s5590_s23  ;;  %v7182_v21 = vld [vmem:[#allocation12_spill] sm:$0xff] }
0x331f   : > { %v1931_v20 = vpop.permute.xlu0 %1930 }
0x3320   : > { %1939 = vst.msk [vmem:[%s5725_s7 + $0x35] sm:$0x1] %vm650_vm6, %v1931_v20 }
0x3323   : > { %v2164_v58 = vpop.permute.xlu0 %2163 }
0x3324   : > { %v2174_v7 = vadd.f32 %v2164_v58, %v6148_v36 }
0x3326   : > { %2183 = vrot.lane.b32.xlu0 %v2174_v7, %s5590_s23  ;;  %v2925_v7 = vld [vmem:[%s5723_s6 + $0x19] sm:$0x1] }
0x3327   : > { %v2168_v42 = vpop.permute.xlu0 %2167 }
0x3328   : > { %v2176_v57 = vadd.f32 %v2168_v42, %v6152_v16  ;;  %v2927_v42 = vld [vmem:[%s5723_s6 + $0x39] sm:$0x1] }
0x332a   : > { %2187 = vrot.lane.b32.xlu0 %v2176_v57, %s5590_s23  ;;  %v3182_v57 = vld [vmem:[%s5723_s6 + $0x1a] sm:$0x1] }
0x332e   : > { %2420 = vrot.lane.b32.xlu0 %v2411_v25, %s5590_s23  ;;  %v3184_v25 = vld [vmem:[%s5723_s6 + $0x3a] sm:$0x1] }
0x3332   : > { %2424 = vrot.lane.b32.xlu0 %v2413_v50, %s5590_s23  ;;  %v3439_v50 = vld [vmem:[%s5723_s6 + $0x1b] sm:$0x1] }
0x3382   : > { %v1925_v6 = vpop.permute.xlu1 %1924 }
0x3383   : > { %1936 = vst.msk [vmem:[%s5725_s7 + $0x5] sm:$0x1] %vm650_vm6, %v1925_v6  ;;  %v3441_v6 = vld [vmem:[%s5723_s6 + $0x3b] sm:$0x1] }
0x3386   : > { %v1929_v36 = vpop.permute.xlu1 %1928 }
0x3387   : > { %1938 = vst.msk [vmem:[%s5725_s7 + $0x25] sm:$0x1] %vm650_vm6, %v1929_v36  ;;  %v3696_v36 = vld [vmem:[%s5723_s6 + $0x1c] sm:$0x1] }
0x338a   : > { %v2162_v44 = vpop.permute.xlu1 %2161 }
0x338b   : > { %v2173_v16 = vadd.f32 %v2162_v44, %v6155_v43  ;;  %v3698_v44 = vld [vmem:[%s5723_s6 + $0x3c] sm:$0x1] }
0x338d   : > { %2181 = vrot.lane.b32.xlu1 %v2173_v16, %s5590_s23  ;;  %v3953_v16 = vld [vmem:[%s5723_s6 + $0x1d] sm:$0x1] }
0x338e   : > { %v2166_v0 = vpop.permute.xlu1 %2165 }
0x338f   : > { %v2175_v17 = vadd.f32 %v2166_v0, %v6150_v38  ;;  %v3955_v0 = vld [vmem:[%s5723_s6 + $0x3d] sm:$0x1] }
0x3391   : > { %2185 = vrot.lane.b32.xlu1 %v2175_v17, %s5590_s23  ;;  %v4210_v17 = vld [vmem:[%s5723_s6 + $0x1e] sm:$0x1] }
0x3395   : > { %2418 = vrot.lane.b32.xlu1 %v2410_v22, %s5590_s23  ;;  %v4212_v22 = vld [vmem:[%s5723_s6 + $0x3e] sm:$0x1] }
0x3398   : > { %v2184_v47 = vpop.permute.xlu0 %2183 }
0x3399   : > { %2194 = vst.msk [vmem:[%s5725_s7 + $0x16] sm:$0x1] %vm650_vm6, %v2184_v47  ;;  %2422 = vrot.lane.b32.xlu1 %v2412_v24, %s5590_s23  ;;  %v4467_v24 = vld [vmem:[%s5723_s6 + $0x1f] sm:$0x1]  ;;  %v4414_v47 = vadd.f32 %v6781_v37, %v6690_v26 }
0x339c   : > { %v2188_v43 = vpop.permute.xlu0 %2187 }
0x339d   : > { %2196 = vst.msk [vmem:[%s5725_s7 + $0x36] sm:$0x1] %vm650_vm6, %v2188_v43  ;;  %v4415_v43 = vadd.f32 %v6783_v15, %v6700_v12 }
0x33a0   : > { %v2421_v32 = vpop.permute.xlu0 %2420 }
0x33a1   : > { %v2431_v38 = vadd.f32 %v2421_v32, %v6200_v13 }
0x33a3   : > { %2440 = vrot.lane.b32.xlu0 %v2431_v38, %s5590_s23 }
0x33a4   : > { %v2425_v5 = vpop.permute.xlu0 %2424 }
0x33a5   : > { %v2433_v62 = vadd.f32 %v2425_v5, %v6204_v45 }
0x33a7   : > { %2444 = vrot.lane.b32.xlu0 %v2433_v62, %s5590_s23  ;;  %v7183_v62 = vld [vmem:[#allocation13_spill] sm:$0xff] }
0x33ab   : > { %2677 = vrot.lane.b32.xlu0 %v2668_v34, %s5590_s23 }
0x33af   : > { %2681 = vrot.lane.b32.xlu0 %v2670_v3, %s5590_s23 }
0x33ff   : > { %v2182_v56 = vpop.permute.xlu1 %2181 }
0x3400   : > { %2193 = vst.msk [vmem:[%s5725_s7 + $0x6] sm:$0x1] %vm650_vm6, %v2182_v56  ;;  %v7184_v56 = vld [vmem:[#allocation11_spill] sm:$0xff] }
0x3403   : > { %v2186_v13 = vpop.permute.xlu1 %2185 }
0x3404   : > { %2195 = vst.msk [vmem:[%s5725_s7 + $0x26] sm:$0x1] %vm650_vm6, %v2186_v13 }
0x3407   : > { %v2419_v60 = vpop.permute.xlu1 %2418 }
0x3408   : > { %v2430_v45 = vadd.f32 %v2419_v60, %v6207_v28  ;;  %v4417_v28 = vadd.f32 %v6768_v40, %v6705_v4  ;;  %v6856_v40 = vpop.eup %5503 }
0x3409   : > { %v4424_v39 = vsub.f32 %v6578_v48, %v6856_v40 }
0x340a   : > { %2438 = vrot.lane.b32.xlu1 %v2430_v45, %s5590_s23  ;;  %5505 = vtanh.f32 %v4417_v28  ;;  %v2924_v45 = vld [vmem:[%s5723_s6 + $0x9] sm:$0x1] }
0x340b   : > { %v2423_v8 = vpop.permute.xlu1 %2422  ;;  %5507 = vtanh.f32 %v4414_v47 }
0x340c   : > { %v2432_v2 = vadd.f32 %v2423_v8, %v6202_v14  ;;  %5509 = vtanh.f32 %v4415_v43  ;;  %v4209_v43 = vld [vmem:[%s5723_s6 + $0xe] sm:$0x1] }
0x340e   : > { %2442 = vrot.lane.b32.xlu1 %v2432_v2, %s5590_s23  ;;  %v2926_v2 = vld [vmem:[%s5723_s6 + $0x29] sm:$0x1] }
0x3412   : > { %2675 = vrot.lane.b32.xlu1 %v2667_v63, %s5590_s23 }
0x3415   : > { %v2441_v55 = vpop.permute.xlu0 %2440 }
0x3416   : > { %2451 = vst.msk [vmem:[%s5725_s7 + $0x17] sm:$0x1] %vm650_vm6, %v2441_v55  ;;  %2679 = vrot.lane.b32.xlu1 %v2669_v41, %s5590_s23  ;;  %v3181_v41 = vld [vmem:[%s5723_s6 + $0xa] sm:$0x1] }
0x3417   : > { %v6861_v20 = vpop.eup %5505 }
0x3418   : > { %v4425_v58 = vsub.f32 %v6580_v33, %v6861_v20  ;;  %v6902_v3 = vpop.eup %5507 }
0x3419   : > { %v2445_v14 = vpop.permute.xlu0 %2444  ;;  %v4422_v26 = vsub.f32 %v6583_v53, %v6902_v3  ;;  %v6907_v12 = vpop.eup %5509 }
0x341a   : > { %2453 = vst.msk [vmem:[%s5725_s7 + $0x37] sm:$0x1] %vm650_vm6, %v2445_v14  ;;  %v4423_v37 = vsub.f32 %v6576_v19, %v6907_v12  ;;  %v3183_v14 = vld [vmem:[%s5723_s6 + $0x2a] sm:$0x1] }
0x341d   : > { %v2678_v46 = vpop.permute.xlu0 %2677 }
0x341e   : > { %v2688_v49 = vadd.f32 %v2678_v46, %v7181_v23  ;;  %v4469_v23 = vld [vmem:[%s5723_s6 + $0x3f] sm:$0x1] }
0x3420   : > { %2697 = vrot.lane.b32.xlu0 %v2688_v49, %s5590_s23 }
0x3421   : > { %v2682_v29 = vpop.permute.xlu0 %2681 }
0x3422   : > { %v2690_v4 = vadd.f32 %v2682_v29, %v7182_v21  ;;  %v7185_v29 = vld [vmem:[#allocation14_spill] sm:$0xff] }
0x3424   : > { %2701 = vrot.lane.b32.xlu0 %v2690_v4, %s5590_s23 }
0x3428   : > { %4434 = vrot.lane.b32.xlu0 %v4424_v39, %s5592_s12  ;;  %v7186_v39 = vld [vmem:[#allocation16_spill] sm:$0xff] }
0x342c   : > { %4436 = vrot.lane.b32.xlu0 %v4425_v58, %s5592_s12 }
0x3430   : > { %2934 = vrot.lane.b32.xlu0 %v2925_v7, %s5590_s23  ;;  %v3695_v7 = vld [vmem:[%s5723_s6 + $0xc] sm:$0x1] }
0x3434   : > { %2938 = vrot.lane.b32.xlu0 %v2927_v42, %s5590_s23 }
0x3438   : > { %3191 = vrot.lane.b32.xlu0 %v3182_v57, %s5590_s23  ;;  %v7187_v57 = vld [vmem:[#allocation18_spill] sm:$0xff] }
0x343c   : > { %3195 = vrot.lane.b32.xlu0 %v3184_v25, %s5590_s23 }
0x3440   : > { %3448 = vrot.lane.b32.xlu0 %v3439_v50, %s5590_s23  ;;  %v3697_v50 = vld [vmem:[%s5723_s6 + $0x2c] sm:$0x1] }
0x3444   : > { %3452 = vrot.lane.b32.xlu0 %v3441_v6, %s5590_s23 }
0x3448   : > { %3705 = vrot.lane.b32.xlu0 %v3696_v36, %s5590_s23  ;;  %v7188_v36 = vld [vmem:[#allocation20_spill] sm:$0xff] }
0x344c   : > { %3709 = vrot.lane.b32.xlu0 %v3698_v44, %s5590_s23 }
0x3450   : > { %3962 = vrot.lane.b32.xlu0 %v3953_v16, %s5590_s23  ;;  %v3952_v16 = vld [vmem:[%s5723_s6 + $0xd] sm:$0x1] }
0x3454   : > { %3966 = vrot.lane.b32.xlu0 %v3955_v0, %s5590_s23 }
0x3458   : > { %4219 = vrot.lane.b32.xlu0 %v4210_v17, %s5590_s23 }
0x345c   : > { %4223 = vrot.lane.b32.xlu0 %v4212_v22, %s5590_s23  ;;  %v3954_v22 = vld [vmem:[%s5723_s6 + $0x2d] sm:$0x1] }
0x3460   : > { %4476 = vrot.lane.b32.xlu0 %v4467_v24, %s5590_s23 }
0x347c   : > { %v2439_v32 = vpop.permute.xlu1 %2438 }
0x347d   : > { %2450 = vst.msk [vmem:[%s5725_s7 + $0x7] sm:$0x1] %vm650_vm6, %v2439_v32 }
0x3480   : > { %v2443_v38 = vpop.permute.xlu1 %2442 }
0x3481   : > { %2452 = vst.msk [vmem:[%s5725_s7 + $0x27] sm:$0x1] %vm650_vm6, %v2443_v38 }
0x3484   : > { %v2676_v5 = vpop.permute.xlu1 %2675 }
0x3485   : > { %v2687_v34 = vadd.f32 %v2676_v5, %v7183_v62  ;;  %v4211_v5 = vld [vmem:[%s5723_s6 + $0x2e] sm:$0x1] }
0x3487   : > { %2695 = vrot.lane.b32.xlu1 %v2687_v34, %s5590_s23 }
0x3488   : > { %v2680_v15 = vpop.permute.xlu1 %2679 }
0x3489   : > { %v2689_v13 = vadd.f32 %v2680_v15, %v7184_v56 }
0x348b   : > { %4430 = vrot.lane.b32.xlu1 %v4422_v26, %s5592_s12 }
0x348f   : > { %4432 = vrot.lane.b32.xlu1 %v4423_v37, %s5592_s12 }
0x3492   : > { %v2698_v60 = vpop.permute.xlu0 %2697 }
0x3493   : > { %2708 = vst.msk [vmem:[%s5725_s7 + $0x18] sm:$0x1] %vm650_vm6, %v2698_v60  ;;  %2699 = vrot.lane.b32.xlu1 %v2689_v13, %s5590_s23 }
0x3496   : > { %v2702_v8 = vpop.permute.xlu0 %2701 }
0x3497   : > { %2710 = vst.msk [vmem:[%s5725_s7 + $0x38] sm:$0x1] %vm650_vm6, %v2702_v8  ;;  %2932 = vrot.lane.b32.xlu1 %v2924_v45, %s5590_s23  ;;  %v4466_v45 = vld [vmem:[%s5723_s6 + $0xf] sm:$0x1] }
0x349a   : > { %v4435_v63 = vpop.permute.xlu0 %4434 }
0x349b   : > { %v4444_v30 = vmul.f32 %v6731_v11, %v4435_v63  ;;  %2936 = vrot.lane.b32.xlu1 %v2926_v2, %s5590_s23  ;;  %v3438_v11 = vld [vmem:[%s5723_s6 + $0xb] sm:$0x1]  ;;  %v4468_v2 = vld [vmem:[%s5723_s6 + $0x2f] sm:$0x1]  ;;  %v7189_v63 = vld [vmem:[#allocation17_spill] sm:$0xff] }
0x349d   : > { %4454 = vrot.lane.b32.xlu0 %v4444_v30, %s5591_s11 }
0x349e   : > { %v4437_v55 = vpop.permute.xlu0 %4436 }
0x349f   : > { %v4445_v28 = vmul.f32 %v6741_v9, %v4437_v55  ;;  %3189 = vrot.lane.b32.xlu1 %v3181_v41, %s5590_s23  ;;  %v3440_v9 = vld [vmem:[%s5723_s6 + $0x2b] sm:$0x1] }
0x34a0   : > { %v7190_v55 = vld [vmem:[#allocation15_spill] sm:$0xff] }
0x34a1   : > { %4456 = vrot.lane.b32.xlu0 %v4445_v28, %s5591_s11 }
0x34a2   : > { %v2935_v46 = vpop.permute.xlu0 %2934 }
0x34a3   : > { %3193 = vrot.lane.b32.xlu1 %v3183_v14, %s5590_s23  ;;  %v2945_v21 = vadd.f32 %v2935_v46, %v7185_v29 }
0x34a5   : > { %4480 = vrot.lane.b32.xlu0 %v4469_v23, %s5590_s23  ;;  %v7191_v23 = vld [vmem:[#allocation21_spill] sm:$0xff] }
0x34a6   : > { %v2939_v49 = vpop.permute.xlu0 %2938 }
0x34a7   : > { %3446 = vrot.lane.b32.xlu1 %v3438_v11, %s5590_s23  ;;  %v2947_v58 = vadd.f32 %v2939_v49, %v7186_v39 }
0x34a9   : > { %2954 = vrot.lane.b32.xlu0 %v2945_v21, %s5590_s23 }
0x34aa   : > { %v3192_v4 = vpop.permute.xlu0 %3191 }
0x34ab   : > { %3450 = vrot.lane.b32.xlu1 %v3440_v9, %s5590_s23  ;;  %v3202_v25 = vadd.f32 %v3192_v4, %v7187_v57  ;;  %v7192_v4 = vld [vmem:[#allocation19_spill] sm:$0xff] }
0x34ad   : > { %2958 = vrot.lane.b32.xlu0 %v2947_v58, %s5590_s23 }
0x34ae   : > { %v3196_v42 = vpop.permute.xlu0 %3195 }
0x34af   : > { %3703 = vrot.lane.b32.xlu1 %v3695_v7, %s5590_s23  ;;  %v3204_v44 = vadd.f32 %v3196_v42, %v7188_v36 }
0x34b1   : > { %3211 = vrot.lane.b32.xlu0 %v3202_v25, %s5590_s23  ;;  %v7193_v25 = vld [vmem:[#allocation22_spill] sm:$0xff] }
0x34b2   : > { %v3449_v6 = vpop.permute.xlu0 %3448 }
0x34b3   : > { %3707 = vrot.lane.b32.xlu1 %v3697_v50, %s5590_s23  ;;  %v3459_v17 = vadd.f32 %v3449_v6, %v6428_v35 }
0x34b5   : > { %3215 = vrot.lane.b32.xlu0 %v3204_v44, %s5590_s23  ;;  %v7194_v44 = vld [vmem:[#allocation24_spill] sm:$0xff] }
0x34b6   : > { %v3453_v0 = vpop.permute.xlu0 %3452 }
0x34b7   : > { %3960 = vrot.lane.b32.xlu1 %v3952_v16, %s5590_s23  ;;  %v3461_v47 = vadd.f32 %v3453_v0, %v6432_v52 }
0x34b9   : > { %3468 = vrot.lane.b32.xlu0 %v3459_v17, %s5590_s23  ;;  %v7195_v17 = vld [vmem:[#allocation23_spill] sm:$0xff] }
0x34ba   : > { %v3706_v24 = vpop.permute.xlu0 %3705 }
0x34bb   : > { %3964 = vrot.lane.b32.xlu1 %v3954_v22, %s5590_s23  ;;  %v3716_v38 = vadd.f32 %v3706_v24, %v6479_v54 }
0x34bd   : > { %3472 = vrot.lane.b32.xlu0 %v3461_v47, %s5590_s23 }
0x34be   : > { %v3710_v32 = vpop.permute.xlu0 %3709 }
0x34bf   : > { %4217 = vrot.lane.b32.xlu1 %v4209_v43, %s5590_s23  ;;  %v3718_v62 = vadd.f32 %v3710_v32, %v6483_v1 }
0x34c1   : > { %3725 = vrot.lane.b32.xlu0 %v3716_v38, %s5590_s23 }
0x34c2   : > { %v3963_v35 = vpop.permute.xlu0 %3962 }
0x34c3   : > { %4221 = vrot.lane.b32.xlu1 %v4211_v5, %s5590_s23  ;;  %v3973_v34 = vadd.f32 %v3963_v35, %v6530_v59 }
0x34c5   : > { %3729 = vrot.lane.b32.xlu0 %v3718_v62, %s5590_s23 }
0x34c6   : > { %v3967_v52 = vpop.permute.xlu0 %3966 }
0x34c7   : > { %v3975_v54 = vadd.f32 %v3967_v52, %v6534_v51 }
0x34c9   : > { %3982 = vrot.lane.b32.xlu0 %v3973_v34, %s5590_s23 }
0x34ca   : > { %v4220_v26 = vpop.permute.xlu0 %4219 }
0x34cb   : > { %v4230_v37 = vadd.f32 %v4220_v26, %v6576_v19 }
0x34cd   : > { %3986 = vrot.lane.b32.xlu0 %v3975_v54, %s5590_s23 }
0x34ce   : > { %v4224_v15 = vpop.permute.xlu0 %4223 }
0x34cf   : > { %v4232_v1 = vadd.f32 %v4224_v15, %v6580_v33 }
0x34d1   : > { %4239 = vrot.lane.b32.xlu0 %v4230_v37, %s5590_s23 }
0x34d2   : > { %v6983_v8 = vpop.permute.xlu0 %4476 }
0x34d5   : > { %4243 = vrot.lane.b32.xlu0 %v4232_v1, %s5590_s23 }
0x34f9   : > { %v2696_v59 = vpop.permute.xlu1 %2695 }
0x34fa   : > { %2707 = vst.msk [vmem:[%s5725_s7 + $0x8] sm:$0x1] %vm650_vm6, %v2696_v59 }
0x34fd   : > { %v4431_v56 = vpop.permute.xlu1 %4430 }
0x34fe   : > { %v4442_v51 = vmul.f32 %v6726_v10, %v4431_v56 }
0x3500   : > { %4450 = vrot.lane.b32.xlu1 %v4442_v51, %s5591_s11 }
0x3501   : > { %v4433_v13 = vpop.permute.xlu1 %4432 }
0x3502   : > { %v4443_v60 = vmul.f32 %v6736_v61, %v4433_v13 }
0x3504   : > { %4452 = vrot.lane.b32.xlu1 %v4443_v60, %s5591_s11 }
0x3505   : > { %v2700_v19 = vpop.permute.xlu1 %2699 }
0x3506   : > { %2709 = vst.msk [vmem:[%s5725_s7 + $0x28] sm:$0x1] %vm650_vm6, %v2700_v19 }
0x3508   : > { %4474 = vrot.lane.b32.xlu1 %v4466_v45, %s5590_s23 }
0x3509   : > { %v2933_v33 = vpop.permute.xlu1 %2932 }
0x350a   : > { %v2944_v30 = vadd.f32 %v2933_v33, %v7189_v63 }
0x350c   : > { %4478 = vrot.lane.b32.xlu1 %v4468_v2, %s5590_s23 }
0x350d   : > { %v2937_v10 = vpop.permute.xlu1 %2936 }
0x350e   : > { %v2946_v28 = vadd.f32 %v2937_v10, %v7190_v55 }
0x350f   : > { %v6988_v41 = vpop.permute.xlu0 %4454 }
0x3510   : > { %2952 = vrot.lane.b32.xlu1 %v2944_v30, %s5590_s23  ;;  %v4464_v15 = vadd.f32 %v6856_v40, %v6988_v41 }
0x3511   : > { %v3190_v61 = vpop.permute.xlu1 %3189 }
0x3512   : > { %v3201_v11 = vadd.f32 %v3190_v61, %v7191_v23  ;;  %v4516_v13 = vrot.slane %v4464_v15, 6 }
0x3513   : > { %v4457_v14 = vpop.permute.xlu0 %4456 }
0x3514   : > { %2956 = vrot.lane.b32.xlu1 %v2946_v28, %s5590_s23  ;;  %v6995_v49 = vadd.f32 %v6861_v20, %v4457_v14 }
0x3515   : > { %v3194_v46 = vpop.permute.xlu1 %3193 }
0x3516   : > { %v3203_v39 = vadd.f32 %v3194_v46, %v7192_v4  ;;  %v4518_v19 = vrot.slane %v6995_v49, 5 }
0x3517   : > { %v4481_v29 = vpop.permute.xlu0 %4480 }
0x3518   : > { %v6998_v21 = vadd.f32 %v4481_v29, %v6995_v49  ;;  %3209 = vrot.lane.b32.xlu1 %v3201_v11, %s5590_s23 }
0x3519   : > { %v3447_v9 = vpop.permute.xlu1 %3446 }
0x351a   : > { %v3458_v20 = vadd.f32 %v3447_v9, %v6435_v27 }
0x351b   : > { %v2955_v58 = vpop.permute.xlu0 %2954 }
0x351c   : > { %2965 = vst.msk [vmem:[%s5725_s7 + $0x19] sm:$0x1] %vm650_vm6, %v2955_v58  ;;  %3213 = vrot.lane.b32.xlu1 %v3203_v39, %s5590_s23 }
0x351d   : > { %v3451_v7 = vpop.permute.xlu1 %3450 }
0x351e   : > { %v3460_v50 = vadd.f32 %v3451_v7, %v7193_v25 }
0x351f   : > { %v2959_v42 = vpop.permute.xlu0 %2958 }
0x3520   : > { %2967 = vst.msk [vmem:[%s5725_s7 + $0x39] sm:$0x1] %vm650_vm6, %v2959_v42  ;;  %3466 = vrot.lane.b32.xlu1 %v3458_v20, %s5590_s23 }
0x3521   : > { %v3704_v57 = vpop.permute.xlu1 %3703 }
0x3522   : > { %v3715_v16 = vadd.f32 %v3704_v57, %v7194_v44 }
0x3523   : > { %v3212_v6 = vpop.permute.xlu0 %3211 }
0x3524   : > { %3222 = vst.msk [vmem:[%s5725_s7 + $0x1a] sm:$0x1] %vm650_vm6, %v3212_v6  ;;  %3470 = vrot.lane.b32.xlu1 %v3460_v50, %s5590_s23 }
0x3525   : > { %v3708_v36 = vpop.permute.xlu1 %3707 }
0x3526   : > { %v3717_v22 = vadd.f32 %v3708_v36, %v7195_v17 }
0x3527   : > { %v3216_v0 = vpop.permute.xlu0 %3215 }
0x3528   : > { %3224 = vst.msk [vmem:[%s5725_s7 + $0x3a] sm:$0x1] %vm650_vm6, %v3216_v0  ;;  %3723 = vrot.lane.b32.xlu1 %v3715_v16, %s5590_s23 }
0x3529   : > { %v3961_v27 = vpop.permute.xlu1 %3960 }
0x352a   : > { %v3972_v43 = vadd.f32 %v3961_v27, %v6537_v31 }
0x352b   : > { %v3469_v24 = vpop.permute.xlu0 %3468 }
0x352c   : > { %3479 = vst.msk [vmem:[%s5725_s7 + $0x1b] sm:$0x1] %vm650_vm6, %v3469_v24  ;;  %3727 = vrot.lane.b32.xlu1 %v3717_v22, %s5590_s23 }
0x352d   : > { %v3965_v47 = vpop.permute.xlu1 %3964 }
0x352e   : > { %v3974_v5 = vadd.f32 %v3965_v47, %v6532_v18 }
0x352f   : > { %v3473_v32 = vpop.permute.xlu0 %3472 }
0x3530   : > { %3481 = vst.msk [vmem:[%s5725_s7 + $0x3b] sm:$0x1] %vm650_vm6, %v3473_v32  ;;  %3980 = vrot.lane.b32.xlu1 %v3972_v43, %s5590_s23 }
0x3531   : > { %v4218_v38 = vpop.permute.xlu1 %4217 }
0x3532   : > { %v4229_v62 = vadd.f32 %v4218_v38, %v6583_v53 }
0x3533   : > { %v3726_v35 = vpop.permute.xlu0 %3725 }
0x3534   : > { %3736 = vst.msk [vmem:[%s5725_s7 + $0x1c] sm:$0x1] %vm650_vm6, %v3726_v35  ;;  %3984 = vrot.lane.b32.xlu1 %v3974_v5, %s5590_s23 }
0x3535   : > { %v4222_v31 = vpop.permute.xlu1 %4221 }
0x3536   : > { %v4231_v34 = vadd.f32 %v4222_v31, %v6578_v48 }
0x3537   : > { %v3730_v52 = vpop.permute.xlu0 %3729 }
0x3538   : > { %3738 = vst.msk [vmem:[%s5725_s7 + $0x3c] sm:$0x1] %vm650_vm6, %v3730_v52  ;;  %4237 = vrot.lane.b32.xlu1 %v4229_v62, %s5590_s23 }
0x353b   : > { %v3983_v26 = vpop.permute.xlu0 %3982 }
0x353c   : > { %3993 = vst.msk [vmem:[%s5725_s7 + $0x1d] sm:$0x1] %vm650_vm6, %v3983_v26  ;;  %4241 = vrot.lane.b32.xlu1 %v4231_v34, %s5590_s23 }
0x353f   : > { %v3987_v18 = vpop.permute.xlu0 %3986 }
0x3540   : > { %3995 = vst.msk [vmem:[%s5725_s7 + $0x3d] sm:$0x1] %vm650_vm6, %v3987_v18 }
0x3543   : > { %v4240_v54 = vpop.permute.xlu0 %4239 }
0x3544   : > { %4250 = vst.msk [vmem:[%s5725_s7 + $0x1e] sm:$0x1] %vm650_vm6, %v4240_v54 }
0x3547   : > { %v4244_v53 = vpop.permute.xlu0 %4243 }
0x3548   : > { %4252 = vst.msk [vmem:[%s5725_s7 + $0x3e] sm:$0x1] %vm650_vm6, %v4244_v53 }
0x3572   : > { %v4451_v37 = vpop.permute.xlu1 %4450 }
0x3573   : > { %v4462_v59 = vadd.f32 %v6902_v3, %v4451_v37 }
0x3576   : > { %v4453_v1 = vpop.permute.xlu1 %4452 }
0x3577   : > { %v4463_v48 = vadd.f32 %v6907_v12, %v4453_v1 }
0x3579   : > { %v4487_v56 = vadd.f32 %v6983_v8, %v4463_v48  ;;  %v4514_v51 = vrot.slane %v4463_v48, 7 }
0x357a   : > { %v4475_v60 = vpop.permute.xlu1 %4474 }
0x357b   : > { %v4515_v45 = vsel %vm558_vm3, %v4514_v51, %v4462_v59  ;;  %v4486_v33 = vadd.f32 %v4475_v60, %v4462_v59  ;;  %4496 = vrot.lane.b32.xlu0 %v4487_v56, %s5590_s23 }
0x357c   : > { %v4517_v40 = vsel %vm561_vm4, %v4516_v13, %v4515_v45 }
0x357d   : > { %4494 = vrot.lane.b32.xlu1 %v4486_v33, %s5590_s23  ;;  %v4519_v3 = vsel %vm564_vm5, %v4518_v19, %v4517_v40 }
0x357e   : > { %v4479_v12 = vpop.permute.xlu1 %4478 }
0x357f   : > { %v4488_v8 = vadd.f32 %v4479_v12, %v4464_v15  ;;  %4500 = vrot.lane.b32.xlu0 %v6998_v21, %s5590_s23 }
0x3581   : > { %4498 = vrot.lane.b32.xlu1 %v4488_v8, %s5590_s23 }
0x3582   : > { %v2953_v2 = vpop.permute.xlu1 %2952 }
0x3583   : > { %2964 = vst.msk [vmem:[%s5725_s7 + $0x9] sm:$0x1] %vm650_vm6, %v2953_v2 }
0x3585   : > { %4520 = vrot.lane.b32.xlu1 %v4519_v3, %s5590_s23 }
0x3586   : > { %v2957_v10 = vpop.permute.xlu1 %2956 }
0x3587   : > { %2966 = vst.msk [vmem:[%s5725_s7 + $0x29] sm:$0x1] %vm650_vm6, %v2957_v10 }
0x358a   : > { %v3210_v63 = vpop.permute.xlu1 %3209 }
0x358b   : > { %3221 = vst.msk [vmem:[%s5725_s7 + $0xa] sm:$0x1] %vm650_vm6, %v3210_v63 }
0x358e   : > { %v3214_v30 = vpop.permute.xlu1 %3213 }
0x358f   : > { %3223 = vst.msk [vmem:[%s5725_s7 + $0x2a] sm:$0x1] %vm650_vm6, %v3214_v30 }
0x3592   : > { %v3467_v41 = vpop.permute.xlu1 %3466 }
0x3593   : > { %3478 = vst.msk [vmem:[%s5725_s7 + $0xb] sm:$0x1] %vm650_vm6, %v3467_v41 }
0x3596   : > { %v3471_v61 = vpop.permute.xlu1 %3470 }
0x3597   : > { %3480 = vst.msk [vmem:[%s5725_s7 + $0x2b] sm:$0x1] %vm650_vm6, %v3471_v61 }
0x359a   : > { %v3724_v55 = vpop.permute.xlu1 %3723 }
0x359b   : > { %3735 = vst.msk [vmem:[%s5725_s7 + $0xc] sm:$0x1] %vm650_vm6, %v3724_v55 }
0x359e   : > { %v3728_v28 = vpop.permute.xlu1 %3727 }
0x359f   : > { %3737 = vst.msk [vmem:[%s5725_s7 + $0x2c] sm:$0x1] %vm650_vm6, %v3728_v28 }
0x35a2   : > { %v3981_v14 = vpop.permute.xlu1 %3980 }
0x35a3   : > { %3992 = vst.msk [vmem:[%s5725_s7 + $0xd] sm:$0x1] %vm650_vm6, %v3981_v14 }
0x35a6   : > { %v3985_v46 = vpop.permute.xlu1 %3984 }
0x35a7   : > { %3994 = vst.msk [vmem:[%s5725_s7 + $0x2d] sm:$0x1] %vm650_vm6, %v3985_v46 }
0x35aa   : > { %v4238_v23 = vpop.permute.xlu1 %4237 }
0x35ab   : > { %4249 = vst.msk [vmem:[%s5725_s7 + $0xe] sm:$0x1] %vm650_vm6, %v4238_v23 }
0x35ae   : > { %v4242_v11 = vpop.permute.xlu1 %4241 }
0x35af   : > { %4251 = vst.msk [vmem:[%s5725_s7 + $0x2e] sm:$0x1] %vm650_vm6, %v4242_v11 }
0x35ed   : > { %v4497_v49 = vpop.permute.xlu0 %4496 }
0x35ee   : > { %4507 = vst.msk [vmem:[%s5725_s7 + $0x1f] sm:$0x1] %vm650_vm6, %v4497_v49 }
0x35ef   : > { %v4495_v29 = vpop.permute.xlu1 %4494 }
0x35f0   : > { %4506 = vst.msk [vmem:[%s5725_s7 + $0xf] sm:$0x1] %vm650_vm6, %v4495_v29 }
0x35f1   : > { %v4501_v21 = vpop.permute.xlu0 %4500 }
0x35f2   : > { %4509 = vst.msk [vmem:[%s5725_s7 + $0x3f] sm:$0x1] %vm650_vm6, %v4501_v21 }
0x35f3   : > { %v4499_v9 = vpop.permute.xlu1 %4498 }
0x35f4   : > { %4508 = vst.msk [vmem:[%s5725_s7 + $0x2f] sm:$0x1] %vm650_vm6, %v4499_v9 }
0x35f7   : > { %v4521_v4 = vpop.permute.xlu1 %4520 }
0x35f8   : > { %4524 = vst.msk [vmem:[#allocation2] sm:$0xf] %vm4523_vm7, %v4521_v4 }
0x35f9   : > { %s4773_s6 = sshll.u32 %s5569_s18, 1  ;;  %s4780_s23 = sshll.u32 %s5573_s19, 4 }
0x35fa   : > { %s4539_s11 = sadd.s32 %s4780_s23, %s4773_s6  ;;  %s4552_s12 = sshll.u32 %s5725_s7, 4  ;;  %s4553_s12 = int_to_ptr.vmem [resolvable:$true] %s4552_s12 }
0x35fb   : > { %s4775_s9 = sshll.u32 %s4539_s11, 7  ;;  %s5593_s14 = smov 256  }
0x35fc   : > { %s4541_s28 = scalar_lea.hbm %s7144_s4, %s4775_s9  ;;  %5037 = sst [smem:[#allocation8]] (%p5685_p8), %s5593_s14 }
0x35fd   : > { %s5594_s24 = smov 512   ;;  %s5595_s27 = smov 2  }
0x35fe   : > { %5038 = sst [smem:[#allocation8 + $0x1]] (%p5685_p8), %s5594_s24  ;;  %s5596_s18 = smov 128  }
0x35ff   : > { %5039 = sst [smem:[#allocation8 + $0x2]] (%p5685_p8), %s5595_s27  ;;  %s5597_s19 = smov 8  }
0x3600   : > { %5040 = sst [smem:[#allocation8 + $0x3]] (%p5685_p8), %s5596_s18  ;;  %s5598_s7 = smov 131072  }
0x3601   : > { %5041 = sst [smem:[#allocation8 + $0x4]] (%p5685_p8), %s5596_s18  ;;  %s5599_s6 = smov 0  }
0x3602   : > { %5042 = sst [smem:[#allocation8 + $0x5]] (%p5685_p8), %s5597_s19 }
0x3603   : > { %5043 = dma.general (%p5685_p8), %s4553_s12, 1024, %s4541_s28, %s4526_s5, %s5598_s7, [#allocation8], %s5599_s6, 0  }
0x3604 PF: > { %p5049_p2 = scmp.ge.s32.totalorder %s5585_s22, 2  ;;  %s4580_s23 = sand.u32 1, %s5557_s15  }
0x3605   : > { %s4581_s11 = scalar_lea.sflag [#allocation6], %s4580_s23 }
0x3606   : > { %p5046_p3 = pnand %p5049_p2, %p5689_p9 }
0x3608   : > { %p5047_p4 = pneg %p5046_p3 }
0x360a   : > { %5552 = dma.done.wait (%p5047_p4), %s4581_s11, 1024  }
0x360b   : > { %5554 = vsyncadd (%p5047_p4), %s4581_s11, 4294966272  ;;  %s17_s22 = sadd.s32 1, %s5585_s22   ;;  %s7196_s15 = smov %s5561_s16 }
0x360c   : > { %p14_p5 = scmp.ge.s32.totalorder %s17_s22, 6   ;;  %s7197_s16 = smov %s5565_s17 }
0x360d   : > { %s7198_s17 = smov %s5697_s8  ;;  %s7199_s18 = smov %s5577_s20 }
0x360e   : > { %s7200_s19 = smov %s5581_s21  ;;  %s7201_s20 = smov %s7204_s25 }
0x360f   : > { %s7202_s21 = smov %s7208_s26  ;;  %16 = sbr.rel (!%p14_p5) target bundleno = 5 (0x5), region = 169 }
0x3614   :  { %4586 = vsyncpa [#allocation6], 1 }
0x3615   :  { %4588 = vsyncpa [#allocation6 + $0x1], 1 }

</bundles_post_ra>
